<compile_context>
chip_gen: v5e
topology: v5e:2x2
jax: 0.10.0
libtpu: 0.0.40
codegen_flags: <defaults>
</compile_context>

<pallas_src>
import functools

import jax
import jax.numpy as jnp
import numpy as np
from jax.experimental import pallas as pl
from jax.experimental.pallas import tpu as pltpu


# ------------------------------------------------------------------ glue ----
def channel_squeeze(x, x_mask, n_sqz=2):
    b, c, t = x.shape
    t = (t // n_sqz) * n_sqz
    x = x[:, :, :t]
    x_sqz = x.reshape(b, c, t // n_sqz, n_sqz)
    x_sqz = jnp.transpose(x_sqz, (0, 3, 1, 2)).reshape(b, c * n_sqz, t // n_sqz)
    x_mask = x_mask[:, :, n_sqz - 1::n_sqz]
    return x_sqz * x_mask, x_mask


def channel_unsqueeze(x, x_mask, n_sqz=2):
    b, c, t = x.shape
    x_unsqz = x.reshape(b, n_sqz, c // n_sqz, t)
    x_unsqz = jnp.transpose(x_unsqz, (0, 2, 3, 1)).reshape(b, c // n_sqz, t * n_sqz)
    x_mask = jnp.repeat(x_mask[:, :, :, None], n_sqz, axis=3).reshape(b, 1, t * n_sqz)
    return x_unsqz * x_mask, x_mask


# -------------------------------------------------------- param folding -----
def _expand_invconv_weight(weight, C, n_split):
    """Expand InvConvNear's (n_split, n_split) grouped 1x1 conv into an
    equivalent (C, C) matrix acting directly on the un-permuted channel axis,
    absorbing the torch view/permute/view shuffles (so the kernel needs no
    channel reshuffle at all)."""
    ns2 = n_split // 2
    cg = C // n_split
    perm = np.empty((C,), dtype=np.int32)
    for g in range(n_split):
        a, s = divmod(g, ns2)
        for m in range(cg):
            perm[g * cg + m] = a * cg * ns2 + m * ns2 + s
    P = jnp.eye(C, dtype=weight.dtype)[perm]            # (P x)[j] = x[perm[j]]
    kron = jnp.kron(weight, jnp.eye(cg, dtype=weight.dtype))
    return P.T @ kron @ P


# --------------------------------------------------- fused flow-stack kernel
def _fused_flow_blocks(x, x_mask, bc, A_all, c_all, ws_all, bs_all,
                       wi_all, wr_all, br_all, we_all, be_all, *,
                       n_blocks, n_layers, kernel_size, dilation_rate,
                       sigmoid_scale, hidden_channels):
    B, C, T = x.shape
    C2 = C // 2
    H = hidden_channels
    H2 = 2 * H
    K = kernel_size
    NB, L = n_blocks, n_layers
    KH = K * H

    dils = [int(round(dilation_rate ** i)) for i in range(L)]
    pads = [(K * d - d) // 2 for d in dils]
    PAD_L = max(pads)                                    # left halo
    PAD_R = max((K - 1) * d - p for d, p in zip(dils, pads))   # right halo
    TP = PAD_L + T + PAD_R                               # padded hidden width

    def kernel(x_ref, m_ref, bc_ref, a_ref, c_ref, ws_ref, bs_ref,
               wi_ref, wr_ref, br_ref, we_ref, be_ref,
               z_ref, ld_ref, hpad_ref, stk_ref, skip_ref):
        n = pl.program_id(1)

        @pl.when(n == 0)
        def _():
            z_ref[...] = x_ref[...]            # block 0 consumes the raw input
            ld_ref[...] = jnp.zeros_like(ld_ref)

        mask = m_ref[...]                                  # (1, T) f32
        mask_h = jnp.broadcast_to(mask, (H, T))            # hoisted, reused L+2x

        xb = z_ref[...].astype(jnp.float32)                # carried activation

        # ---- ActNorm + InvConvNear folded into one (C,C) affine (f32) ------
        y = (jnp.dot(a_ref[...], xb, preferred_element_type=jnp.float32)
             + c_ref[...]) * mask
        x0 = y[:C2, :]
        x1 = y[C2:, :]

        # ---- CouplingBlock: start conv -> WaveNet -> end conv --------------
        # zero the halo borders of the padded hidden scratch (tiny stores)
        if PAD_L > 0:
            hpad_ref[:, :PAD_L] = jnp.zeros((H, PAD_L), jnp.float32)
        if PAD_R > 0:
            hpad_ref[:, PAD_L + T:] = jnp.zeros((H, PAD_R), jnp.float32)

        h0 = (jnp.dot(ws_ref[...], x0.astype(jnp.bfloat16),
                      preferred_element_type=jnp.float32)
              + bs_ref[...]) * mask_h
        hpad_ref[:, PAD_L:PAD_L + T] = h0

        for i in range(L):                                 # unrolled (small L)
            dil, pad = dils[i], pads[i]
            # K dilation taps as static shifted reads of the zero-padded
            # scratch, band-stored (bf16) for ONE stacked matmul.
            for k in range(K):
                start = PAD_L + k * dil - pad
                stk_ref[k * H:(k + 1) * H, :] = (
                    hpad_ref[:, start:start + T].astype(jnp.bfloat16))
            x_in = (jnp.dot(wi_ref[i], stk_ref[...],
                            preferred_element_type=jnp.float32)
                    + bc_ref[i * H2:(i + 1) * H2, :])      # (2H, T) f32
            acts = (jnp.tanh(x_in[:H, :])
                    * jax.nn.sigmoid(x_in[H:, :])).astype(jnp.bfloat16)
            wr_i = wr_ref[i]
            br_i = br_ref[i]
            if i < L - 1:
                rs = (jnp.dot(wr_i, acts, preferred_element_type=jnp.float32)
                      + br_i)                              # (2H, T)
                hpad_ref[:, PAD_L:PAD_L + T] = (
                    hpad_ref[:, PAD_L:PAD_L + T] + rs[:H, :]) * mask_h
                skip = rs[H:, :]
            else:
                # last layer: (H, H) skip projection (first H rows of w_rs)
                skip = (jnp.dot(wr_i[:H, :], acts,
                                preferred_element_type=jnp.float32)
                        + br_i[:H, :])
            if i == 0:
                skip_ref[...] = skip
            else:
                skip_ref[...] = skip_ref[...] + skip

        out = (jnp.dot(we_ref[...],
                       (skip_ref[...] * mask_h).astype(jnp.bfloat16),
                       preferred_element_type=jnp.float32)
               + be_ref[...])                              # (C, T)
        m_c = out[:C2, :]
        logs = out[C2:, :]
        if sigmoid_scale:
            logs = jnp.log(1e-6 + jax.nn.sigmoid(logs + 2.0))
        z1 = (m_c + jnp.exp(logs) * x1) * mask

        # write the two halves directly into the resident block (no concat)
        z_ref[:C2, :] = x0.astype(z_ref.dtype)
        z_ref[C2:, :] = z1.astype(z_ref.dtype)
        ld_ref[...] = ld_ref[...] + jnp.sum(logs * mask, keepdims=True)

    z, ld = pl.pallas_call(
        kernel,
        out_shape=(jax.ShapeDtypeStruct((B, C, T), x.dtype),
                   jax.ShapeDtypeStruct((B, 1, 1), jnp.float32)),
        grid=(B, NB),
        in_specs=[
            pl.BlockSpec((None, C, T), lambda b, n: (b, 0, 0)),              # x
            pl.BlockSpec((None, 1, T), lambda b, n: (b, 0, 0)),              # mask
            pl.BlockSpec((None, None, L * H2, 1), lambda b, n: (b, n, 0, 0)),  # cond+bias
            pl.BlockSpec((None, C, C), lambda b, n: (n, 0, 0)),              # fused actnorm+invconv
            pl.BlockSpec((None, C, 1), lambda b, n: (n, 0, 0)),
            pl.BlockSpec((None, H, C2), lambda b, n: (n, 0, 0)),             # start conv
            pl.BlockSpec((None, H, 1), lambda b, n: (n, 0, 0)),
            pl.BlockSpec((None, L, H2, KH), lambda b, n: (n, 0, 0, 0)),      # stacked tap weights
            pl.BlockSpec((None, L, H2, H), lambda b, n: (n, 0, 0, 0)),       # res/skip conv
            pl.BlockSpec((None, L, H2, 1), lambda b, n: (n, 0, 0, 0)),
            pl.BlockSpec((None, C, H), lambda b, n: (n, 0, 0)),              # end conv
            pl.BlockSpec((None, C, 1), lambda b, n: (n, 0, 0)),
        ],
        out_specs=(
            pl.BlockSpec((None, C, T), lambda b, n: (b, 0, 0)),
            pl.BlockSpec((None, 1, 1), lambda b, n: (b, 0, 0)),
        ),
        scratch_shapes=[
            pltpu.VMEM((H, TP), jnp.float32),        # zero-padded hidden (halo)
            pltpu.VMEM((KH, T), jnp.bfloat16),       # stacked dilation taps
            pltpu.VMEM((H, T), jnp.float32),         # skip accumulator
        ],
        compiler_params=pltpu.CompilerParams(
            dimension_semantics=("parallel", "arbitrary"),   # B parallel, blocks streamed
            vmem_limit_bytes=32 * 1024 * 1024),
    )(x, x_mask, bc, A_all, c_all, ws_all, bs_all,
      wi_all, wr_all, br_all, we_all, be_all)
    return z, ld[:, 0, 0]


# ------------------------------------------------------------- full Flow ----
def flow_forward(x, x_mask, params, g=None, *, n_sqz, n_split, n_layers,
                 kernel_size, dilation_rate, sigmoid_scale, hidden_channels,
                 gin_channels):
    """Forward (reverse=False) pass of the Flow module."""
    if n_sqz > 1:
        x, x_mask = channel_squeeze(x, x_mask, n_sqz)
    B, C, T = x.shape
    H = hidden_channels
    H2 = 2 * H
    L = n_layers
    K = kernel_size
    blocks = params["blocks"]
    NB = len(blocks)

    # -- pre-fold tiny per-block parameters (host/XLA, O(params) work only) --
    A_list, c_list = [], []
    host_ld = jnp.zeros((), jnp.float32)        # per-frame logdet scalar
    for blk in blocks:
        logs = blk["actnorm_logs"].reshape(C).astype(jnp.float32)
        bias = blk["actnorm_bias"].reshape(C).astype(jnp.float32)
        M = _expand_invconv_weight(blk["invconv_weight"].astype(jnp.float32),
                                   C, n_split)
        A_list.append(M * jnp.exp(logs)[None, :])        # actnorm scale folded in
        c_list.append((M @ bias).reshape(C, 1))          # actnorm bias folded in
        _, logabsdet = jnp.linalg.slogdet(blk["invconv_weight"])  # det>0 by init
        host_ld = host_ld + jnp.sum(logs) + logabsdet * (C / n_split)
    A_all = jnp.stack(A_list)                                    # (NB,C,C) f32
    c_all = jnp.stack(c_list)                                    # (NB,C,1) f32

    # bf16 MXU operands (f32 accumulation in the kernel); biases stay f32
    ws_all = jnp.stack([b["w_start"] for b in blocks]).astype(jnp.bfloat16)
    bs_all = jnp.stack([b["b_start"].reshape(H, 1)
                        for b in blocks]).astype(jnp.float32)
    wi_all = jnp.stack([b["w_in"] for b in blocks])              # (NB,L,K,2H,H)
    wi_all = jnp.transpose(wi_all, (0, 1, 3, 2, 4)).reshape(NB, L, H2, K * H)
    wi_all = wi_all.astype(jnp.bfloat16)
    wr_all = jnp.stack([b["w_rs"] for b in blocks]).astype(jnp.bfloat16)
    br_all = jnp.stack([b["b_rs"] for b in blocks]
                       ).reshape(NB, L, H2, 1).astype(jnp.float32)
    we_all = jnp.stack([b["w_end"] for b in blocks]).astype(jnp.bfloat16)
    be_all = jnp.stack([b["b_end"].reshape(C, 1)
                        for b in blocks]).astype(jnp.float32)

    # x-vector speaker conditioning + in-layer bias, folded per batch (tiny)
    b_in_all = jnp.stack([b["b_in"] for b in blocks]).reshape(NB, L * H2)
    if g is not None and gin_channels > 0:
        w_cond = jnp.stack([b["w_cond"] for b in blocks])        # (NB,L*2H,gin)
        b_cond = jnp.stack([b["b_cond"] for b in blocks])        # (NB,L*2H)
        cond = jnp.einsum("koc,bc->bko", w_cond, g) + b_cond[None]
    else:
        cond = jnp.zeros((B, NB, L * H2), jnp.float32)
    bc = (cond + b_in_all[None]).reshape(B, NB, L * H2, 1).astype(jnp.float32)

    z, ld_blocks = _fused_flow_blocks(
        x, x_mask, bc, A_all, c_all, ws_all, bs_all,
        wi_all, wr_all, br_all, we_all, be_all,
        n_blocks=NB, n_layers=n_layers, kernel_size=kernel_size,
        dilation_rate=dilation_rate, sigmoid_scale=sigmoid_scale,
        hidden_channels=hidden_channels)

    # ActNorm + InvConv logdet is a data-independent scalar per valid frame.
    logdet = ld_blocks + host_ld * jnp.sum(x_mask, axis=(1, 2))

    if n_sqz > 1:
        z, x_mask = channel_unsqueeze(z, x_mask, n_sqz)
    return z, logdet
    # TODO(synk): reverse (inference) path and store_inverse() not implemented;
    # for long utterances on v7x add a T grid axis with a halo of
    # (K-1)/2 * dilation_rate**(L-1) columns, and for tiny T stack several
    # batch elements along the lane axis per grid step.


# ----------------------------------------------------------- param init -----
def init_flow_params(key, *, in_channels, hidden_channels, kernel_size,
                     n_blocks, n_layers, n_split, n_sqz, gin_channels):
    C = in_channels * n_sqz
    C2 = C // 2
    H = hidden_channels
    K = kernel_size
    blocks = []
    for _ in range(n_blocks):
        key, *ks = jax.random.split(key, 14)
        # ActNorm (torch inits zeros; small random -> non-trivial synthetic fwd)
        actnorm_logs = 0.1 * jax.random.normal(ks[0], (1, C, 1), jnp.float32)
        actnorm_bias = 0.1 * jax.random.normal(ks[1], (1, C, 1), jnp.float32)
        # InvConvNear: orthogonal via QR, flip first column if det < 0
        w = jax.random.normal(ks[2], (n_split, n_split), jnp.float32)
        q, _ = jnp.linalg.qr(w)
        q = jnp.where(jnp.linalg.det(q) < 0, q.at[:, 0].set(-q[:, 0]), q)
        blk = dict(
            actnorm_logs=actnorm_logs,
            actnorm_bias=actnorm_bias,
            invconv_weight=q,
            w_start=jax.random.normal(ks[3], (H, C2), jnp.float32) / jnp.sqrt(C2),
            b_start=0.1 * jax.random.normal(ks[4], (H,), jnp.float32),
            w_in=jax.random.normal(ks[5], (n_layers, K, 2 * H, H), jnp.float32)
                 / jnp.sqrt(H * K),
            b_in=0.1 * jax.random.normal(ks[6], (n_layers, 2 * H), jnp.float32),
            # NOTE: last WN layer uses only the first H rows of its (2H, H)
            # w_rs / (2H,) b_rs (distinct (H,H) conv in torch) -- a parameter
            # layout choice, fine for this self-contained demo.
            w_rs=jax.random.normal(ks[7], (n_layers, 2 * H, H), jnp.float32)
                 / jnp.sqrt(H),
            b_rs=0.1 * jax.random.normal(ks[8], (n_layers, 2 * H), jnp.float32),
            # torch zeroes the `end` conv; small random here so the coupling
            # transform (and its logdet) is non-trivial for the demo.
            w_end=0.02 * jax.random.normal(ks[9], (C, H), jnp.float32),
            b_end=0.02 * jax.random.normal(ks[10], (C,), jnp.float32),
            w_cond=(jax.random.normal(ks[11], (n_layers * 2 * H, gin_channels),
                                      jnp.float32)
                    / jnp.sqrt(max(gin_channels, 1))) if gin_channels > 0 else None,
            b_cond=(0.1 * jax.random.normal(ks[12], (n_layers * 2 * H,),
                                            jnp.float32))
                    if gin_channels > 0 else None,
        )
        blocks.append(blk)
    return {"blocks": blocks}


# ------------------------------------------------------------------- main ---
if __name__ == "__main__":
    B = 2
    in_channels = 8
    T_in = 256
    hidden_channels = 32
    kernel_size = 3
    dilation_rate = 2
    n_blocks = 2
    n_layers = 2
    n_split = 4
    n_sqz = 2
    gin_channels = 16
    sigmoid_scale = False

    key = jax.random.PRNGKey(0)
    k_x, k_g, k_p = jax.random.split(key, 3)
    x = jax.random.normal(k_x, (B, in_channels, T_in), jnp.float32)
    lengths = jnp.array([256, 192], dtype=jnp.int32)
    x_mask = (jnp.arange(T_in)[None, None, :] < lengths[:, None, None]).astype(jnp.float32)
    g = jax.random.normal(k_g, (B, gin_channels), jnp.float32)   # x-vector embedding

    params = init_flow_params(
        k_p, in_channels=in_channels, hidden_channels=hidden_channels,
        kernel_size=kernel_size, n_blocks=n_blocks, n_layers=n_layers,
        n_split=n_split, n_sqz=n_sqz, gin_channels=gin_channels)

    fwd = jax.jit(functools.partial(
        flow_forward, n_sqz=n_sqz, n_split=n_split, n_layers=n_layers,
        kernel_size=kernel_size, dilation_rate=dilation_rate,
        sigmoid_scale=sigmoid_scale, hidden_channels=hidden_channels,
        gin_channels=gin_channels))

    z, logdet = fwd(x, x_mask, params, g)
    z, logdet = jax.block_until_ready((z, logdet))
    assert z.shape == (B, in_channels, T_in)
    assert logdet.shape == (B,)
    assert bool(jnp.all(jnp.isfinite(z))) and bool(jnp.all(jnp.isfinite(logdet)))
    print("KERNEL_OK")
</pallas_src>

<mosaic_0001>
module attributes {stable_mosaic.version = 11 : i64} {
  func.func @kernel(%arg0: i32, %arg1: i32, %arg2: memref<1x16x128xf32, #tpu.memory_space<vmem>>, %arg3: memref<1x1x128xf32, #tpu.memory_space<vmem>>, %arg4: memref<1x1x128x1xf32, #tpu.memory_space<vmem>>, %arg5: memref<1x16x16xf32, #tpu.memory_space<vmem>>, %arg6: memref<1x16x1xf32, #tpu.memory_space<vmem>>, %arg7: memref<1x32x8xbf16, #tpu.memory_space<vmem>>, %arg8: memref<1x32x1xf32, #tpu.memory_space<vmem>>, %arg9: memref<1x2x64x96xbf16, #tpu.memory_space<vmem>>, %arg10: memref<1x2x64x32xbf16, #tpu.memory_space<vmem>>, %arg11: memref<1x2x64x1xf32, #tpu.memory_space<vmem>>, %arg12: memref<1x16x32xbf16, #tpu.memory_space<vmem>>, %arg13: memref<1x16x1xf32, #tpu.memory_space<vmem>>, %arg14: memref<1x16x128xf32, #tpu.memory_space<vmem>>, %arg15: memref<1x1x1xf32, #tpu.memory_space<vmem>>, %arg16: memref<32x132xf32, #tpu.memory_space<vmem>>, %arg17: memref<96x128xbf16, #tpu.memory_space<vmem>>, %arg18: memref<32x128xf32, #tpu.memory_space<vmem>>) attributes {dimension_semantics = [#tpu.dimension_semantics<parallel>, #tpu.dimension_semantics<arbitrary>], iteration_bounds = array<i64: 2, 2>, scalar_prefetch = 0 : i64, scratch_operands = 3 : i64, tpu.core_type = #tpu.core_type<tc>, window_params = [{transform_indices = @transform_0, window_bounds = array<i64: 1, 16, 128>}, {transform_indices = @transform_1, window_bounds = array<i64: 1, 1, 128>}, {transform_indices = @transform_2, window_bounds = array<i64: 1, 1, 128, 1>}, {transform_indices = @transform_3, window_bounds = array<i64: 1, 16, 16>}, {transform_indices = @transform_4, window_bounds = array<i64: 1, 16, 1>}, {transform_indices = @transform_5, window_bounds = array<i64: 1, 32, 8>}, {transform_indices = @transform_6, window_bounds = array<i64: 1, 32, 1>}, {transform_indices = @transform_7, window_bounds = array<i64: 1, 2, 64, 96>}, {transform_indices = @transform_8, window_bounds = array<i64: 1, 2, 64, 32>}, {transform_indices = @transform_9, window_bounds = array<i64: 1, 2, 64, 1>}, {transform_indices = @transform_10, window_bounds = array<i64: 1, 16, 32>}, {transform_indices = @transform_11, window_bounds = array<i64: 1, 16, 1>}, {transform_indices = @transform_12, window_bounds = array<i64: 1, 16, 128>}, {transform_indices = @transform_13, window_bounds = array<i64: 1, 1, 1>}]} {
    %c0_i32 = arith.constant 0 : i32
    %0 = arith.cmpi eq, %arg1, %c0_i32 : i32
    %1 = arith.extui %0 : i1 to i32
    %c0_i32_0 = arith.constant 0 : i32
    %2 = arith.cmpi ne, %1, %c0_i32_0 : i32
    scf.if %2 {
      %c0_117 = arith.constant 0 : index
      %c0_118 = arith.constant 0 : index
      %c0_119 = arith.constant 0 : index
      %150 = vector.load %arg2[%c0_117, %c0_118, %c0_119] : memref<1x16x128xf32, #tpu.memory_space<vmem>>, vector<1x16x128xf32>
      %151 = vector.shape_cast %150 : vector<1x16x128xf32> to vector<16x128xf32>
      %c0_120 = arith.constant 0 : index
      %c0_121 = arith.constant 0 : index
      %c0_122 = arith.constant 0 : index
      %152 = vector.load %arg14[%c0_120, %c0_121, %c0_122] : memref<1x16x128xf32, #tpu.memory_space<vmem>>, vector<1x16x128xf32>
      %153 = vector.shape_cast %152 : vector<1x16x128xf32> to vector<16x128xf32>
      %154 = vector.shape_cast %151 : vector<16x128xf32> to vector<1x16x128xf32>
      tpu.vector_store %arg14[%c0_120, %c0_121, %c0_122], %154 {strides = array<i32>} : memref<1x16x128xf32, #tpu.memory_space<vmem>>, vector<1x16x128xf32>,
      %cst_123 = arith.constant 0.000000e+00 : f32
      %155 = vector.broadcast %cst_123 : f32 to vector<1x1xf32>
      %c0_124 = arith.constant 0 : index
      %c0_125 = arith.constant 0 : index
      %c0_126 = arith.constant 0 : index
      %156 = vector.load %arg15[%c0_124, %c0_125, %c0_126] : memref<1x1x1xf32, #tpu.memory_space<vmem>>, vector<1x1x1xf32>
      %157 = vector.shape_cast %156 : vector<1x1x1xf32> to vector<1x1xf32>
      %158 = vector.shape_cast %155 : vector<1x1xf32> to vector<1x1x1xf32>
      tpu.vector_store %arg15[%c0_124, %c0_125, %c0_126], %158 {strides = array<i32>} : memref<1x1x1xf32, #tpu.memory_space<vmem>>, vector<1x1x1xf32>,
    } else {
    }
    %c0 = arith.constant 0 : index
    %c0_1 = arith.constant 0 : index
    %c0_2 = arith.constant 0 : index
    %3 = vector.load %arg3[%c0, %c0_1, %c0_2] : memref<1x1x128xf32, #tpu.memory_space<vmem>>, vector<1x1x128xf32>
    %4 = vector.shape_cast %3 : vector<1x1x128xf32> to vector<1x128xf32>
    %5 = vector.shape_cast %4 : vector<1x128xf32> to vector<1x128xf32>
    %6 = vector.broadcast %5 : vector<1x128xf32> to vector<32x128xf32>
    %c0_3 = arith.constant 0 : index
    %c0_4 = arith.constant 0 : index
    %c0_5 = arith.constant 0 : index
    %7 = vector.load %arg14[%c0_3, %c0_4, %c0_5] : memref<1x16x128xf32, #tpu.memory_space<vmem>>, vector<1x16x128xf32>
    %8 = vector.shape_cast %7 : vector<1x16x128xf32> to vector<16x128xf32>
    %c0_6 = arith.constant 0 : index
    %c0_7 = arith.constant 0 : index
    %c0_8 = arith.constant 0 : index
    %9 = vector.load %arg5[%c0_6, %c0_7, %c0_8] : memref<1x16x16xf32, #tpu.memory_space<vmem>>, vector<1x16x16xf32>
    %10 = vector.shape_cast %9 : vector<1x16x16xf32> to vector<16x16xf32>
    %cst = arith.constant dense<0.000000e+00> : vector<16x128xf32>
    %11 = tpu.matmul %10, %8, %cst {dimension_numbers = #tpu.dot_dimension_numbers<[1], [0], [0], [1], [0, 0, 1, 1], [], []>} : vector<16x16xf32>, vector<16x128xf32>, vector<16x128xf32> -> vector<16x128xf32>
    %c0_9 = arith.constant 0 : index
    %c0_10 = arith.constant 0 : index
    %c0_11 = arith.constant 0 : index
    %12 = vector.load %arg6[%c0_9, %c0_10, %c0_11] : memref<1x16x1xf32, #tpu.memory_space<vmem>>, vector<1x16x1xf32>
    %13 = vector.shape_cast %12 : vector<1x16x1xf32> to vector<16x1xf32>
    %14 = vector.broadcast %13 : vector<16x1xf32> to vector<16x128xf32>
    %15 = arith.addf %11, %14 : vector<16x128xf32>
    %16 = vector.broadcast %4 : vector<1x128xf32> to vector<16x128xf32>
    %17 = arith.mulf %15, %16 : vector<16x128xf32>
    %18 = vector.extract_strided_slice %17 {offsets = [0, 0], sizes = [8, 128], strides = [1, 1]} : vector<16x128xf32> to vector<8x128xf32>
    %19 = vector.extract_strided_slice %17 {offsets = [8, 0], sizes = [8, 128], strides = [1, 1]} : vector<16x128xf32> to vector<8x128xf32>
    %cst_12 = arith.constant 0.000000e+00 : f32
    %20 = vector.broadcast %cst_12 : f32 to vector<32x2xf32>
    %c0_13 = arith.constant 0 : index
    %c0_14 = arith.constant 0 : index
    %21 = vector.load %arg16[%c0_13, %c0_14] : memref<32x132xf32, #tpu.memory_space<vmem>>, vector<32x2xf32>
    tpu.vector_store %arg16[%c0_13, %c0_14], %20 {strides = array<i32>} : memref<32x132xf32, #tpu.memory_space<vmem>>, vector<32x2xf32>,
    %cst_15 = arith.constant 0.000000e+00 : f32
    %22 = vector.broadcast %cst_15 : f32 to vector<32x2xf32>
    %c0_16 = arith.constant 0 : index
    %c130 = arith.constant 130 : index
    %23 = vector.load %arg16[%c0_16, %c130] : memref<32x132xf32, #tpu.memory_space<vmem>>, vector<32x2xf32>
    tpu.vector_store %arg16[%c0_16, %c130], %22 {strides = array<i32>} : memref<32x132xf32, #tpu.memory_space<vmem>>, vector<32x2xf32>,
    %c0_17 = arith.constant 0 : index
    %c0_18 = arith.constant 0 : index
    %c0_19 = arith.constant 0 : index
    %24 = vector.load %arg7[%c0_17, %c0_18, %c0_19] : memref<1x32x8xbf16, #tpu.memory_space<vmem>>, vector<1x32x8xbf16>
    %25 = vector.shape_cast %24 : vector<1x32x8xbf16> to vector<32x8xbf16>
    %26 = arith.truncf %18 : vector<8x128xf32> to vector<8x128xbf16>
    %cst_20 = arith.constant dense<0.000000e+00> : vector<32x128xf32>
    %27 = tpu.matmul %25, %26, %cst_20 {dimension_numbers = #tpu.dot_dimension_numbers<[1], [0], [0], [1], [0, 0, 1, 1], [], []>} : vector<32x8xbf16>, vector<8x128xbf16>, vector<32x128xf32> -> vector<32x128xf32>
    %c0_21 = arith.constant 0 : index
    %c0_22 = arith.constant 0 : index
    %c0_23 = arith.constant 0 : index
    %28 = vector.load %arg8[%c0_21, %c0_22, %c0_23] : memref<1x32x1xf32, #tpu.memory_space<vmem>>, vector<1x32x1xf32>
    %29 = vector.shape_cast %28 : vector<1x32x1xf32> to vector<32x1xf32>
    %30 = vector.broadcast %29 : vector<32x1xf32> to vector<32x128xf32>
    %31 = arith.addf %27, %30 : vector<32x128xf32>
    %32 = arith.mulf %31, %6 : vector<32x128xf32>
    %c0_24 = arith.constant 0 : index
    %c2 = arith.constant 2 : index
    %33 = vector.load %arg16[%c0_24, %c2] : memref<32x132xf32, #tpu.memory_space<vmem>>, vector<32x128xf32>
    tpu.vector_store %arg16[%c0_24, %c2], %32 {strides = array<i32>} : memref<32x132xf32, #tpu.memory_space<vmem>>, vector<32x128xf32>,
    %c0_25 = arith.constant 0 : index
    %c1 = arith.constant 1 : index
    %34 = vector.load %arg16[%c0_25, %c1] : memref<32x132xf32, #tpu.memory_space<vmem>>, vector<32x128xf32>
    %35 = arith.truncf %34 : vector<32x128xf32> to vector<32x128xbf16>
    %c0_26 = arith.constant 0 : index
    %c0_27 = arith.constant 0 : index
    %36 = vector.load %arg17[%c0_26, %c0_27] : memref<96x128xbf16, #tpu.memory_space<vmem>>, vector<32x128xbf16>
    tpu.vector_store %arg17[%c0_26, %c0_27], %35 {strides = array<i32>} : memref<96x128xbf16, #tpu.memory_space<vmem>>, vector<32x128xbf16>,
    %c0_28 = arith.constant 0 : index
    %c2_29 = arith.constant 2 : index
    %37 = vector.load %arg16[%c0_28, %c2_29] : memref<32x132xf32, #tpu.memory_space<vmem>>, vector<32x128xf32>
    %38 = arith.truncf %37 : vector<32x128xf32> to vector<32x128xbf16>
    %c32 = arith.constant 32 : index
    %c0_30 = arith.constant 0 : index
    %39 = vector.load %arg17[%c32, %c0_30] : memref<96x128xbf16, #tpu.memory_space<vmem>>, vector<32x128xbf16>
    tpu.vector_store %arg17[%c32, %c0_30], %38 {strides = array<i32>} : memref<96x128xbf16, #tpu.memory_space<vmem>>, vector<32x128xbf16>,
    %c0_31 = arith.constant 0 : index
    %c3 = arith.constant 3 : index
    %40 = vector.load %arg16[%c0_31, %c3] : memref<32x132xf32, #tpu.memory_space<vmem>>, vector<32x128xf32>
    %41 = arith.truncf %40 : vector<32x128xf32> to vector<32x128xbf16>
    %c64 = arith.constant 64 : index
    %c0_32 = arith.constant 0 : index
    %42 = vector.load %arg17[%c64, %c0_32] : memref<96x128xbf16, #tpu.memory_space<vmem>>, vector<32x128xbf16>
    tpu.vector_store %arg17[%c64, %c0_32], %41 {strides = array<i32>} : memref<96x128xbf16, #tpu.memory_space<vmem>>, vector<32x128xbf16>,
    %c0_33 = arith.constant 0 : index
    %c0_34 = arith.constant 0 : index
    %c0_35 = arith.constant 0 : index
    %c0_36 = arith.constant 0 : index
    %43 = vector.load %arg9[%c0_33, %c0_34, %c0_35, %c0_36] : memref<1x2x64x96xbf16, #tpu.memory_space<vmem>>, vector<1x1x64x96xbf16>
    %44 = vector.shape_cast %43 : vector<1x1x64x96xbf16> to vector<64x96xbf16>
    %c0_37 = arith.constant 0 : index
    %c0_38 = arith.constant 0 : index
    %45 = vector.load %arg17[%c0_37, %c0_38] : memref<96x128xbf16, #tpu.memory_space<vmem>>, vector<96x128xbf16>
    %cst_39 = arith.constant dense<0.000000e+00> : vector<64x128xf32>
    %46 = tpu.matmul %44, %45, %cst_39 {dimension_numbers = #tpu.dot_dimension_numbers<[1], [0], [0], [1], [0, 0, 1, 1], [], []>} : vector<64x96xbf16>, vector<96x128xbf16>, vector<64x128xf32> -> vector<64x128xf32>
    %c0_40 = arith.constant 0 : index
    %c0_41 = arith.constant 0 : index
    %c0_42 = arith.constant 0 : index
    %c0_43 = arith.constant 0 : index
    %47 = vector.load %arg4[%c0_40, %c0_41, %c0_42, %c0_43] : memref<1x1x128x1xf32, #tpu.memory_space<vmem>>, vector<1x1x64x1xf32>
    %48 = vector.shape_cast %47 : vector<1x1x64x1xf32> to vector<64x1xf32>
    %49 = vector.broadcast %48 : vector<64x1xf32> to vector<64x128xf32>
    %50 = arith.addf %46, %49 : vector<64x128xf32>
    %51 = vector.extract_strided_slice %50 {offsets = [0, 0], sizes = [32, 128], strides = [1, 1]} : vector<64x128xf32> to vector<32x128xf32>
    %52 = math.tanh %51 : vector<32x128xf32>
    %53 = vector.extract_strided_slice %50 {offsets = [32, 0], sizes = [32, 128], strides = [1, 1]} : vector<64x128xf32> to vector<32x128xf32>
    %54 = arith.negf %53 : vector<32x128xf32>
    %55 = math.exp %54 : vector<32x128xf32>
    %cst_44 = arith.constant 1.000000e+00 : f32
    %56 = vector.broadcast %cst_44 : f32 to vector<32x128xf32>
    %57 = arith.addf %56, %55 : vector<32x128xf32>
    %58 = arith.divf %56, %57 : vector<32x128xf32>
    %59 = arith.mulf %52, %58 : vector<32x128xf32>
    %60 = arith.truncf %59 : vector<32x128xf32> to vector<32x128xbf16>
    %c0_45 = arith.constant 0 : index
    %c0_46 = arith.constant 0 : index
    %c0_47 = arith.constant 0 : index
    %c0_48 = arith.constant 0 : index
    %61 = vector.load %arg10[%c0_45, %c0_46, %c0_47, %c0_48] : memref<1x2x64x32xbf16, #tpu.memory_space<vmem>>, vector<1x1x64x32xbf16>
    %62 = vector.shape_cast %61 : vector<1x1x64x32xbf16> to vector<64x32xbf16>
    %c0_49 = arith.constant 0 : index
    %c0_50 = arith.constant 0 : index
    %c0_51 = arith.constant 0 : index
    %c0_52 = arith.constant 0 : index
    %63 = vector.load %arg11[%c0_49, %c0_50, %c0_51, %c0_52] : memref<1x2x64x1xf32, #tpu.memory_space<vmem>>, vector<1x1x64x1xf32>
    %64 = vector.shape_cast %63 : vector<1x1x64x1xf32> to vector<64x1xf32>
    %cst_53 = arith.constant dense<0.000000e+00> : vector<64x128xf32>
    %65 = tpu.matmul %62, %60, %cst_53 {dimension_numbers = #tpu.dot_dimension_numbers<[1], [0], [0], [1], [0, 0, 1, 1], [], []>} : vector<64x32xbf16>, vector<32x128xbf16>, vector<64x128xf32> -> vector<64x128xf32>
    %66 = vector.broadcast %64 : vector<64x1xf32> to vector<64x128xf32>
    %67 = arith.addf %65, %66 : vector<64x128xf32>
    %c0_54 = arith.constant 0 : index
    %c2_55 = arith.constant 2 : index
    %68 = vector.load %arg16[%c0_54, %c2_55] : memref<32x132xf32, #tpu.memory_space<vmem>>, vector<32x128xf32>
    %69 = vector.extract_strided_slice %67 {offsets = [0, 0], sizes = [32, 128], strides = [1, 1]} : vector<64x128xf32> to vector<32x128xf32>
    %70 = arith.addf %68, %69 : vector<32x128xf32>
    %71 = arith.mulf %70, %6 : vector<32x128xf32>
    %c0_56 = arith.constant 0 : index
    %c2_57 = arith.constant 2 : index
    %72 = vector.load %arg16[%c0_56, %c2_57] : memref<32x132xf32, #tpu.memory_space<vmem>>, vector<32x128xf32>
    tpu.vector_store %arg16[%c0_56, %c2_57], %71 {strides = array<i32>} : memref<32x132xf32, #tpu.memory_space<vmem>>, vector<32x128xf32>,
    %73 = vector.extract_strided_slice %67 {offsets = [32, 0], sizes = [32, 128], strides = [1, 1]} : vector<64x128xf32> to vector<32x128xf32>
    %c0_58 = arith.constant 0 : index
    %c0_59 = arith.constant 0 : index
    %74 = vector.load %arg18[%c0_58, %c0_59] : memref<32x128xf32, #tpu.memory_space<vmem>>, vector<32x128xf32>
    tpu.vector_store %arg18[%c0_58, %c0_59], %73 {strides = array<i32>} : memref<32x128xf32, #tpu.memory_space<vmem>>, vector<32x128xf32>,
    %c0_60 = arith.constant 0 : index
    %c0_61 = arith.constant 0 : index
    %75 = vector.load %arg16[%c0_60, %c0_61] : memref<32x132xf32, #tpu.memory_space<vmem>>, vector<32x128xf32>
    %76 = arith.truncf %75 : vector<32x128xf32> to vector<32x128xbf16>
    %c0_62 = arith.constant 0 : index
    %c0_63 = arith.constant 0 : index
    %77 = vector.load %arg17[%c0_62, %c0_63] : memref<96x128xbf16, #tpu.memory_space<vmem>>, vector<32x128xbf16>
    tpu.vector_store %arg17[%c0_62, %c0_63], %76 {strides = array<i32>} : memref<96x128xbf16, #tpu.memory_space<vmem>>, vector<32x128xbf16>,
    %c0_64 = arith.constant 0 : index
    %c2_65 = arith.constant 2 : index
    %78 = vector.load %arg16[%c0_64, %c2_65] : memref<32x132xf32, #tpu.memory_space<vmem>>, vector<32x128xf32>
    %79 = arith.truncf %78 : vector<32x128xf32> to vector<32x128xbf16>
    %c32_66 = arith.constant 32 : index
    %c0_67 = arith.constant 0 : index
    %80 = vector.load %arg17[%c32_66, %c0_67] : memref<96x128xbf16, #tpu.memory_space<vmem>>, vector<32x128xbf16>
    tpu.vector_store %arg17[%c32_66, %c0_67], %79 {strides = array<i32>} : memref<96x128xbf16, #tpu.memory_space<vmem>>, vector<32x128xbf16>,
    %c0_68 = arith.constant 0 : index
    %c4 = arith.constant 4 : index
    %81 = vector.load %arg16[%c0_68, %c4] : memref<32x132xf32, #tpu.memory_space<vmem>>, vector<32x128xf32>
    %82 = arith.truncf %81 : vector<32x128xf32> to vector<32x128xbf16>
    %c64_69 = arith.constant 64 : index
    %c0_70 = arith.constant 0 : index
    %83 = vector.load %arg17[%c64_69, %c0_70] : memref<96x128xbf16, #tpu.memory_space<vmem>>, vector<32x128xbf16>
    tpu.vector_store %arg17[%c64_69, %c0_70], %82 {strides = array<i32>} : memref<96x128xbf16, #tpu.memory_space<vmem>>, vector<32x128xbf16>,
    %c0_71 = arith.constant 0 : index
    %c1_72 = arith.constant 1 : index
    %c0_73 = arith.constant 0 : index
    %c0_74 = arith.constant 0 : index
    %84 = vector.load %arg9[%c0_71, %c1_72, %c0_73, %c0_74] : memref<1x2x64x96xbf16, #tpu.memory_space<vmem>>, vector<1x1x64x96xbf16>
    %85 = vector.shape_cast %84 : vector<1x1x64x96xbf16> to vector<64x96xbf16>
    %c0_75 = arith.constant 0 : index
    %c0_76 = arith.constant 0 : index
    %86 = vector.load %arg17[%c0_75, %c0_76] : memref<96x128xbf16, #tpu.memory_space<vmem>>, vector<96x128xbf16>
    %cst_77 = arith.constant dense<0.000000e+00> : vector<64x128xf32>
    %87 = tpu.matmul %85, %86, %cst_77 {dimension_numbers = #tpu.dot_dimension_numbers<[1], [0], [0], [1], [0, 0, 1, 1], [], []>} : vector<64x96xbf16>, vector<96x128xbf16>, vector<64x128xf32> -> vector<64x128xf32>
    %c0_78 = arith.constant 0 : index
    %c0_79 = arith.constant 0 : index
    %c64_80 = arith.constant 64 : index
    %c0_81 = arith.constant 0 : index
    %88 = vector.load %arg4[%c0_78, %c0_79, %c64_80, %c0_81] : memref<1x1x128x1xf32, #tpu.memory_space<vmem>>, vector<1x1x64x1xf32>
    %89 = vector.shape_cast %88 : vector<1x1x64x1xf32> to vector<64x1xf32>
    %90 = vector.broadcast %89 : vector<64x1xf32> to vector<64x128xf32>
    %91 = arith.addf %87, %90 : vector<64x128xf32>
    %92 = vector.extract_strided_slice %91 {offsets = [0, 0], sizes = [32, 128], strides = [1, 1]} : vector<64x128xf32> to vector<32x128xf32>
    %93 = math.tanh %92 : vector<32x128xf32>
    %94 = vector.extract_strided_slice %91 {offsets = [32, 0], sizes = [32, 128], strides = [1, 1]} : vector<64x128xf32> to vector<32x128xf32>
    %95 = arith.negf %94 : vector<32x128xf32>
    %96 = math.exp %95 : vector<32x128xf32>
    %cst_82 = arith.constant 1.000000e+00 : f32
    %97 = vector.broadcast %cst_82 : f32 to vector<32x128xf32>
    %98 = arith.addf %97, %96 : vector<32x128xf32>
    %99 = arith.divf %97, %98 : vector<32x128xf32>
    %100 = arith.mulf %93, %99 : vector<32x128xf32>
    %101 = arith.truncf %100 : vector<32x128xf32> to vector<32x128xbf16>
    %c0_83 = arith.constant 0 : index
    %c1_84 = arith.constant 1 : index
    %c0_85 = arith.constant 0 : index
    %c0_86 = arith.constant 0 : index
    %102 = vector.load %arg10[%c0_83, %c1_84, %c0_85, %c0_86] : memref<1x2x64x32xbf16, #tpu.memory_space<vmem>>, vector<1x1x64x32xbf16>
    %103 = vector.shape_cast %102 : vector<1x1x64x32xbf16> to vector<64x32xbf16>
    %c0_87 = arith.constant 0 : index
    %c1_88 = arith.constant 1 : index
    %c0_89 = arith.constant 0 : index
    %c0_90 = arith.constant 0 : index
    %104 = vector.load %arg11[%c0_87, %c1_88, %c0_89, %c0_90] : memref<1x2x64x1xf32, #tpu.memory_space<vmem>>, vector<1x1x64x1xf32>
    %105 = vector.shape_cast %104 : vector<1x1x64x1xf32> to vector<64x1xf32>
    %106 = vector.extract_strided_slice %103 {offsets = [0, 0], sizes = [32, 32], strides = [1, 1]} : vector<64x32xbf16> to vector<32x32xbf16>
    %cst_91 = arith.constant dense<0.000000e+00> : vector<32x128xf32>
    %107 = tpu.matmul %106, %101, %cst_91 {dimension_numbers = #tpu.dot_dimension_numbers<[1], [0], [0], [1], [0, 0, 1, 1], [], []>} : vector<32x32xbf16>, vector<32x128xbf16>, vector<32x128xf32> -> vector<32x128xf32>
    %108 = vector.extract_strided_slice %105 {offsets = [0, 0], sizes = [32, 1], strides = [1, 1]} : vector<64x1xf32> to vector<32x1xf32>
    %109 = vector.broadcast %108 : vector<32x1xf32> to vector<32x128xf32>
    %110 = arith.addf %107, %109 : vector<32x128xf32>
    %c0_92 = arith.constant 0 : index
    %c0_93 = arith.constant 0 : index
    %111 = vector.load %arg18[%c0_92, %c0_93] : memref<32x128xf32, #tpu.memory_space<vmem>>, vector<32x128xf32>
    %112 = arith.addf %111, %110 : vector<32x128xf32>
    %c0_94 = arith.constant 0 : index
    %c0_95 = arith.constant 0 : index
    %113 = vector.load %arg18[%c0_94, %c0_95] : memref<32x128xf32, #tpu.memory_space<vmem>>, vector<32x128xf32>
    tpu.vector_store %arg18[%c0_94, %c0_95], %112 {strides = array<i32>} : memref<32x128xf32, #tpu.memory_space<vmem>>, vector<32x128xf32>,
    %c0_96 = arith.constant 0 : index
    %c0_97 = arith.constant 0 : index
    %c0_98 = arith.constant 0 : index
    %114 = vector.load %arg12[%c0_96, %c0_97, %c0_98] : memref<1x16x32xbf16, #tpu.memory_space<vmem>>, vector<1x16x32xbf16>
    %115 = vector.shape_cast %114 : vector<1x16x32xbf16> to vector<16x32xbf16>
    %c0_99 = arith.constant 0 : index
    %c0_100 = arith.constant 0 : index
    %116 = vector.load %arg18[%c0_99, %c0_100] : memref<32x128xf32, #tpu.memory_space<vmem>>, vector<32x128xf32>
    %117 = arith.mulf %116, %6 : vector<32x128xf32>
    %118 = arith.truncf %117 : vector<32x128xf32> to vector<32x128xbf16>
    %cst_101 = arith.constant dense<0.000000e+00> : vector<16x128xf32>
    %119 = tpu.matmul %115, %118, %cst_101 {dimension_numbers = #tpu.dot_dimension_numbers<[1], [0], [0], [1], [0, 0, 1, 1], [], []>} : vector<16x32xbf16>, vector<32x128xbf16>, vector<16x128xf32> -> vector<16x128xf32>
    %c0_102 = arith.constant 0 : index
    %c0_103 = arith.constant 0 : index
    %c0_104 = arith.constant 0 : index
    %120 = vector.load %arg13[%c0_102, %c0_103, %c0_104] : memref<1x16x1xf32, #tpu.memory_space<vmem>>, vector<1x16x1xf32>
    %121 = vector.shape_cast %120 : vector<1x16x1xf32> to vector<16x1xf32>
    %122 = vector.broadcast %121 : vector<16x1xf32> to vector<16x128xf32>
    %123 = arith.addf %119, %122 : vector<16x128xf32>
    %124 = vector.extract_strided_slice %123 {offsets = [0, 0], sizes = [8, 128], strides = [1, 1]} : vector<16x128xf32> to vector<8x128xf32>
    %125 = vector.extract_strided_slice %123 {offsets = [8, 0], sizes = [8, 128], strides = [1, 1]} : vector<16x128xf32> to vector<8x128xf32>
    %126 = math.exp %125 : vector<8x128xf32>
    %127 = arith.mulf %126, %19 : vector<8x128xf32>
    %128 = arith.addf %124, %127 : vector<8x128xf32>
    %129 = vector.broadcast %4 : vector<1x128xf32> to vector<8x128xf32>
    %130 = arith.mulf %128, %129 : vector<8x128xf32>
    %c0_105 = arith.constant 0 : index
    %c0_106 = arith.constant 0 : index
    %c0_107 = arith.constant 0 : index
    %131 = vector.load %arg14[%c0_105, %c0_106, %c0_107] : memref<1x16x128xf32, #tpu.memory_space<vmem>>, vector<1x8x128xf32>
    %132 = vector.shape_cast %131 : vector<1x8x128xf32> to vector<8x128xf32>
    %133 = vector.shape_cast %18 : vector<8x128xf32> to vector<1x8x128xf32>
    tpu.vector_store %arg14[%c0_105, %c0_106, %c0_107], %133 {strides = array<i32>} : memref<1x16x128xf32, #tpu.memory_space<vmem>>, vector<1x8x128xf32>,
    %c0_108 = arith.constant 0 : index
    %c8 = arith.constant 8 : index
    %c0_109 = arith.constant 0 : index
    %134 = vector.load %arg14[%c0_108, %c8, %c0_109] : memref<1x16x128xf32, #tpu.memory_space<vmem>>, vector<1x8x128xf32>
    %135 = vector.shape_cast %134 : vector<1x8x128xf32> to vector<8x128xf32>
    %136 = vector.shape_cast %130 : vector<8x128xf32> to vector<1x8x128xf32>
    tpu.vector_store %arg14[%c0_108, %c8, %c0_109], %136 {strides = array<i32>} : memref<1x16x128xf32, #tpu.memory_space<vmem>>, vector<1x8x128xf32>,
    %c0_110 = arith.constant 0 : index
    %c0_111 = arith.constant 0 : index
    %c0_112 = arith.constant 0 : index
    %137 = vector.load %arg15[%c0_110, %c0_111, %c0_112] : memref<1x1x1xf32, #tpu.memory_space<vmem>>, vector<1x1x1xf32>
    %138 = vector.shape_cast %137 : vector<1x1x1xf32> to vector<1x1xf32>
    %139 = vector.broadcast %4 : vector<1x128xf32> to vector<8x128xf32>
    %140 = arith.mulf %125, %139 : vector<8x128xf32>
    %141 = vector.shape_cast %140 : vector<8x128xf32> to vector<1x8x128xf32>
    %cst_113 = arith.constant dense<0.000000e+00> : vector<1xf32>
    %142 = vector.multi_reduction <add>, %141, %cst_113 [1, 2] : vector<1x8x128xf32> to vector<1xf32>
    %143 = vector.shape_cast %142 : vector<1xf32> to vector<1x1x1xf32>
    %144 = vector.extract %143[0, 0, 0] : f32 from vector<1x1x1xf32>
    %145 = vector.broadcast %144 : f32 to vector<1x1xf32>
    %146 = arith.addf %138, %145 : vector<1x1xf32>
    %c0_114 = arith.constant 0 : index
    %c0_115 = arith.constant 0 : index
    %c0_116 = arith.constant 0 : index
    %147 = vector.load %arg15[%c0_114, %c0_115, %c0_116] : memref<1x1x1xf32, #tpu.memory_space<vmem>>, vector<1x1x1xf32>
    %148 = vector.shape_cast %147 : vector<1x1x1xf32> to vector<1x1xf32>
    %149 = vector.shape_cast %146 : vector<1x1xf32> to vector<1x1x1xf32>
    tpu.vector_store %arg15[%c0_114, %c0_115, %c0_116], %149 {strides = array<i32>} : memref<1x1x1xf32, #tpu.memory_space<vmem>>, vector<1x1x1xf32>,
    return
  }
  func.func @transform_0(%arg0: i32, %arg1: i32) -> (i32, i32, i32) {
    %c0_i32 = arith.constant 0 : i32
    %c0_i32_0 = arith.constant 0 : i32
    %c0_i32_1 = arith.constant 0 : i32
    return %arg0, %c0_i32, %c0_i32_0 : i32, i32, i32
  }
  func.func @transform_1(%arg0: i32, %arg1: i32) -> (i32, i32, i32) {
    %c0_i32 = arith.constant 0 : i32
    %c0_i32_0 = arith.constant 0 : i32
    %c0_i32_1 = arith.constant 0 : i32
    return %arg0, %c0_i32, %c0_i32_0 : i32, i32, i32
  }
  func.func @transform_2(%arg0: i32, %arg1: i32) -> (i32, i32, i32, i32) {
    %c0_i32 = arith.constant 0 : i32
    %c0_i32_0 = arith.constant 0 : i32
    %c0_i32_1 = arith.constant 0 : i32
    return %arg0, %arg1, %c0_i32, %c0_i32_0 : i32, i32, i32, i32
  }
  func.func @transform_3(%arg0: i32, %arg1: i32) -> (i32, i32, i32) {
    %c0_i32 = arith.constant 0 : i32
    %c0_i32_0 = arith.constant 0 : i32
    %c0_i32_1 = arith.constant 0 : i32
    return %arg1, %c0_i32, %c0_i32_0 : i32, i32, i32
  }
  func.func @transform_4(%arg0: i32, %arg1: i32) -> (i32, i32, i32) {
    %c0_i32 = arith.constant 0 : i32
    %c0_i32_0 = arith.constant 0 : i32
    %c0_i32_1 = arith.constant 0 : i32
    return %arg1, %c0_i32, %c0_i32_0 : i32, i32, i32
  }
  func.func @transform_5(%arg0: i32, %arg1: i32) -> (i32, i32, i32) {
    %c0_i32 = arith.constant 0 : i32
    %c0_i32_0 = arith.constant 0 : i32
    %c0_i32_1 = arith.constant 0 : i32
    return %arg1, %c0_i32, %c0_i32_0 : i32, i32, i32
  }
  func.func @transform_6(%arg0: i32, %arg1: i32) -> (i32, i32, i32) {
    %c0_i32 = arith.constant 0 : i32
    %c0_i32_0 = arith.constant 0 : i32
    %c0_i32_1 = arith.constant 0 : i32
    return %arg1, %c0_i32, %c0_i32_0 : i32, i32, i32
  }
  func.func @transform_7(%arg0: i32, %arg1: i32) -> (i32, i32, i32, i32) {
    %c0_i32 = arith.constant 0 : i32
    %c0_i32_0 = arith.constant 0 : i32
    %c0_i32_1 = arith.constant 0 : i32
    %c0_i32_2 = arith.constant 0 : i32
    return %arg1, %c0_i32, %c0_i32_0, %c0_i32_1 : i32, i32, i32, i32
  }
  func.func @transform_8(%arg0: i32, %arg1: i32) -> (i32, i32, i32, i32) {
    %c0_i32 = arith.constant 0 : i32
    %c0_i32_0 = arith.constant 0 : i32
    %c0_i32_1 = arith.constant 0 : i32
    %c0_i32_2 = arith.constant 0 : i32
    return %arg1, %c0_i32, %c0_i32_0, %c0_i32_1 : i32, i32, i32, i32
  }
  func.func @transform_9(%arg0: i32, %arg1: i32) -> (i32, i32, i32, i32) {
    %c0_i32 = arith.constant 0 : i32
    %c0_i32_0 = arith.constant 0 : i32
    %c0_i32_1 = arith.constant 0 : i32
    %c0_i32_2 = arith.constant 0 : i32
    return %arg1, %c0_i32, %c0_i32_0, %c0_i32_1 : i32, i32, i32, i32
  }
  func.func @transform_10(%arg0: i32, %arg1: i32) -> (i32, i32, i32) {
    %c0_i32 = arith.constant 0 : i32
    %c0_i32_0 = arith.constant 0 : i32
    %c0_i32_1 = arith.constant 0 : i32
    return %arg1, %c0_i32, %c0_i32_0 : i32, i32, i32
  }
  func.func @transform_11(%arg0: i32, %arg1: i32) -> (i32, i32, i32) {
    %c0_i32 = arith.constant 0 : i32
    %c0_i32_0 = arith.constant 0 : i32
    %c0_i32_1 = arith.constant 0 : i32
    return %arg1, %c0_i32, %c0_i32_0 : i32, i32, i32
  }
  func.func @transform_12(%arg0: i32, %arg1: i32) -> (i32, i32, i32) {
    %c0_i32 = arith.constant 0 : i32
    %c0_i32_0 = arith.constant 0 : i32
    %c0_i32_1 = arith.constant 0 : i32
    return %arg0, %c0_i32, %c0_i32_0 : i32, i32, i32
  }
  func.func @transform_13(%arg0: i32, %arg1: i32) -> (i32, i32, i32) {
    %c0_i32 = arith.constant 0 : i32
    %c0_i32_0 = arith.constant 0 : i32
    %c0_i32_1 = arith.constant 0 : i32
    return %arg0, %c0_i32, %c0_i32_0 : i32, i32, i32
  }
}

</mosaic_0001>

<bundles_post_ra>
// kernel: custom-call.7
= control target key start
LH: loop header
LB: loop body
LE: loop exit
PB: predicated region body
PF: predicated region fallthrough
CT: control target
= control target key end

     0   :  { %5 = vsyncpa [#allocation6], 0  ;;  %s557_s0 = inlined_call_operand.vmem [shape: f32[4,4], index: 0, kind: input, shape index: {}]   ;;  %s558_s1 = inlined_call_operand.vmem [shape: f32[4,4], index: 1, kind: output, shape index: {0}]   ;;  %s559_s2 = inlined_call_operand.hbm [shape: s32[4], index: 2, kind: output, shape index: {1}]   ;;  %s560_s3 = inlined_call_operand.hbm [shape: s32[4], index: 3, kind: output, shape index: {2}]  }
   0x1   :  { %6 = vsyncpa [#allocation9], 0  ;;  %v61_v0 = vld [vmem:[%s557_s0] sm:$0xf]  ;;  %v70_v1 = vlaneseq  ;;  %v482_v2 = vmov 0   ;;  %s512_s14 = smov 0  }
   0x2   :  { %62 = vst [vmem:[#allocation1] sm:$0xf] %v61_v0 }
   0x3   :  { %69 = vst [vmem:[#allocation4] sm:$0x1] %v482_v2  ;;  %v509_v3 = vshrl.u32 %v70_v1, 7 }
   0x5   :  { %74 = vst [vmem:[#allocation10] sm:$0xff] %v509_v3 }
   0x9   :  { %v65_v4 = vld [vmem:[#allocation1] sm:$0xf] }
   0xa   :  { %66 = vst [vmem:[#allocation0] sm:$0xf] %v65_v4 }
  0x11   :  { %v67_v5 = vld [vmem:[#allocation0] sm:$0xff] }
  0x12   :  { %68 = vst [vmem:[#allocation2] sm:$0xff] %v67_v5 }
  0x13 LB: > { %vm90_vm0 = vcmp.lt.s32.totalorder %v509_v3, 4  ;;  %v519_v8 = vstv %s480_s14  ;;  %s131_s0 = ssub.s32 128, %s480_s14  ;;  %v137_v39 = vand.u32 127, %v70_v1  ;;  %s143_s15 = scalar_lea.vmem [#allocation2], %s480_s14  ;;  %v140_v42 = vld [vmem:[#allocation4] ss:$0 sm:$0xff]  ;;  %s480_s14 = sphi %s512_s14, %s80_s14  }
  0x14   : > { %vm89_vm1 = vcmp.ge.s32.totalorder %v509_v3, %v519_v8  ;;  %s149_s18 = scalar_lea.vmem [#allocation10], %s480_s14  ;;  %vm169_vm14 = vcmp.gt.s32.totalorder %v509_v3, %v519_v8  ;;  %s80_s14 = sadd.s32 1, %s480_s14  }
  0x15   : > { %vm91_vm3 = vmand %vm89_vm1, %vm90_vm0  ;;  %vm138_vm12 = vcmp.eq.s32.totalorder %v137_v39, %v519_v8  ;;  %v151_v44 = vld [vmem:[%s149_s18] ss:$0 sm:$0xff]  ;;  %p77_p0 = scmp.ge.s32.totalorder %s80_s14, 4  }
  0x16   :  { %s483_s20 = smov (%p77_p0), [#allocation5]   ;;  %s323_s24 = sshll.u32 (%p77_p0), %s559_s2, 4  ;;  %s324_s24 = int_to_ptr.hbm [resolvable:$true] %s323_s24 }
  0x17   :  { %s321_s21 = sshll.u32 (%p77_p0), %s483_s20, 4  ;;  %s484_s27 = smov (%p77_p0), [#allocation8]   ;;  %s322_s21 = int_to_ptr.vmem [resolvable:$true] %s321_s21 }
  0x18   :  { %s332_s28 = sshll.u32 (%p77_p0), %s484_s27, 4  ;;  %s334_s2 = sshll.u32 (%p77_p0), %s560_s3, 4  ;;  %s333_s28 = int_to_ptr.vmem [resolvable:$true] %s332_s28  ;;  %s335_s2 = int_to_ptr.hbm [resolvable:$true] %s334_s2 }
  0x19   : > { %v85_v6 = vld [vmem:[#allocation2] sm:$0xff]  ;;  %v145_v40 = vld [vmem:[%s143_s15] ss:$0 sm:$0xff] }
  0x1a   : > { %v86_v7 = vand.u32 2147483647, %v85_v6 }
  0x1c   : > { %vm403_vm2 = vcmp.gt.f32.partialorder %v86_v7, -inf }
  0x1d   : > { %vm93_vm4 = vmand %vm91_vm3, %vm403_vm2 }
  0x1e   : > { %v94_v9 = vsel %vm93_vm4, %v509_v3, %v519_v8  ;;  %v95_v10 = vsel %vm93_vm4, %v86_v7, -inf  ;;  %vm186_vm4 = vmand %vm169_vm14, %vm138_vm12 }
  0x1f   : > { %v96_v11 = vrot.slane %v95_v10, 1  ;;  %v97_v12 = vrot.slane %v94_v9, 1 }
  0x21   : > { %vm98_vm5 = vcmp.ge.f32.partialorder %v96_v11, %v95_v10  ;;  %v101_v13 = vrot.slane %v96_v11, 1  ;;  %v102_v14 = vrot.slane %v97_v12, 1 }
  0x22   : > { %v99_v15 = vsel %vm98_vm5, %v96_v11, %v95_v10  ;;  %v100_v16 = vsel %vm98_vm5, %v97_v12, %v94_v9  ;;  %vm161_vm5 = vcmp.gt.s32.totalorder %v137_v39, %v519_v8 }
  0x23   : > { %vm103_vm6 = vcmp.ge.f32.partialorder %v101_v13, %v99_v15  ;;  %v106_v17 = vrot.slane %v101_v13, 1  ;;  %v107_v18 = vrot.slane %v102_v14, 1 }
  0x24   : > { %v104_v19 = vsel %vm103_vm6, %v101_v13, %v99_v15  ;;  %v105_v20 = vsel %vm103_vm6, %v102_v14, %v100_v16 }
  0x25   : > { %vm108_vm7 = vcmp.ge.f32.partialorder %v106_v17, %v104_v19  ;;  %v111_v21 = vrot.slane %v106_v17, 1  ;;  %v112_v22 = vrot.slane %v107_v18, 1 }
  0x26   : > { %v109_v23 = vsel %vm108_vm7, %v106_v17, %v104_v19  ;;  %v110_v24 = vsel %vm108_vm7, %v107_v18, %v105_v20 }
  0x27   : > { %vm113_vm8 = vcmp.ge.f32.partialorder %v111_v21, %v109_v23  ;;  %v116_v25 = vrot.slane %v111_v21, 1  ;;  %v117_v26 = vrot.slane %v112_v22, 1 }
  0x28   : > { %v114_v27 = vsel %vm113_vm8, %v111_v21, %v109_v23  ;;  %v115_v28 = vsel %vm113_vm8, %v112_v22, %v110_v24 }
  0x29   : > { %vm118_vm9 = vcmp.ge.f32.partialorder %v116_v25, %v114_v27  ;;  %v121_v29 = vrot.slane %v116_v25, 1  ;;  %v122_v30 = vrot.slane %v117_v26, 1 }
  0x2a   : > { %v119_v31 = vsel %vm118_vm9, %v116_v25, %v114_v27  ;;  %v120_v32 = vsel %vm118_vm9, %v117_v26, %v115_v28 }
  0x2b   : > { %vm123_vm10 = vcmp.ge.f32.partialorder %v121_v29, %v119_v31  ;;  %v126_v33 = vrot.slane %v121_v29, 1  ;;  %v127_v34 = vrot.slane %v122_v30, 1 }
  0x2c   : > { %v124_v35 = vsel %vm123_vm10, %v121_v29, %v119_v31  ;;  %v125_v36 = vsel %vm123_vm10, %v122_v30, %v120_v32 }
  0x2d   : > { %vm128_vm11 = vcmp.ge.f32.partialorder %v126_v33, %v124_v35 }
  0x2e   : > { %v130_v37 = vsel %vm128_vm11, %v127_v34, %v125_v36 }
  0x2f   : > { %132 = vrot.lane.b32.xlu0 %v130_v37, %s131_s0 }
  0xa1   : > { %v133_v38 = vpop.permute.xlu0 %132 }
  0xa2   : > { %407 = vpush %v133_v38 }
  0xd3   : > { %s408_s16 = spop %407 }
  0xd4   : > { %v139_v41 = vstv %s408_s16  ;;  %s144_s17 = scalar_lea.vmem [#allocation2], %s408_s16  ;;  %s150_s19 = scalar_lea.vmem [#allocation10], %s408_s16 }
  0xd5   : > { %v146_v43 = vld [vmem:[%s144_s17] ss:$0 sm:$0xff]  ;;  %v141_v46 = vsel %vm138_vm12, %v139_v41, %v140_v42 }
  0xd6   : > { %v152_v45 = vld [vmem:[%s150_s19] ss:$0 sm:$0xff]  ;;  %147 = vst [vmem:[%s144_s17] sm:$0x1] %v145_v40  ;;  %vm155_vm13 = vcmp.ne.f32.partialorder %v146_v43, 0.0  ;;  %v162_v62 = vsel %vm161_vm5, %v146_v43, 0.0 }
  0xd7   : > { %148 = vst [vmem:[%s143_s15] sm:$0x1] %v146_v43  ;;  %vm156_vm15 = vmand %vm138_vm12, %vm155_vm13 }
  0xd8   : > { %153 = vst [vmem:[%s150_s19] sm:$0x1] %v151_v44  ;;  %v157_v47 = vsel %vm156_vm15, %v146_v43, 1.0 }
  0xd9   : > { %154 = vst [vmem:[%s149_s18] sm:$0x1] %v152_v45  ;;  %v170_v48 = vsel %vm169_vm14, %v157_v47, 1.0 }
  0xda   : > { %420 = vrcp.f32 %v170_v48  ;;  %142 = vst [vmem:[#allocation4] sm:$0x1] %v141_v46  ;;  %v182_v52 = vand.u32 2147483648, %v170_v48  ;;  %v180_v54 = vand.u32 2147483647, %v170_v48  ;;  %vm176_vm1 = vweird.f32 %v170_v48 }
  0xdc   : > { %v183_v56 = vor.u32 1.1754944e-38, %v182_v52  ;;  %vm181_vm3 = vcmp.eq.f32.partialorder %v180_v54, 8.507059e+37 }
  0xde   : > { %v166_v58 = vld [vmem:[#allocation2] sm:$0xff] }
  0xe0   : > { %v421_v49 = vpop.eup %420  ;;  %v193_v4 = vld [vmem:[#allocation10] sm:$0xff] (%p77_p0) }
  0xe1   : > { %v172_v50 = vmul.f32 %v421_v49, %v170_v48  ;;  %vm177_vm0 = vweird.f32 %v421_v49  ;;  %v250_v6 = vld [vmem:[#allocation4] sm:$0x1] (%p77_p0) }
  0xe2   : > { %vm178_vm2 = vmor %vm176_vm1, %vm177_vm0  ;;  %253 = vst [vmem:[#allocation5] sm:$0x1] (%p77_p0), %v250_v6 }
  0xe3   : > { %v173_v51 = vsub.f32 1.0, %v172_v50  ;;  %326 = dma.vmem_to_hbm [thread:$0]  (%p77_p0), %s322_s21, 16, %s324_s24, [#allocation6]  }
  0xe5   : > { %v174_v53 = vmul.f32 %v421_v49, %v173_v51 }
  0xe7   : > { %v175_v55 = vadd.f32 %v421_v49, %v174_v53 }
  0xe9   : > { %v179_v57 = vsel %vm178_vm2, %v421_v49, %v175_v55 }
  0xea   : > { %v184_v59 = vsel %vm181_vm3, %v183_v56, %v179_v57 }
  0xeb   : > { %v185_v60 = vmul.f32 %v184_v59, %v166_v58 }
  0xed   : > { %v187_v61 = vsel %vm186_vm4, %v185_v60, 0.0 }
  0xee   : > { %188 = vadd.xlane.f32.xlu0 %v187_v61 }
 0x117   :  { %209 = vxpose.xlu0.b32.start.end [1/1] (short) (narrow) (%p77_p0), %v193_v4, 8 }
 0x161   : > { %v189_v63 = vpop.xlane.xlu0 %188 }
 0x162   : > { %v190_v0 = vmul.f32 %v189_v63, %v162_v62  ;;  %79 = sbr.rel (!%p77_p0) target bundleno = 19 (0x13), region = 134 }
 0x164   : > { %v191_v2 = vsub.f32 %v185_v60, %v190_v0 }
 0x166   : > { %192 = vst [vmem:[#allocation2] sm:$0xff] %v191_v2 }
 0x16d   :  { %v244_v5 = vld [vmem:[#allocation2] sm:$0xf] }
 0x16e   :  { %247 = vst [vmem:[#allocation3] sm:$0xf] %v244_v5 }
 0x175   :  { %v314_v7 = vld [vmem:[#allocation3] sm:$0xf] }
 0x176   :  { %315 = vst [vmem:[%s558_s1] sm:$0xf] %v314_v7 }
 0x1bb   :  { %v225_v1 = vpop.trf.xlu0 }
 0x1bc   :  { %241 = vst [vmem:[#allocation7] sm:$0x1] %v225_v1 }
 0x1c3   :  { %v256_v3 = vld [vmem:[#allocation7] sm:$0x1] }
 0x1c4   :  { %259 = vst [vmem:[#allocation8] sm:$0x1] %v256_v3 }
 0x1c5   :  { %337 = dma.vmem_to_hbm [thread:$0]  %s333_s28, 16, %s335_s2, [#allocation9]  }
 0x1c6   :  { %474 = dma.done.wait [#allocation6], 16  }
 0x1c7   :  { %475 = vsyncadd [#allocation6], 4294967280 }
 0x1c8   :  { %476 = dma.done.wait [#allocation9], 16  }
 0x1c9   :  { %477 = vsyncadd [#allocation9], 4294967280 }
 0x1ca   :  { %346 = vsyncpa [#allocation6], 1 }
 0x1cb   :  { %347 = vsyncpa [#allocation9], 1 }

// kernel: mul.51
= control target key start
LH: loop header
LB: loop body
LE: loop exit
PB: predicated region body
PF: predicated region fallthrough
CT: control target
= control target key end

     0   :  { %vm5_vm0 = vcmask 1041409   ;;  %vm9_vm1 = vcmask 1042434   ;;  %vm13_vm2 = vcmask 1043459   ;;  %s1610_s28 = smov 126   ;;  %s1611_s6 = smov 122   ;;  %vm15_vm3 = vcmask 15360   ;;  %s2711_s0 = inlined_call_operand.vmem [shape: f32[2,128,1,2], index: 0, kind: input, shape index: {}]   ;;  %s2712_s1 = inlined_call_operand.vmem [shape: f32[2,256], index: 1, kind: output, shape index: {}]  }
   0x1   :  { %v1294_v0 = vld [vmem:[%s2711_s0 + $0x3f] sm:$0x1]   ;;  %v1302_v5 = vld [vmem:[%s2711_s0 + $0x3d] sm:$0x1]   ;;  %v1298_v11 = vld [vmem:[%s2711_s0 + $0x3e] sm:$0x1]  }
   0x2   :  { %v1295_v1 = vld [vmem:[%s2711_s0 + $0xbe] sm:$0x2]   ;;  %v1303_v6 = vld [vmem:[%s2711_s0 + $0xbc] sm:$0x2]   ;;  %v1299_v14 = vld [vmem:[%s2711_s0 + $0xbd] sm:$0x2]  }
   0x3   :  { %v1296_v2 = vld [vmem:[%s2711_s0 + $0x7d] sm:$0x4]   ;;  %v24_v4 = vsel %vm5_vm0, %v1295_v1, %v1294_v0  ;;  %v1304_v7 = vld [vmem:[%s2711_s0 + $0x7b] sm:$0x4]   ;;  %v64_v9 = vsel %vm5_vm0, %v1303_v6, %v1302_v5  ;;  %v1300_v15 = vld [vmem:[%s2711_s0 + $0x7c] sm:$0x4]   ;;  %v44_v17 = vsel %vm5_vm0, %v1299_v14, %v1298_v11 }
   0x4   :  { %v1297_v3 = vld [vmem:[%s2711_s0 + $0xfc] sm:$0x8]   ;;  %v28_v8 = vsel %vm9_vm1, %v1296_v2, %v24_v4  ;;  %v1305_v10 = vld [vmem:[%s2711_s0 + $0xfa] sm:$0x8]   ;;  %v68_v13 = vsel %vm9_vm1, %v1304_v7, %v64_v9  ;;  %v1306_v18 = vld [vmem:[%s2711_s0 + $0x3c] sm:$0x1]   ;;  %v48_v22 = vsel %vm9_vm1, %v1300_v15, %v44_v17 }
   0x5   :  { %v32_v12 = vsel %vm13_vm2, %v1297_v3, %v28_v8  ;;  %v72_v16 = vsel %vm13_vm2, %v1305_v10, %v68_v13  ;;  %v1307_v19 = vld [vmem:[%s2711_s0 + $0xbb] sm:$0x2]   ;;  %v1301_v23 = vld [vmem:[%s2711_s0 + $0xfb] sm:$0x8]   ;;  %v1318_v26 = vld [vmem:[%s2711_s0 + $0x39] sm:$0x1]  }
   0x6   :  { %33 = vrot.lane.b32.xlu0 %v32_v12, %s1610_s28  ;;  %v1308_v20 = vld [vmem:[%s2711_s0 + $0x7a] sm:$0x4]   ;;  %73 = vrot.lane.b32.xlu1 %v72_v16, %s1611_s6  ;;  %v84_v21 = vsel %vm5_vm0, %v1307_v19, %v1306_v18  ;;  %v1319_v27 = vld [vmem:[%s2711_s0 + $0xb8] sm:$0x2]   ;;  %v52_v28 = vsel %vm13_vm2, %v1301_v23, %v48_v22  ;;  %s1612_s25 = smov 124   ;;  %s1613_s3 = smov 120  }
   0x7   :  { %v88_v24 = vsel %vm9_vm1, %v1308_v20, %v84_v21  ;;  %v1309_v25 = vld [vmem:[%s2711_s0 + $0xf9] sm:$0x8]   ;;  %v1322_v29 = vld [vmem:[%s2711_s0 + $0x38] sm:$0x1]   ;;  %v144_v32 = vsel %vm5_vm0, %v1319_v27, %v1318_v26  ;;  %v1320_v33 = vld [vmem:[%s2711_s0 + $0x77] sm:$0x4]  }
   0x8   :  { %v1323_v30 = vld [vmem:[%s2711_s0 + $0xb7] sm:$0x2]   ;;  %v92_v31 = vsel %vm13_vm2, %v1309_v25, %v88_v24  ;;  %v1310_v35 = vld [vmem:[%s2711_s0 + $0x3b] sm:$0x1]   ;;  %v148_v41 = vsel %vm9_vm1, %v1320_v33, %v144_v32  ;;  %v1321_v42 = vld [vmem:[%s2711_s0 + $0xf6] sm:$0x8]  }
   0x9   :  { %v1324_v34 = vld [vmem:[%s2711_s0 + $0x76] sm:$0x4]   ;;  %v164_v36 = vsel %vm5_vm0, %v1323_v30, %v1322_v29  ;;  %v1311_v37 = vld [vmem:[%s2711_s0 + $0xba] sm:$0x2]   ;;  %v1330_v46 = vld [vmem:[%s2711_s0 + $0x36] sm:$0x1]   ;;  %v152_v52 = vsel %vm13_vm2, %v1321_v42, %v148_v41 }
   0xa   :  { %v1312_v38 = vld [vmem:[%s2711_s0 + $0x79] sm:$0x4]   ;;  %v104_v40 = vsel %vm5_vm0, %v1311_v37, %v1310_v35  ;;  %v168_v44 = vsel %vm9_vm1, %v1324_v34, %v164_v36  ;;  %v1325_v45 = vld [vmem:[%s2711_s0 + $0xf5] sm:$0x8]   ;;  %v1331_v47 = vld [vmem:[%s2711_s0 + $0xb5] sm:$0x2]  }
   0xb   :  { %v1313_v39 = vld [vmem:[%s2711_s0 + $0xf8] sm:$0x8]   ;;  %v108_v43 = vsel %vm9_vm1, %v1312_v38, %v104_v40  ;;  %s1614_s12 = smov 118   ;;  %v1314_v49 = vld [vmem:[%s2711_s0 + $0x3a] sm:$0x1]   ;;  %v172_v56 = vsel %vm13_vm2, %v1325_v45, %v168_v44  ;;  %v204_v59 = vsel %vm5_vm0, %v1331_v47, %v1330_v46  ;;  %s1615_s27 = smov 114  }
   0xc   :  { %v112_v48 = vsel %vm13_vm2, %v1313_v39, %v108_v43  ;;  %v1315_v50 = vld [vmem:[%s2711_s0 + $0xb9] sm:$0x2]   ;;  %v1334_v53 = vld [vmem:[%s2711_s0 + $0x35] sm:$0x1]   ;;  %v1332_v60 = vld [vmem:[%s2711_s0 + $0x74] sm:$0x4]  }
   0xd   :  { %113 = vrot.lane.b32.xlu2 %v112_v48, %s1614_s12  ;;  %v1316_v51 = vld [vmem:[%s2711_s0 + $0x78] sm:$0x4]   ;;  %v1335_v54 = vld [vmem:[%s2711_s0 + $0xb4] sm:$0x2]   ;;  %v124_v55 = vsel %vm5_vm0, %v1315_v50, %v1314_v49  ;;  %v1326_v63 = vld [vmem:[%s2711_s0 + $0x37] sm:$0x1]   ;;  %v208_v2 = vsel %vm9_vm1, %v1332_v60, %v204_v59 }
   0xe   :  { %53 = vrot.lane.b32.xlu0 %v52_v28, %s1612_s25  ;;  %93 = vrot.lane.b32.xlu1 %v92_v31, %s1613_s3  ;;  %v128_v57 = vsel %vm9_vm1, %v1316_v51, %v124_v55  ;;  %v1317_v58 = vld [vmem:[%s2711_s0 + $0xf7] sm:$0x8]   ;;  %v224_v61 = vsel %vm5_vm0, %v1335_v54, %v1334_v53  ;;  %v1336_v62 = vld [vmem:[%s2711_s0 + $0x73] sm:$0x4]   ;;  %s1616_s3 = smov 112   ;;  %s1617_s16 = smov 116  }
   0xf   :  { %v132_v0 = vsel %vm13_vm2, %v1317_v58, %v128_v57  ;;  %v1327_v1 = vld [vmem:[%s2711_s0 + $0xb6] sm:$0x2]   ;;  %v1333_v3 = vld [vmem:[%s2711_s0 + $0xf3] sm:$0x8]   ;;  %v228_v4 = vsel %vm9_vm1, %v1336_v62, %v224_v61  ;;  %v1337_v5 = vld [vmem:[%s2711_s0 + $0xf2] sm:$0x8]  }
  0x10   :  { %v184_v6 = vsel %vm5_vm0, %v1327_v1, %v1326_v63  ;;  %v1328_v7 = vld [vmem:[%s2711_s0 + $0x75] sm:$0x4]   ;;  %v1342_v8 = vld [vmem:[%s2711_s0 + $0x33] sm:$0x1]   ;;  %v212_v10 = vsel %vm13_vm2, %v1333_v3, %v208_v2  ;;  %v1346_v11 = vld [vmem:[%s2711_s0 + $0x32] sm:$0x1]   ;;  %v232_v13 = vsel %vm13_vm2, %v1337_v5, %v228_v4 }
  0x11   :  { %v1343_v9 = vld [vmem:[%s2711_s0 + $0xb2] sm:$0x2]   ;;  %v1347_v12 = vld [vmem:[%s2711_s0 + $0xb1] sm:$0x2]   ;;  %v188_v14 = vsel %vm9_vm1, %v1328_v7, %v184_v6  ;;  %v1329_v15 = vld [vmem:[%s2711_s0 + $0xf4] sm:$0x8]  }
  0x12   :  { %v264_v16 = vsel %vm5_vm0, %v1343_v9, %v1342_v8  ;;  %v1344_v17 = vld [vmem:[%s2711_s0 + $0x71] sm:$0x4]   ;;  %s1618_s25 = smov 108   ;;  %v284_v18 = vsel %vm5_vm0, %v1347_v12, %v1346_v11  ;;  %v1348_v19 = vld [vmem:[%s2711_s0 + $0x70] sm:$0x4]   ;;  %v192_v22 = vsel %vm13_vm2, %v1329_v15, %v188_v14  ;;  %s1620_s14 = smov 110  }
  0x13   :  { %v1338_v20 = vld [vmem:[%s2711_s0 + $0x34] sm:$0x1]   ;;  %v268_v23 = vsel %vm9_vm1, %v1344_v17, %v264_v16  ;;  %v1345_v24 = vld [vmem:[%s2711_s0 + $0xf0] sm:$0x8]   ;;  %v288_v25 = vsel %vm9_vm1, %v1348_v19, %v284_v18  ;;  %v1349_v26 = vld [vmem:[%s2711_s0 + $0xef] sm:$0x8]  }
  0x14   :  { %v1339_v21 = vld [vmem:[%s2711_s0 + $0xb3] sm:$0x2]   ;;  %v1354_v29 = vld [vmem:[%s2711_s0 + $0x30] sm:$0x1]   ;;  %v272_v31 = vsel %vm13_vm2, %v1345_v24, %v268_v23  ;;  %v1358_v32 = vld [vmem:[%s2711_s0 + $0x2f] sm:$0x1]   ;;  %v292_v34 = vsel %vm13_vm2, %v1349_v26, %v288_v25 }
  0x15   :  { %133 = vrot.lane.b32.xlu2 %v132_v0, %s1617_s16  ;;  %v244_v27 = vsel %vm5_vm0, %v1339_v21, %v1338_v20  ;;  %v1340_v28 = vld [vmem:[%s2711_s0 + $0x72] sm:$0x4]   ;;  %v1355_v30 = vld [vmem:[%s2711_s0 + $0xaf] sm:$0x2]   ;;  %v1359_v33 = vld [vmem:[%s2711_s0 + $0xae] sm:$0x2]  }
  0x16   :  { %153 = vrot.lane.b32.xlu0 %v152_v52, %s1615_s27  ;;  %173 = vrot.lane.b32.xlu1 %v172_v56, %s1616_s3  ;;  %s1619_s3 = smov 106   ;;  %v248_v35 = vsel %vm9_vm1, %v1340_v28, %v244_v27  ;;  %v1341_v36 = vld [vmem:[%s2711_s0 + $0xf1] sm:$0x8]   ;;  %v324_v37 = vsel %vm5_vm0, %v1355_v30, %v1354_v29  ;;  %v1356_v38 = vld [vmem:[%s2711_s0 + $0x6e] sm:$0x4]   ;;  %s1621_s23 = smov 102   ;;  %v344_v39 = vsel %vm5_vm0, %v1359_v33, %v1358_v32 }
  0x17   :  { %v1360_v40 = vld [vmem:[%s2711_s0 + $0x6d] sm:$0x4]   ;;  %v1350_v41 = vld [vmem:[%s2711_s0 + $0x31] sm:$0x1]   ;;  %s1622_s30 = smov 100   ;;  %v252_v43 = vsel %vm13_vm2, %v1341_v36, %v248_v35  ;;  %v328_v44 = vsel %vm9_vm1, %v1356_v38, %v324_v37  ;;  %s1623_s12 = smov 104  }
  0x18   :  { %v1351_v42 = vld [vmem:[%s2711_s0 + $0xb0] sm:$0x2]   ;;  %v1357_v45 = vld [vmem:[%s2711_s0 + $0xed] sm:$0x8]   ;;  %v348_v46 = vsel %vm9_vm1, %v1360_v40, %v344_v39  ;;  %v1361_v47 = vld [vmem:[%s2711_s0 + $0xec] sm:$0x8]  }
  0x19   :  { %v304_v48 = vsel %vm5_vm0, %v1351_v42, %v1350_v41  ;;  %v1352_v49 = vld [vmem:[%s2711_s0 + $0x6f] sm:$0x4]   ;;  %v1366_v50 = vld [vmem:[%s2711_s0 + $0x2d] sm:$0x1]   ;;  %v332_v52 = vsel %vm13_vm2, %v1357_v45, %v328_v44  ;;  %v1370_v53 = vld [vmem:[%s2711_s0 + $0x2c] sm:$0x1]   ;;  %v352_v55 = vsel %vm13_vm2, %v1361_v47, %v348_v46 }
  0x1a   :  { %v1367_v51 = vld [vmem:[%s2711_s0 + $0xac] sm:$0x2]   ;;  %v1371_v54 = vld [vmem:[%s2711_s0 + $0xab] sm:$0x2]   ;;  %v308_v56 = vsel %vm9_vm1, %v1352_v49, %v304_v48  ;;  %v1353_v57 = vld [vmem:[%s2711_s0 + $0xee] sm:$0x8]  }
  0x1b   :  { %v384_v58 = vsel %vm5_vm0, %v1367_v51, %v1366_v50  ;;  %v1368_v59 = vld [vmem:[%s2711_s0 + $0x6b] sm:$0x4]   ;;  %s1624_s21 = smov 96   ;;  %v404_v60 = vsel %vm5_vm0, %v1371_v54, %v1370_v53  ;;  %v1372_v61 = vld [vmem:[%s2711_s0 + $0x6a] sm:$0x4]   ;;  %s1625_s28 = smov 94   ;;  %v312_v0 = vsel %vm13_vm2, %v1353_v57, %v308_v56 }
  0x1c   :  { %v1362_v62 = vld [vmem:[%s2711_s0 + $0x2e] sm:$0x1]   ;;  %v388_v1 = vsel %vm9_vm1, %v1368_v59, %v384_v58  ;;  %v1369_v2 = vld [vmem:[%s2711_s0 + $0xea] sm:$0x8]   ;;  %v408_v3 = vsel %vm9_vm1, %v1372_v61, %v404_v60  ;;  %v1373_v4 = vld [vmem:[%s2711_s0 + $0xe9] sm:$0x8]  }
  0x1d   :  { %193 = vrot.lane.b32.xlu2 %v192_v22, %s1620_s14  ;;  %v1363_v63 = vld [vmem:[%s2711_s0 + $0xad] sm:$0x2]   ;;  %v1378_v7 = vld [vmem:[%s2711_s0 + $0x2a] sm:$0x1]   ;;  %s1626_s10 = smov 98   ;;  %v392_v9 = vsel %vm13_vm2, %v1369_v2, %v388_v1  ;;  %v412_v12 = vsel %vm13_vm2, %v1373_v4, %v408_v3  ;;  %s1627_s19 = smov 90  }
  0x1e   :  { %213 = vrot.lane.b32.xlu0 %v212_v10, %s1618_s25  ;;  %233 = vrot.lane.b32.xlu1 %v232_v13, %s1619_s3  ;;  %v364_v5 = vsel %vm5_vm0, %v1363_v63, %v1362_v62  ;;  %v1364_v6 = vld [vmem:[%s2711_s0 + $0x6c] sm:$0x4]   ;;  %v1379_v8 = vld [vmem:[%s2711_s0 + $0xa9] sm:$0x2]   ;;  %s1628_s26 = smov 88   ;;  %s1629_s8 = smov 92  }
  0x1f   :  { %v1382_v10 = vld [vmem:[%s2711_s0 + $0x29] sm:$0x1]   ;;  %v368_v13 = vsel %vm9_vm1, %v1364_v6, %v364_v5  ;;  %v1365_v14 = vld [vmem:[%s2711_s0 + $0xeb] sm:$0x8]   ;;  %v444_v15 = vsel %vm5_vm0, %v1379_v8, %v1378_v7  ;;  %v1380_v16 = vld [vmem:[%s2711_s0 + $0x68] sm:$0x4]  }
  0x20   :  { %v1383_v11 = vld [vmem:[%s2711_s0 + $0xa8] sm:$0x2]   ;;  %v1374_v19 = vld [vmem:[%s2711_s0 + $0x2b] sm:$0x1]   ;;  %v372_v21 = vsel %vm13_vm2, %v1365_v14, %v368_v13  ;;  %v448_v22 = vsel %vm9_vm1, %v1380_v16, %v444_v15  ;;  %v1381_v23 = vld [vmem:[%s2711_s0 + $0xe7] sm:$0x8]  }
  0x21   :  { %v464_v17 = vsel %vm5_vm0, %v1383_v11, %v1382_v10  ;;  %v1384_v18 = vld [vmem:[%s2711_s0 + $0x67] sm:$0x4]   ;;  %v1375_v20 = vld [vmem:[%s2711_s0 + $0xaa] sm:$0x2]   ;;  %v1390_v28 = vld [vmem:[%s2711_s0 + $0x27] sm:$0x1]   ;;  %v452_v30 = vsel %vm13_vm2, %v1381_v23, %v448_v22 }
  0x22   :  { %v468_v24 = vsel %vm9_vm1, %v1384_v18, %v464_v17  ;;  %v1385_v25 = vld [vmem:[%s2711_s0 + $0xe6] sm:$0x8]   ;;  %v424_v26 = vsel %vm5_vm0, %v1375_v20, %v1374_v19  ;;  %v1376_v27 = vld [vmem:[%s2711_s0 + $0x69] sm:$0x4]   ;;  %v1391_v29 = vld [vmem:[%s2711_s0 + $0xa6] sm:$0x2]  }
  0x23   :  { %v1395_v32 = vld [vmem:[%s2711_s0 + $0xa5] sm:$0x2]   ;;  %v472_v33 = vsel %vm13_vm2, %v1385_v25, %v468_v24  ;;  %v1377_v35 = vld [vmem:[%s2711_s0 + $0xe8] sm:$0x8]   ;;  %v504_v36 = vsel %vm5_vm0, %v1391_v29, %v1390_v28  ;;  %v1392_v37 = vld [vmem:[%s2711_s0 + $0x65] sm:$0x4]  }
  0x24   :  { %s1630_s17 = smov 84   ;;  %v1396_v39 = vld [vmem:[%s2711_s0 + $0x64] sm:$0x4]   ;;  %v1386_v40 = vld [vmem:[%s2711_s0 + $0x28] sm:$0x1]   ;;  %s1631_s24 = smov 82  }
  0x25   :  { %253 = vrot.lane.b32.xlu2 %v252_v43, %s1623_s12  ;;  %v1387_v41 = vld [vmem:[%s2711_s0 + $0xa7] sm:$0x2]   ;;  %v508_v43 = vsel %vm9_vm1, %v1392_v37, %v504_v36  ;;  %v1393_v44 = vld [vmem:[%s2711_s0 + $0xe4] sm:$0x8]   ;;  %v1397_v46 = vld [vmem:[%s2711_s0 + $0xe3] sm:$0x8]  }
  0x26   :  { %273 = vrot.lane.b32.xlu0 %v272_v31, %s1621_s23  ;;  %293 = vrot.lane.b32.xlu1 %v292_v34, %s1622_s30  ;;  %v1394_v31 = vld [vmem:[%s2711_s0 + $0x26] sm:$0x1]   ;;  %v428_v34 = vsel %vm9_vm1, %v1376_v27, %v424_v26  ;;  %v484_v47 = vsel %vm5_vm0, %v1387_v41, %v1386_v40  ;;  %v1388_v48 = vld [vmem:[%s2711_s0 + $0x66] sm:$0x4]   ;;  %s1632_s6 = smov 86   ;;  %v512_v51 = vsel %vm13_vm2, %v1393_v44, %v508_v43  ;;  %s1633_s15 = smov 78  }
  0x27   :  { %v524_v38 = vsel %vm5_vm0, %v1395_v32, %v1394_v31  ;;  %v432_v42 = vsel %vm13_vm2, %v1377_v35, %v428_v34  ;;  %v1402_v49 = vld [vmem:[%s2711_s0 + $0x24] sm:$0x1]   ;;  %v1407_v53 = vld [vmem:[%s2711_s0 + $0xa2] sm:$0x2]   ;;  %v1389_v56 = vld [vmem:[%s2711_s0 + $0xe5] sm:$0x8]  }
  0x28   :  { %v528_v45 = vsel %vm9_vm1, %v1396_v39, %v524_v38  ;;  %v1403_v50 = vld [vmem:[%s2711_s0 + $0xa3] sm:$0x2]   ;;  %v1408_v60 = vld [vmem:[%s2711_s0 + $0x61] sm:$0x4]   ;;  %v1398_v61 = vld [vmem:[%s2711_s0 + $0x25] sm:$0x1]  }
  0x29   :  { %v532_v54 = vsel %vm13_vm2, %v1397_v46, %v528_v45  ;;  %v564_v57 = vsel %vm5_vm0, %v1403_v50, %v1402_v49  ;;  %v1404_v58 = vld [vmem:[%s2711_s0 + $0x62] sm:$0x4]   ;;  %v1399_v62 = vld [vmem:[%s2711_s0 + $0xa4] sm:$0x2]   ;;  %s1634_s22 = smov 76   ;;  %s1635_s4 = smov 80  }
  0x2a   :  { %v1405_v1 = vld [vmem:[%s2711_s0 + $0xe1] sm:$0x8]   ;;  %v1409_v3 = vld [vmem:[%s2711_s0 + $0xe0] sm:$0x8]   ;;  %v544_v4 = vsel %vm5_vm0, %v1399_v62, %v1398_v61  ;;  %v1400_v5 = vld [vmem:[%s2711_s0 + $0x63] sm:$0x4]  }
  0x2b   :  { %v1414_v6 = vld [vmem:[%s2711_s0 + $0x21] sm:$0x1]   ;;  %v1419_v10 = vld [vmem:[%s2711_s0 + $0x9f] sm:$0x2]   ;;  %v1401_v13 = vld [vmem:[%s2711_s0 + $0xe2] sm:$0x8]  }
  0x2c   :  { %v1415_v7 = vld [vmem:[%s2711_s0 + $0xa0] sm:$0x2]   ;;  %s1636_s13 = smov 72   ;;  %v1420_v17 = vld [vmem:[%s2711_s0 + $0x5e] sm:$0x4]   ;;  %s1637_s20 = smov 70  }
  0x2d   :  { %313 = vrot.lane.b32.xlu2 %v312_v0, %s1626_s10  ;;  %v568_v0 = vsel %vm9_vm1, %v1404_v58, %v564_v57  ;;  %v624_v14 = vsel %vm5_vm0, %v1415_v7, %v1414_v6  ;;  %v1416_v15 = vld [vmem:[%s2711_s0 + $0x5f] sm:$0x4]   ;;  %v1410_v18 = vld [vmem:[%s2711_s0 + $0x22] sm:$0x1]   ;;  %v1421_v24 = vld [vmem:[%s2711_s0 + $0xdd] sm:$0x8]  }
  0x2e   :  { %333 = vrot.lane.b32.xlu0 %v332_v52, %s1624_s21  ;;  %353 = vrot.lane.b32.xlu1 %v352_v55, %s1625_s28  ;;  %v1406_v52 = vld [vmem:[%s2711_s0 + $0x23] sm:$0x1]   ;;  %v488_v55 = vsel %vm9_vm1, %v1388_v48, %v484_v47  ;;  %v572_v8 = vsel %vm13_vm2, %v1405_v1, %v568_v0  ;;  %v1411_v19 = vld [vmem:[%s2711_s0 + $0xa1] sm:$0x2]   ;;  %s1638_s2 = smov 74   ;;  %s1641_s10 = smov 68  }
  0x2f   :  { %v584_v59 = vsel %vm5_vm0, %v1407_v53, %v1406_v52  ;;  %v492_v63 = vsel %vm13_vm2, %v1389_v56, %v488_v55  ;;  %v1417_v22 = vld [vmem:[%s2711_s0 + $0xde] sm:$0x8]   ;;  %v604_v25 = vsel %vm5_vm0, %v1411_v19, %v1410_v18  ;;  %v1412_v26 = vld [vmem:[%s2711_s0 + $0x60] sm:$0x4]   ;;  %v1426_v27 = vld [vmem:[%s2711_s0 + $0x1e] sm:$0x1]  }
  0x30   :  { %v588_v2 = vsel %vm9_vm1, %v1408_v60, %v584_v59  ;;  %v1427_v28 = vld [vmem:[%s2711_s0 + $0x9d] sm:$0x2]   ;;  %v1431_v31 = vld [vmem:[%s2711_s0 + $0x9c] sm:$0x2]   ;;  %v1413_v34 = vld [vmem:[%s2711_s0 + $0xdf] sm:$0x8]  }
  0x31   :  { %v592_v11 = vsel %vm13_vm2, %v1409_v3, %v588_v2  ;;  %v684_v35 = vsel %vm5_vm0, %v1427_v28, %v1426_v27  ;;  %v1428_v36 = vld [vmem:[%s2711_s0 + $0x5c] sm:$0x4]   ;;  %v1432_v37 = vld [vmem:[%s2711_s0 + $0x5b] sm:$0x4]   ;;  %v1422_v38 = vld [vmem:[%s2711_s0 + $0x1f] sm:$0x1]  }
  0x32   :  { %v1423_v40 = vld [vmem:[%s2711_s0 + $0x9e] sm:$0x2]   ;;  %v1292_v41 = vld [vmem:[%s2711_s0 + $0x7e] sm:$0x4]   ;;  %v688_v46 = vsel %vm9_vm1, %v1428_v36, %v684_v35  ;;  %v1429_v47 = vld [vmem:[%s2711_s0 + $0xdb] sm:$0x8]  }
  0x33   :  { %v1293_v44 = vld [vmem:[%s2711_s0 + $0xbd] sm:$0x8]   ;;  %v1433_v50 = vld [vmem:[%s2711_s0 + $0xda] sm:$0x8]   ;;  %v1424_v52 = vld [vmem:[%s2711_s0 + $0x5d] sm:$0x4]   ;;  %v692_v58 = vsel %vm13_vm2, %v1429_v47, %v688_v46 }
  0x34   :  { %v1291_v45 = vld [vmem:[%s2711_s0 + $0x3f] sm:$0x2]   ;;  %v1439_v55 = vld [vmem:[%s2711_s0 + $0x9a] sm:$0x2]   ;;  %v1442_v56 = vld [vmem:[%s2711_s0 + $0x1a] sm:$0x1]  }
  0x35   :  { %373 = vrot.lane.b32.xlu2 %v372_v21, %s1629_s8  ;;  %v628_v21 = vsel %vm9_vm1, %v1416_v15, %v624_v14  ;;  %v1443_v59 = vld [vmem:[%s2711_s0 + $0x99] sm:$0x2]   ;;  %v1425_v62 = vld [vmem:[%s2711_s0 + $0xdc] sm:$0x8]   ;;  %v1440_v0 = vld [vmem:[%s2711_s0 + $0x59] sm:$0x4]  }
  0x36   :  { %393 = vrot.lane.b32.xlu0 %v392_v9, %s1627_s19  ;;  %413 = vrot.lane.b32.xlu1 %v412_v12, %s1628_s26  ;;  %v1418_v9 = vld [vmem:[%s2711_s0 + $0x20] sm:$0x1]   ;;  %v548_v12 = vsel %vm9_vm1, %v1400_v5, %v544_v4  ;;  %v632_v29 = vsel %vm13_vm2, %v1417_v22, %v628_v21  ;;  %v764_v1 = vsel %vm5_vm0, %v1443_v59, %v1442_v56  ;;  %v1444_v2 = vld [vmem:[%s2711_s0 + $0x58] sm:$0x4]   ;;  %vm35_vm4 = vcmask 1048560   ;;  %s1651_s11 = smov 42  }
  0x37   :  { %v644_v16 = vsel %vm5_vm0, %v1419_v10, %v1418_v9  ;;  %v552_v20 = vsel %vm13_vm2, %v1401_v13, %v548_v12  ;;  %v1434_v3 = vld [vmem:[%s2711_s0 + $0x1c] sm:$0x1]   ;;  %v1441_v7 = vld [vmem:[%s2711_s0 + $0xd8] sm:$0x8]   ;;  %v1445_v9 = vld [vmem:[%s2711_s0 + $0xd7] sm:$0x8]  }
  0x38   :  { %v648_v23 = vsel %vm9_vm1, %v1420_v17, %v644_v16  ;;  %v1435_v4 = vld [vmem:[%s2711_s0 + $0x9b] sm:$0x2]   ;;  %v1450_v12 = vld [vmem:[%s2711_s0 + $0x18] sm:$0x1]   ;;  %v1454_v15 = vld [vmem:[%s2711_s0 + $0x17] sm:$0x1]  }
  0x39   :  { %v652_v32 = vsel %vm13_vm2, %v1421_v24, %v648_v23  ;;  %v724_v10 = vsel %vm5_vm0, %v1435_v4, %v1434_v3  ;;  %v1451_v13 = vld [vmem:[%s2711_s0 + $0x97] sm:$0x2]   ;;  %v1455_v16 = vld [vmem:[%s2711_s0 + $0x96] sm:$0x2]   ;;  %v1437_v19 = vld [vmem:[%s2711_s0 + $0xd9] sm:$0x8]  }
  0x3a   :  { %v1452_v21 = vld [vmem:[%s2711_s0 + $0x56] sm:$0x4]   ;;  %v824_v22 = vsel %vm5_vm0, %v1455_v16, %v1454_v15  ;;  %v1456_v23 = vld [vmem:[%s2711_s0 + $0x55] sm:$0x4]   ;;  %v1446_v24 = vld [vmem:[%s2711_s0 + $0x19] sm:$0x1]  }
  0x3b   :  { %v1453_v28 = vld [vmem:[%s2711_s0 + $0xd5] sm:$0x8]   ;;  %v1466_v36 = vld [vmem:[%s2711_s0 + $0x14] sm:$0x1]   ;;  %v1458_v46 = vld [vmem:[%s2711_s0 + $0x16] sm:$0x1]  }
  0x3c   :  { %v1459_v47 = vld [vmem:[%s2711_s0 + $0x95] sm:$0x2]   ;;  %v1475_v56 = vld [vmem:[%s2711_s0 + $0x91] sm:$0x2]   ;;  %v1479_v59 = vld [vmem:[%s2711_s0 + $0x90] sm:$0x2]  }
  0x3d   :  { %433 = vrot.lane.b32.xlu2 %v432_v42, %s1632_s6  ;;  %v2_v42 = vld [vmem:[%s2711_s0] sm:$0x1]   ;;  %s1644_s6 = smov 62   ;;  %v1480_v3 = vld [vmem:[%s2711_s0 + $0x4f] sm:$0x4]   ;;  %s1652_s18 = smov 40  }
  0x3e   :  { %453 = vrot.lane.b32.xlu0 %v452_v30, %s1630_s17  ;;  %473 = vrot.lane.b32.xlu1 %v472_v33, %s1631_s24  ;;  %v1430_v30 = vld [vmem:[%s2711_s0 + $0x1d] sm:$0x1]   ;;  %v608_v33 = vsel %vm9_vm1, %v1412_v26, %v604_v25  ;;  %v6_v48 = vsel %vm5_vm0, %v1291_v45, %v2_v42  ;;  %s1642_s17 = smov 60   ;;  %s1643_s24 = smov 58   ;;  %v1447_v25 = vld [vmem:[%s2711_s0 + $0x98] sm:$0x2]  }
  0x3f   :  { %v704_v39 = vsel %vm5_vm0, %v1431_v31, %v1430_v30  ;;  %v612_v43 = vsel %vm13_vm2, %v1413_v34, %v608_v33  ;;  %v10_v53 = vsel %vm9_vm1, %v1292_v41, %v6_v48  ;;  %v1457_v30 = vld [vmem:[%s2711_s0 + $0xd4] sm:$0x8]   ;;  %v784_v31 = vsel %vm5_vm0, %v1447_v25, %v1446_v24  ;;  %v1462_v33 = vld [vmem:[%s2711_s0 + $0x15] sm:$0x1]   ;;  %v1449_v41 = vld [vmem:[%s2711_s0 + $0xd6] sm:$0x8]  }
  0x40   :  { %v708_v49 = vsel %vm9_vm1, %v1432_v37, %v704_v39  ;;  %v14_v57 = vsel %vm13_vm2, %v1293_v44, %v10_v53  ;;  %v1463_v34 = vld [vmem:[%s2711_s0 + $0x94] sm:$0x2]   ;;  %v1467_v37 = vld [vmem:[%s2711_s0 + $0x93] sm:$0x2]   ;;  %v844_v53 = vsel %vm5_vm0, %v1459_v47, %v1458_v46  ;;  %v1470_v4 = vld [vmem:[%s2711_s0 + $0x13] sm:$0x1]  }
  0x41   :  { %16 = vst.msk [vmem:[#allocation0] ss:$8 sm:$0x3] %vm15_vm3, %v14_v57   ;;  %v712_v60 = vsel %vm13_vm2, %v1433_v50, %v708_v49  ;;  %v864_v42 = vsel %vm5_vm0, %v1463_v34, %v1462_v33  ;;  %v884_v44 = vsel %vm5_vm0, %v1467_v37, %v1466_v36  ;;  %v1468_v45 = vld [vmem:[%s2711_s0 + $0x52] sm:$0x4]   ;;  %s1653_s29 = smov 44  }
  0x42   :  { %18 = vst.msk [vmem:[#allocation0 - $0xf] ss:$8 sm:$0xc] %vm15_vm3, %v14_v57   ;;  %v1465_v50 = vld [vmem:[%s2711_s0 + $0xd2] sm:$0x8]   ;;  %vm55_vm5 = vcmask 1032160  }
  0x43   :  { %v1486_v15 = vld [vmem:[%s2711_s0 + $0xf] sm:$0x1]   ;;  %s1654_s9 = smov 36   ;;  %s1655_s16 = smov 34   ;;  %vm75_vm6 = vcmask 1015760   ;;  %vm95_vm7 = vcmask 999360  }
  0x44   :  { %v1487_v16 = vld [vmem:[%s2711_s0 + $0x8e] sm:$0x2]   ;;  %v1493_v36 = vld [vmem:[%s2711_s0 + $0xcb] sm:$0x8]   ;;  %s1656_s27 = smov 38   ;;  %vm115_vm8 = vcmask 982960  }
  0x45   :  { %493 = vrot.lane.b32.xlu2 %v492_v63, %s1635_s4  ;;  %s1647_s4 = smov 56   ;;  %v984_v24 = vsel %vm5_vm0, %v1487_v16, %v1486_v15  ;;  %v1488_v25 = vld [vmem:[%s2711_s0 + $0x4d] sm:$0x4]   ;;  %vm135_vm9 = vcmask 966560   ;;  %s1658_s14 = smov 28   ;;  %vm155_vm10 = vcmask 950160  }
  0x46   :  { %513 = vrot.lane.b32.xlu0 %v512_v51, %s1633_s15  ;;  %533 = vrot.lane.b32.xlu1 %v532_v54, %s1634_s22  ;;  %s1639_s15 = smov 66   ;;  %s1640_s22 = smov 64   ;;  %v664_v51 = vsel %vm5_vm0, %v1423_v40, %v1422_v38  ;;  %v1438_v54 = vld [vmem:[%s2711_s0 + $0x1b] sm:$0x1]   ;;  %v1489_v33 = vld [vmem:[%s2711_s0 + $0xcc] sm:$0x8]  }
  0x47   :  { %v668_v61 = vsel %vm9_vm1, %v1424_v52, %v664_v51  ;;  %v744_v63 = vsel %vm5_vm0, %v1439_v55, %v1438_v54  ;;  %v888_v51 = vsel %vm9_vm1, %v1468_v45, %v884_v44  ;;  %v1469_v52 = vld [vmem:[%s2711_s0 + $0xd1] sm:$0x8]   ;;  %v1460_v54 = vld [vmem:[%s2711_s0 + $0x54] sm:$0x4]   ;;  %v1474_v55 = vld [vmem:[%s2711_s0 + $0x12] sm:$0x1]  }
  0x48   :  { %v672_v5 = vsel %vm13_vm2, %v1425_v62, %v668_v61  ;;  %v748_v6 = vsel %vm9_vm1, %v1440_v0, %v744_v63  ;;  %v848_v62 = vsel %vm9_vm1, %v1460_v54, %v844_v53  ;;  %v1461_v63 = vld [vmem:[%s2711_s0 + $0xd3] sm:$0x8]   ;;  %v924_v0 = vsel %vm5_vm0, %v1475_v56, %v1474_v55  ;;  %v1503_v44 = vld [vmem:[%s2711_s0 + $0x8a] sm:$0x2]   ;;  %v1494_v53 = vld [vmem:[%s2711_s0 + $0xd] sm:$0x1]  }
  0x49   :  { %v752_v14 = vsel %vm13_vm2, %v1441_v7, %v748_v6  ;;  %v852_v6 = vsel %vm13_vm2, %v1461_v63, %v848_v62  ;;  %v1495_v54 = vld [vmem:[%s2711_s0 + $0x8c] sm:$0x2]   ;;  %vm175_vm11 = vcmask 933760   ;;  %s1659_s25 = smov 32   ;;  %vm195_vm12 = vcmask 917360   ;;  %s1660_s7 = smov 24  }
  0x4a   :  { %v1024_v62 = vsel %vm5_vm0, %v1495_v54, %v1494_v53  ;;  %v1496_v63 = vld [vmem:[%s2711_s0 + $0x4b] sm:$0x4]   ;;  %vm215_vm13 = vcmask 900960   ;;  %s1661_s12 = smov 22   ;;  %vm235_vm14 = vcmask 884560   ;;  %vm255_vm15 = vcmask 868160  }
  0x4b   :  { %s1662_s23 = smov 26   ;;  %vm275_vm3 = vcmask 851760   ;;  %s1663_s5 = smov 18  }
  0x4c   :  { %s1665_s21 = smov 20   ;;  %s1666_s3 = smov 12  }
  0x4d   :  { %553 = vrot.lane.b32.xlu2 %v552_v20, %s1638_s2  ;;  %v804_v20 = vsel %vm5_vm0, %v1451_v13, %v1450_v12  ;;  %s1650_s2 = smov 50   ;;  %v1481_v12 = vld [vmem:[%s2711_s0 + $0xce] sm:$0x8]   ;;  %s1667_s8 = smov 10  }
  0x4e   :  { %573 = vrot.lane.b32.xlu0 %v572_v8, %s1636_s13  ;;  %593 = vrot.lane.b32.xlu1 %v592_v11, %s1637_s20  ;;  %v768_v8 = vsel %vm9_vm1, %v1444_v2, %v764_v1  ;;  %v1436_v11 = vld [vmem:[%s2711_s0 + $0x5a] sm:$0x4]   ;;  %v808_v27 = vsel %vm9_vm1, %v1452_v21, %v804_v20  ;;  %s1648_s13 = smov 48   ;;  %s1649_s20 = smov 46   ;;  %v1476_v1 = vld [vmem:[%s2711_s0 + $0x50] sm:$0x4]  }
  0x4f   :  { %v772_v17 = vsel %vm13_vm2, %v1445_v9, %v768_v8  ;;  %v728_v18 = vsel %vm9_vm1, %v1436_v11, %v724_v10  ;;  %v812_v35 = vsel %vm13_vm2, %v1453_v28, %v808_v27  ;;  %v928_v8 = vsel %vm9_vm1, %v1476_v1, %v924_v0  ;;  %v1477_v9 = vld [vmem:[%s2711_s0 + $0xcf] sm:$0x8]   ;;  %v1492_v27 = vld [vmem:[%s2711_s0 + $0x4c] sm:$0x4]   ;;  %v1482_v28 = vld [vmem:[%s2711_s0 + $0x10] sm:$0x1]  }
  0x50   :  { %v732_v26 = vsel %vm13_vm2, %v1437_v19, %v728_v18  ;;  %v1490_v18 = vld [vmem:[%s2711_s0 + $0xe] sm:$0x1]   ;;  %v1511_v0 = vld [vmem:[%s2711_s0 + $0x88] sm:$0x2]   ;;  %s1671_s26 = smov 8  }
  0x51   :  { %v1491_v19 = vld [vmem:[%s2711_s0 + $0x8d] sm:$0x2]  }
  0x55   :  { %613 = vrot.lane.b32.xlu2 %v612_v43, %s1641_s10  ;;  %v1464_v43 = vld [vmem:[%s2711_s0 + $0x53] sm:$0x4]   ;;  %s1664_s10 = smov 16  }
  0x56   :  { %633 = vrot.lane.b32.xlu0 %v632_v29, %s1639_s15  ;;  %653 = vrot.lane.b32.xlu1 %v652_v32, %s1640_s22  ;;  %s1645_s15 = smov 54   ;;  %s1646_s22 = smov 52   ;;  %v828_v29 = vsel %vm9_vm1, %v1456_v23, %v824_v22  ;;  %v1448_v32 = vld [vmem:[%s2711_s0 + $0x57] sm:$0x4]   ;;  %v868_v49 = vsel %vm9_vm1, %v1464_v43, %v864_v42  ;;  %v1473_v23 = vld [vmem:[%s2711_s0 + $0xd0] sm:$0x8]  }
  0x57   :  { %v832_v38 = vsel %vm13_vm2, %v1457_v30, %v828_v29  ;;  %v788_v40 = vsel %vm9_vm1, %v1448_v32, %v784_v31  ;;  %v872_v57 = vsel %vm13_vm2, %v1465_v50, %v868_v49  ;;  %v1483_v29 = vld [vmem:[%s2711_s0 + $0x8f] sm:$0x2]   ;;  %v988_v32 = vsel %vm9_vm1, %v1488_v25, %v984_v24  ;;  %v1502_v43 = vld [vmem:[%s2711_s0 + $0xb] sm:$0x1]   ;;  %v1500_v50 = vld [vmem:[%s2711_s0 + $0x4a] sm:$0x4]  }
  0x58   :  { %v792_v48 = vsel %vm13_vm2, %v1449_v41, %v788_v40  ;;  %v964_v37 = vsel %vm5_vm0, %v1483_v29, %v1482_v28  ;;  %v1498_v40 = vld [vmem:[%s2711_s0 + $0xc] sm:$0x1]   ;;  %v992_v42 = vsel %vm13_vm2, %v1489_v33, %v988_v32  ;;  %v1523_v24 = vld [vmem:[%s2711_s0 + $0x85] sm:$0x2]  }
  0x59   :  { %v1499_v41 = vld [vmem:[%s2711_s0 + $0x8b] sm:$0x2]   ;;  %v1524_v33 = vld [vmem:[%s2711_s0 + $0x44] sm:$0x4]  }
  0x5a   :  { %v1044_v49 = vsel %vm5_vm0, %v1499_v41, %v1498_v40 }
  0x5b   :  { %v1048_v56 = vsel %vm9_vm1, %v1500_v50, %v1044_v49  ;;  %v1535_v49 = vld [vmem:[%s2711_s0 + $0x82] sm:$0x2]  }
  0x5d   :  { %673 = vrot.lane.b32.xlu2 %v672_v5, %s1644_s6  ;;  %v1471_v5 = vld [vmem:[%s2711_s0 + $0x92] sm:$0x2]  }
  0x5e   :  { %693 = vrot.lane.b32.xlu0 %v692_v58, %s1642_s17  ;;  %713 = vrot.lane.b32.xlu1 %v712_v60, %s1643_s24  ;;  %v1478_v58 = vld [vmem:[%s2711_s0 + $0x11] sm:$0x1]   ;;  %v892_v60 = vsel %vm13_vm2, %v1469_v52, %v888_v51  ;;  %v904_v13 = vsel %vm5_vm0, %v1471_v5, %v1470_v4  ;;  %v1504_v51 = vld [vmem:[%s2711_s0 + $0x49] sm:$0x4]   ;;  %v1064_v52 = vsel %vm5_vm0, %v1503_v44, %v1502_v43 }
  0x5f   :  { %v944_v2 = vsel %vm5_vm0, %v1479_v59, %v1478_v58  ;;  %v1068_v59 = vsel %vm9_vm1, %v1504_v51, %v1064_v52  ;;  %v1538_v51 = vld [vmem:[%s2711_s0 + $0x2] sm:$0x1]  }
  0x60   :  { %v948_v11 = vsel %vm9_vm1, %v1480_v3, %v944_v2  ;;  %v1514_v2 = vld [vmem:[%s2711_s0 + $0x8] sm:$0x1]   ;;  %v1539_v52 = vld [vmem:[%s2711_s0 + $0x81] sm:$0x2]  }
  0x61   :  { %v952_v20 = vsel %vm13_vm2, %v1481_v12, %v948_v11  ;;  %v1515_v3 = vld [vmem:[%s2711_s0 + $0x87] sm:$0x2]   ;;  %v1506_v12 = vld [vmem:[%s2711_s0 + $0xa] sm:$0x1]  }
  0x62   :  { %v1124_v11 = vsel %vm5_vm0, %v1515_v3, %v1514_v2 }
  0x65   :  { %733 = vrot.lane.b32.xlu2 %v732_v26, %s1647_s4  ;;  %v1004_v26 = vsel %vm5_vm0, %v1491_v19, %v1490_v18 }
  0x66   :  { %753 = vrot.lane.b32.xlu0 %v752_v14, %s1645_s15  ;;  %773 = vrot.lane.b32.xlu1 %v772_v17, %s1646_s22  ;;  %v1472_v14 = vld [vmem:[%s2711_s0 + $0x51] sm:$0x4]   ;;  %v932_v17 = vsel %vm13_vm2, %v1477_v9, %v928_v8  ;;  %v1512_v9 = vld [vmem:[%s2711_s0 + $0x47] sm:$0x4]   ;;  %s1668_s15 = smov 14  }
  0x67   :  { %v2322_v39 = vpop.permute.xlu2 %113   ;;  %v908_v22 = vsel %vm9_vm1, %v1472_v14, %v904_v13  ;;  %v1507_v13 = vld [vmem:[%s2711_s0 + $0x89] sm:$0x2]  }
  0x68   :  { %v912_v30 = vsel %vm13_vm2, %v1473_v23, %v908_v22  ;;  %v1508_v22 = vld [vmem:[%s2711_s0 + $0x48] sm:$0x4]   ;;  %v1522_v23 = vld [vmem:[%s2711_s0 + $0x6] sm:$0x1]  }
  0x69   :  { %v1164_v32 = vsel %vm5_vm0, %v1523_v24, %v1522_v23 }
  0x6a   :  { %v1168_v41 = vsel %vm9_vm1, %v1524_v33, %v1164_v32 }
  0x6d   :  { %793 = vrot.lane.b32.xlu2 %v792_v48, %s1650_s2  ;;  %v1485_v48 = vld [vmem:[%s2711_s0 + $0xcd] sm:$0x8]  }
  0x6e   :  { %813 = vrot.lane.b32.xlu0 %v812_v35, %s1648_s13  ;;  %833 = vrot.lane.b32.xlu1 %v832_v38, %s1649_s20  ;;  %v1008_v35 = vsel %vm9_vm1, %v1492_v27, %v1004_v26  ;;  %v1484_v38 = vld [vmem:[%s2711_s0 + $0x4e] sm:$0x4]   ;;  %v1526_v26 = vld [vmem:[%s2711_s0 + $0x5] sm:$0x1]  }
  0x6f   :  { %v2369_v61 = vpop.permute.xlu2 %133   ;;  %v1012_v45 = vsel %vm13_vm2, %v1493_v36, %v1008_v35  ;;  %v968_v47 = vsel %vm9_vm1, %v1484_v38, %v964_v37  ;;  %v1527_v27 = vld [vmem:[%s2711_s0 + $0x84] sm:$0x2]   ;;  %v1518_v36 = vld [vmem:[%s2711_s0 + $0x7] sm:$0x1]  }
  0x70   :  { %v972_v55 = vsel %vm13_vm2, %v1485_v48, %v968_v47  ;;  %v1184_v35 = vsel %vm5_vm0, %v1527_v27, %v1526_v26  ;;  %v1519_v37 = vld [vmem:[%s2711_s0 + $0x86] sm:$0x2]   ;;  %v1534_v48 = vld [vmem:[%s2711_s0 + $0x3] sm:$0x1]  }
  0x71   :  { %v1520_v47 = vld [vmem:[%s2711_s0 + $0x45] sm:$0x4]  }
  0x75   :  { %853 = vrot.lane.b32.xlu2 %v852_v6, %s1653_s29  ;;  %v1028_v6 = vsel %vm9_vm1, %v1496_v63, %v1024_v62  ;;  %v1531_v62 = vld [vmem:[%s2711_s0 + $0x83] sm:$0x2]  }
  0x76   :  { %873 = vrot.lane.b32.xlu0 %v872_v57, %s1651_s11  ;;  %893 = vrot.lane.b32.xlu1 %v892_v60, %s1652_s18  ;;  %v1501_v57 = vld [vmem:[%s2711_s0 + $0xc9] sm:$0x8]   ;;  %v1505_v60 = vld [vmem:[%s2711_s0 + $0xc8] sm:$0x8]   ;;  %s1669_s18 = smov 6  }
  0x77   :  { %v2418_v21 = vpop.permute.xlu2 %193   ;;  %v1052_v1 = vsel %vm13_vm2, %v1501_v57, %v1048_v56  ;;  %v1072_v4 = vsel %vm13_vm2, %v1505_v60, %v1068_v59  ;;  %v1224_v56 = vsel %vm5_vm0, %v1535_v49, %v1534_v48  ;;  %v1536_v57 = vld [vmem:[%s2711_s0 + $0x41] sm:$0x4]   ;;  %v1244_v59 = vsel %vm5_vm0, %v1539_v52, %v1538_v51  ;;  %v1530_v60 = vld [vmem:[%s2711_s0 + $0x4] sm:$0x1]  }
  0x78   :  { %v34_v7 = vpop.permute.xlu0 %33   ;;  %v74_v10 = vpop.permute.xlu1 %73  }
  0x79   :  { %36 = vst.msk [vmem:[#allocation0] sm:$0x3] %vm35_vm4, %v34_v7  }
  0x7a   :  { %38 = vst.msk [vmem:[#allocation0 + $0x6] sm:$0xc] %vm35_vm4, %v34_v7   ;;  %v1497_v7 = vld [vmem:[%s2711_s0 + $0xca] sm:$0x8]   ;;  %vm295_vm4 = vcmask 835360  }
  0x7b   :  { %v1032_v14 = vsel %vm13_vm2, %v1497_v7, %v1028_v6  ;;  %v1532_v6 = vld [vmem:[%s2711_s0 + $0x42] sm:$0x4]  }
  0x7d   :  { %913 = vrot.lane.b32.xlu2 %v912_v30, %s1656_s27 }
  0x7e   :  { %933 = vrot.lane.b32.xlu0 %v932_v17, %s1654_s9  ;;  %953 = vrot.lane.b32.xlu1 %v952_v20, %s1655_s16  ;;  %s1657_s9 = smov 30   ;;  %v1513_v17 = vld [vmem:[%s2711_s0 + $0xc6] sm:$0x8]   ;;  %v1517_v20 = vld [vmem:[%s2711_s0 + $0xc5] sm:$0x8]  }
  0x7f   :  { %v2469_v46 = vpop.permute.xlu2 %253  }
  0x80   :  { %v54_v31 = vpop.permute.xlu0 %53   ;;  %v94_v34 = vpop.permute.xlu1 %93  }
  0x81   :  { %56 = vst.msk [vmem:[#allocation0] sm:$0x3] %vm55_vm5, %v54_v31  }
  0x82   :  { %58 = vst.msk [vmem:[#allocation0 + $0x6] sm:$0xc] %vm55_vm5, %v54_v31   ;;  %v1509_v31 = vld [vmem:[%s2711_s0 + $0xc7] sm:$0x8]   ;;  %vm315_vm5 = vcmask 818960  }
  0x83   :  { %76 = vst.msk [vmem:[#allocation0] sm:$0x3] %vm75_vm6, %v74_v10  }
  0x84   :  { %78 = vst.msk [vmem:[#allocation0 + $0x6] sm:$0xc] %vm75_vm6, %v74_v10   ;;  %v1516_v10 = vld [vmem:[%s2711_s0 + $0x46] sm:$0x4]   ;;  %vm335_vm6 = vcmask 802560  }
  0x85   :  { %96 = vst.msk [vmem:[#allocation0] sm:$0x3] %vm95_vm7, %v94_v34   ;;  %973 = vrot.lane.b32.xlu2 %v972_v55, %s1659_s25  ;;  %v1128_v19 = vsel %vm9_vm1, %v1516_v10, %v1124_v11  ;;  %v1533_v11 = vld [vmem:[%s2711_s0 + $0xc1] sm:$0x8]  }
  0x86   :  { %98 = vst.msk [vmem:[#allocation0 + $0x6] sm:$0xc] %vm95_vm7, %v94_v34   ;;  %993 = vrot.lane.b32.xlu0 %v992_v42, %s1657_s9  ;;  %1013 = vrot.lane.b32.xlu1 %v1012_v45, %s1658_s14  ;;  %v1132_v28 = vsel %vm13_vm2, %v1517_v20, %v1128_v19  ;;  %v1528_v34 = vld [vmem:[%s2711_s0 + $0x43] sm:$0x4]   ;;  %v1525_v42 = vld [vmem:[%s2711_s0 + $0xc3] sm:$0x8]  }
  0x87   :  { %116 = vst.msk [vmem:[#allocation0] sm:$0x3] %vm115_vm8, %v2322_v39   ;;  %v2528_v5 = vpop.permute.xlu2 %313   ;;  %v1188_v44 = vsel %vm9_vm1, %v1528_v34, %v1184_v35  ;;  %v1529_v45 = vld [vmem:[%s2711_s0 + $0xc2] sm:$0x8]   ;;  %v1172_v50 = vsel %vm13_vm2, %v1525_v42, %v1168_v41  ;;  %vm355_vm7 = vcmask 786160  }
  0x88   :  { %118 = vst.msk [vmem:[#allocation0 + $0x6] sm:$0xc] %vm115_vm8, %v2322_v39   ;;  %v154_v39 = vpop.permute.xlu0 %153   ;;  %v174_v58 = vpop.permute.xlu1 %173   ;;  %v1192_v53 = vsel %vm13_vm2, %v1529_v45, %v1188_v44  ;;  %vm375_vm8 = vcmask 769760  }
  0x89   :  { %136 = vst.msk [vmem:[#allocation0] sm:$0x3] %vm135_vm9, %v2369_v61  }
  0x8a   :  { %138 = vst.msk [vmem:[#allocation0 + $0x6] sm:$0xc] %vm135_vm9, %v2369_v61   ;;  %v1510_v61 = vld [vmem:[%s2711_s0 + $0x9] sm:$0x1]   ;;  %vm395_vm9 = vcmask 753360  }
  0x8b   :  { %156 = vst.msk [vmem:[#allocation0] sm:$0x3] %vm155_vm10, %v154_v39   ;;  %v1104_v8 = vsel %vm5_vm0, %v1511_v0, %v1510_v61  ;;  %v1228_v0 = vsel %vm9_vm1, %v1536_v57, %v1224_v56 }
  0x8c   :  { %158 = vst.msk [vmem:[#allocation0 + $0x6] sm:$0xc] %vm155_vm10, %v154_v39   ;;  %v1108_v16 = vsel %vm9_vm1, %v1512_v9, %v1104_v8  ;;  %v1521_v39 = vld [vmem:[%s2711_s0 + $0xc4] sm:$0x8]   ;;  %vm415_vm10 = vcmask 736960  }
  0x8d   :  { %176 = vst.msk [vmem:[#allocation0] sm:$0x3] %vm175_vm11, %v174_v58   ;;  %1033 = vrot.lane.b32.xlu2 %v1032_v14, %s1662_s23  ;;  %v1112_v25 = vsel %vm13_vm2, %v1513_v17, %v1108_v16  ;;  %s1670_s23 = smov 4  }
  0x8e   :  { %178 = vst.msk [vmem:[#allocation0 + $0x6] sm:$0xc] %vm175_vm11, %v174_v58   ;;  %1053 = vrot.lane.b32.xlu0 %v1052_v1, %s1660_s7  ;;  %1073 = vrot.lane.b32.xlu1 %v1072_v4, %s1661_s12  ;;  %v1540_v58 = vld [vmem:[%s2711_s0 + $0x40] sm:$0x4]   ;;  %v1537_v1 = vld [vmem:[%s2711_s0 + $0xc0] sm:$0x8]  }
  0x8f   :  { %196 = vst.msk [vmem:[#allocation0] sm:$0x3] %vm195_vm12, %v2418_v21   ;;  %v2585_v29 = vpop.permute.xlu2 %373   ;;  %v1248_v3 = vsel %vm9_vm1, %v1540_v58, %v1244_v59  ;;  %v1541_v4 = vld [vmem:[%s2711_s0 + $0xbf] sm:$0x8]   ;;  %v1232_v7 = vsel %vm13_vm2, %v1537_v1, %v1228_v0  ;;  %vm495_vm11 = vcmask 671360  }
  0x90   :  { %198 = vst.msk [vmem:[#allocation0 + $0x6] sm:$0xc] %vm195_vm12, %v2418_v21   ;;  %v214_v15 = vpop.permute.xlu0 %213   ;;  %v234_v18 = vpop.permute.xlu1 %233   ;;  %v1084_v21 = vsel %vm5_vm0, %v1507_v13, %v1506_v12  ;;  %v1252_v8 = vsel %vm13_vm2, %v1541_v4, %v1248_v3  ;;  %v1542_v12 = vld [vmem:[%s2711_s0 + $0x1] sm:$0x1]   ;;  %vm515_vm12 = vcmask 654960  }
  0x91   :  { %216 = vst.msk [vmem:[#allocation0] sm:$0x3] %vm215_vm13, %v214_v15   ;;  %v1088_v30 = vsel %vm9_vm1, %v1508_v22, %v1084_v21  ;;  %v1543_v13 = vld [vmem:[%s2711_s0 + $0x80] sm:$0x2]  }
  0x92   :  { %218 = vst.msk [vmem:[#allocation0 + $0x6] sm:$0xc] %vm215_vm13, %v214_v15   ;;  %v1092_v38 = vsel %vm13_vm2, %v1509_v31, %v1088_v30  ;;  %v1264_v17 = vsel %vm5_vm0, %v1543_v13, %v1542_v12  ;;  %v1545_v21 = vld [vmem:[%s2711_s0 + $0xbe] sm:$0x8]   ;;  %vm535_vm13 = vcmask 638560  }
  0x93   :  { %236 = vst.msk [vmem:[#allocation0] sm:$0x3] %vm235_vm14, %v234_v18  }
  0x94   :  { %238 = vst.msk [vmem:[#allocation0 + $0x6] sm:$0xc] %vm235_vm14, %v234_v18   ;;  %v1544_v18 = vld [vmem:[%s2711_s0 + $0x3f] sm:$0x4]   ;;  %s1672_s0 = smov 2   ;;  %vm555_vm14 = vcmask 622160  }
  0x95   :  { %256 = vst.msk [vmem:[#allocation0] sm:$0x3] %vm255_vm15, %v2469_v46   ;;  %1093 = vrot.lane.b32.xlu2 %v1092_v38, %s1665_s21  ;;  %v1268_v20 = vsel %vm9_vm1, %v1544_v18, %v1264_v17 }
  0x96   :  { %258 = vst.msk [vmem:[#allocation0 + $0x6] sm:$0xc] %vm255_vm15, %v2469_v46   ;;  %1113 = vrot.lane.b32.xlu0 %v1112_v25, %s1663_s5  ;;  %1133 = vrot.lane.b32.xlu1 %v1132_v28, %s1664_s10  ;;  %v1144_v46 = vsel %vm5_vm0, %v1519_v37, %v1518_v36  ;;  %v1272_v22 = vsel %vm13_vm2, %v1545_v21, %v1268_v20  ;;  %vm575_vm15 = vcmask 605760  }
  0x97   :  { %v2640_v54 = vpop.permute.xlu2 %433   ;;  %v1148_v55 = vsel %vm9_vm1, %v1520_v47, %v1144_v46 }
  0x98   :  { %v274_v40 = vpop.permute.xlu0 %273   ;;  %v294_v43 = vpop.permute.xlu1 %293   ;;  %v1152_v63 = vsel %vm13_vm2, %v1521_v39, %v1148_v55 }
  0x99   :  { %276 = vst.msk [vmem:[#allocation0] sm:$0x3] %vm275_vm3, %v274_v40  }
  0x9a   :  { %278 = vst.msk [vmem:[#allocation0 + $0x6] sm:$0xc] %vm275_vm3, %v274_v40   ;;  %vm595_vm3 = vcmask 589360  }
  0x9b   :  { %296 = vst.msk [vmem:[#allocation0] sm:$0x3] %vm295_vm4, %v294_v43  }
  0x9c   :  { %298 = vst.msk [vmem:[#allocation0 + $0x6] sm:$0xc] %vm295_vm4, %v294_v43   ;;  %vm615_vm4 = vcmask 572960  }
  0x9d   :  { %316 = vst.msk [vmem:[#allocation0] sm:$0x3] %vm315_vm5, %v2528_v5   ;;  %1153 = vrot.lane.b32.xlu2 %v1152_v63, %s1668_s15 }
  0x9e   :  { %318 = vst.msk [vmem:[#allocation0 + $0x6] sm:$0xc] %vm315_vm5, %v2528_v5   ;;  %1173 = vrot.lane.b32.xlu0 %v1172_v50, %s1666_s3  ;;  %1193 = vrot.lane.b32.xlu1 %v1192_v53, %s1667_s8  ;;  %v1204_v5 = vsel %vm5_vm0, %v1531_v62, %v1530_v60  ;;  %vm435_vm0 = vcmask 720560   ;;  %vm635_vm5 = vcmask 556560  }
  0x9f   :  { %v494_v9 = vpop.permute.xlu2 %493   ;;  %v1208_v10 = vsel %vm9_vm1, %v1532_v6, %v1204_v5  ;;  %vm455_vm1 = vcmask 704160  }
  0xa0   :  { %v334_v61 = vpop.permute.xlu0 %333   ;;  %v354_v2 = vpop.permute.xlu1 %353   ;;  %v1212_v14 = vsel %vm13_vm2, %v1533_v11, %v1208_v10  ;;  %vm475_vm2 = vcmask 687760  }
  0xa1   :  { %336 = vst.msk [vmem:[#allocation0] sm:$0x3] %vm335_vm6, %v334_v61  }
  0xa2   :  { %338 = vst.msk [vmem:[#allocation0 + $0x6] sm:$0xc] %vm335_vm6, %v334_v61   ;;  %vm655_vm6 = vcmask 540160  }
  0xa3   :  { %356 = vst.msk [vmem:[#allocation0] sm:$0x3] %vm355_vm7, %v354_v2  }
  0xa4   :  { %358 = vst.msk [vmem:[#allocation0 + $0x6] sm:$0xc] %vm355_vm7, %v354_v2   ;;  %vm675_vm7 = vcmask 523760  }
  0xa5   :  { %376 = vst.msk [vmem:[#allocation0] sm:$0x3] %vm375_vm8, %v2585_v29   ;;  %1213 = vrot.lane.b32.xlu2 %v1212_v14, %s1671_s26 }
  0xa6   :  { %378 = vst.msk [vmem:[#allocation0 + $0x6] sm:$0xc] %vm375_vm8, %v2585_v29   ;;  %1233 = vrot.lane.b32.xlu0 %v1232_v7, %s1669_s18  ;;  %1253 = vrot.lane.b32.xlu1 %v1252_v8, %s1670_s23  ;;  %vm695_vm8 = vcmask 507360  }
  0xa7   :  { %v554_v19 = vpop.permute.xlu2 %553  }
  0xa8   :  { %v394_v15 = vpop.permute.xlu0 %393   ;;  %v414_v16 = vpop.permute.xlu1 %413  }
  0xa9   :  { %396 = vst.msk [vmem:[#allocation0] sm:$0x3] %vm395_vm9, %v394_v15  }
  0xaa   :  { %398 = vst.msk [vmem:[#allocation0 + $0x6] sm:$0xc] %vm395_vm9, %v394_v15   ;;  %vm715_vm9 = vcmask 490960  }
  0xab   :  { %416 = vst.msk [vmem:[#allocation0] sm:$0x3] %vm415_vm10, %v414_v16  }
  0xac   :  { %418 = vst.msk [vmem:[#allocation0 + $0x6] sm:$0xc] %vm415_vm10, %v414_v16   ;;  %vm735_vm10 = vcmask 474560  }
  0xad   :  { %436 = vst.msk [vmem:[#allocation0] sm:$0x3] %vm435_vm0, %v2640_v54   ;;  %1273 = vrot.lane.b32.xlu2 %v1272_v22, %s1672_s0 }
  0xae   :  { %438 = vst.msk [vmem:[#allocation0 + $0x6] sm:$0xc] %vm435_vm0, %v2640_v54   ;;  %vm755_vm0 = vcmask 458160  }
  0xaf   :  { %v614_v25 = vpop.permute.xlu2 %613  }
  0xb0   :  { %v454_v23 = vpop.permute.xlu0 %453   ;;  %v474_v24 = vpop.permute.xlu1 %473  }
  0xb1   :  { %456 = vst.msk [vmem:[#allocation0] sm:$0x3] %vm455_vm1, %v454_v23  }
  0xb2   :  { %458 = vst.msk [vmem:[#allocation0 + $0x6] sm:$0xc] %vm455_vm1, %v454_v23   ;;  %vm775_vm1 = vcmask 441760  }
  0xb3   :  { %476 = vst.msk [vmem:[#allocation0] sm:$0x3] %vm475_vm2, %v474_v24  }
  0xb4   :  { %478 = vst.msk [vmem:[#allocation0 + $0x6] sm:$0xc] %vm475_vm2, %v474_v24   ;;  %vm795_vm2 = vcmask 425360  }
  0xb5   :  { %496 = vst.msk [vmem:[#allocation0] sm:$0x3] %vm495_vm11, %v494_v9  }
  0xb6   :  { %498 = vst.msk [vmem:[#allocation0 + $0x6] sm:$0xc] %vm495_vm11, %v494_v9   ;;  %vm815_vm11 = vcmask 408960  }
  0xb7   :  { %v674_v28 = vpop.permute.xlu2 %673  }
  0xb8   :  { %v514_v26 = vpop.permute.xlu0 %513   ;;  %v534_v27 = vpop.permute.xlu1 %533  }
  0xb9   :  { %516 = vst.msk [vmem:[#allocation0] sm:$0x3] %vm515_vm12, %v514_v26  }
  0xba   :  { %518 = vst.msk [vmem:[#allocation0 + $0x6] sm:$0xc] %vm515_vm12, %v514_v26   ;;  %vm835_vm12 = vcmask 392560  }
  0xbb   :  { %536 = vst.msk [vmem:[#allocation0] sm:$0x3] %vm535_vm13, %v534_v27  }
  0xbc   :  { %538 = vst.msk [vmem:[#allocation0 + $0x6] sm:$0xc] %vm535_vm13, %v534_v27   ;;  %vm855_vm13 = vcmask 376160  }
  0xbd   :  { %556 = vst.msk [vmem:[#allocation0] sm:$0x3] %vm555_vm14, %v554_v19  }
  0xbe   :  { %558 = vst.msk [vmem:[#allocation0 + $0x6] sm:$0xc] %vm555_vm14, %v554_v19   ;;  %vm875_vm14 = vcmask 359760  }
  0xbf   :  { %v734_v31 = vpop.permute.xlu2 %733  }
  0xc0   :  { %v574_v29 = vpop.permute.xlu0 %573   ;;  %v594_v30 = vpop.permute.xlu1 %593  }
  0xc1   :  { %576 = vst.msk [vmem:[#allocation0] sm:$0x3] %vm575_vm15, %v574_v29  }
  0xc2   :  { %578 = vst.msk [vmem:[#allocation0 + $0x6] sm:$0xc] %vm575_vm15, %v574_v29   ;;  %vm895_vm15 = vcmask 343360  }
  0xc3   :  { %596 = vst.msk [vmem:[#allocation0] sm:$0x3] %vm595_vm3, %v594_v30  }
  0xc4   :  { %598 = vst.msk [vmem:[#allocation0 + $0x6] sm:$0xc] %vm595_vm3, %v594_v30   ;;  %vm915_vm3 = vcmask 326960  }
  0xc5   :  { %616 = vst.msk [vmem:[#allocation0] sm:$0x3] %vm615_vm4, %v614_v25  }
  0xc6   :  { %618 = vst.msk [vmem:[#allocation0 + $0x6] sm:$0xc] %vm615_vm4, %v614_v25   ;;  %vm935_vm4 = vcmask 310560  }
  0xc7   :  { %v794_v34 = vpop.permute.xlu2 %793  }
  0xc8   :  { %v634_v32 = vpop.permute.xlu0 %633   ;;  %v654_v33 = vpop.permute.xlu1 %653  }
  0xc9   :  { %636 = vst.msk [vmem:[#allocation0] sm:$0x3] %vm635_vm5, %v634_v32  }
  0xca   :  { %638 = vst.msk [vmem:[#allocation0 + $0x6] sm:$0xc] %vm635_vm5, %v634_v32   ;;  %vm955_vm5 = vcmask 294160  }
  0xcb   :  { %656 = vst.msk [vmem:[#allocation0] sm:$0x3] %vm655_vm6, %v654_v33  }
  0xcc   :  { %658 = vst.msk [vmem:[#allocation0 + $0x6] sm:$0xc] %vm655_vm6, %v654_v33   ;;  %vm975_vm6 = vcmask 277760  }
  0xcd   :  { %676 = vst.msk [vmem:[#allocation0] sm:$0x3] %vm675_vm7, %v674_v28  }
  0xce   :  { %678 = vst.msk [vmem:[#allocation0 + $0x6] sm:$0xc] %vm675_vm7, %v674_v28   ;;  %vm995_vm7 = vcmask 261360  }
  0xcf   :  { %v854_v37 = vpop.permute.xlu2 %853  }
  0xd0   :  { %v694_v35 = vpop.permute.xlu0 %693   ;;  %v714_v36 = vpop.permute.xlu1 %713  }
  0xd1   :  { %696 = vst.msk [vmem:[#allocation0] sm:$0x3] %vm695_vm8, %v694_v35  }
  0xd2   :  { %698 = vst.msk [vmem:[#allocation0 + $0x6] sm:$0xc] %vm695_vm8, %v694_v35   ;;  %vm1015_vm8 = vcmask 244960  }
  0xd3   :  { %716 = vst.msk [vmem:[#allocation0] sm:$0x3] %vm715_vm9, %v714_v36  }
  0xd4   :  { %718 = vst.msk [vmem:[#allocation0 + $0x6] sm:$0xc] %vm715_vm9, %v714_v36   ;;  %vm1035_vm9 = vcmask 228560  }
  0xd5   :  { %736 = vst.msk [vmem:[#allocation0] sm:$0x3] %vm735_vm10, %v734_v31  }
  0xd6   :  { %738 = vst.msk [vmem:[#allocation0 + $0x6] sm:$0xc] %vm735_vm10, %v734_v31   ;;  %vm1055_vm10 = vcmask 212160  }
  0xd7   :  { %v914_v41 = vpop.permute.xlu2 %913  }
  0xd8   :  { %v754_v38 = vpop.permute.xlu0 %753   ;;  %v774_v40 = vpop.permute.xlu1 %773  }
  0xd9   :  { %756 = vst.msk [vmem:[#allocation0] sm:$0x3] %vm755_vm0, %v754_v38  }
  0xda   :  { %758 = vst.msk [vmem:[#allocation0 + $0x6] sm:$0xc] %vm755_vm0, %v754_v38   ;;  %vm1075_vm0 = vcmask 195760  }
  0xdb   :  { %776 = vst.msk [vmem:[#allocation0] sm:$0x3] %vm775_vm1, %v774_v40  }
  0xdc   :  { %778 = vst.msk [vmem:[#allocation0 + $0x6] sm:$0xc] %vm775_vm1, %v774_v40   ;;  %vm1095_vm1 = vcmask 179360  }
  0xdd   :  { %796 = vst.msk [vmem:[#allocation0] sm:$0x3] %vm795_vm2, %v794_v34  }
  0xde   :  { %798 = vst.msk [vmem:[#allocation0 + $0x6] sm:$0xc] %vm795_vm2, %v794_v34   ;;  %vm1115_vm2 = vcmask 162960  }
  0xdf   :  { %v974_v44 = vpop.permute.xlu2 %973  }
  0xe0   :  { %v814_v42 = vpop.permute.xlu0 %813   ;;  %v834_v43 = vpop.permute.xlu1 %833  }
  0xe1   :  { %816 = vst.msk [vmem:[#allocation0] sm:$0x3] %vm815_vm11, %v814_v42  }
  0xe2   :  { %818 = vst.msk [vmem:[#allocation0 + $0x6] sm:$0xc] %vm815_vm11, %v814_v42   ;;  %vm1135_vm11 = vcmask 146560  }
  0xe3   :  { %836 = vst.msk [vmem:[#allocation0] sm:$0x3] %vm835_vm12, %v834_v43  }
  0xe4   :  { %838 = vst.msk [vmem:[#allocation0 + $0x6] sm:$0xc] %vm835_vm12, %v834_v43   ;;  %vm1155_vm12 = vcmask 130160  }
  0xe5   :  { %856 = vst.msk [vmem:[#allocation0] sm:$0x3] %vm855_vm13, %v854_v37  }
  0xe6   :  { %858 = vst.msk [vmem:[#allocation0 + $0x6] sm:$0xc] %vm855_vm13, %v854_v37   ;;  %vm1175_vm13 = vcmask 113760  }
  0xe7   :  { %v1034_v47 = vpop.permute.xlu2 %1033  }
  0xe8   :  { %v874_v45 = vpop.permute.xlu0 %873   ;;  %v894_v46 = vpop.permute.xlu1 %893  }
  0xe9   :  { %876 = vst.msk [vmem:[#allocation0] sm:$0x3] %vm875_vm14, %v874_v45  }
  0xea   :  { %878 = vst.msk [vmem:[#allocation0 + $0x6] sm:$0xc] %vm875_vm14, %v874_v45   ;;  %vm1195_vm14 = vcmask 97360  }
  0xeb   :  { %896 = vst.msk [vmem:[#allocation0] sm:$0x3] %vm895_vm15, %v894_v46  }
  0xec   :  { %898 = vst.msk [vmem:[#allocation0 + $0x6] sm:$0xc] %vm895_vm15, %v894_v46   ;;  %vm1215_vm15 = vcmask 80960  }
  0xed   :  { %916 = vst.msk [vmem:[#allocation0] sm:$0x3] %vm915_vm3, %v914_v41  }
  0xee   :  { %918 = vst.msk [vmem:[#allocation0 + $0x6] sm:$0xc] %vm915_vm3, %v914_v41   ;;  %vm1235_vm3 = vcmask 64560  }
  0xef   :  { %v1094_v50 = vpop.permute.xlu2 %1093  }
  0xf0   :  { %v934_v48 = vpop.permute.xlu0 %933   ;;  %v954_v49 = vpop.permute.xlu1 %953  }
  0xf1   :  { %936 = vst.msk [vmem:[#allocation0] sm:$0x3] %vm935_vm4, %v934_v48  }
  0xf2   :  { %938 = vst.msk [vmem:[#allocation0 + $0x6] sm:$0xc] %vm935_vm4, %v934_v48   ;;  %vm1255_vm4 = vcmask 48160  }
  0xf3   :  { %956 = vst.msk [vmem:[#allocation0] sm:$0x3] %vm955_vm5, %v954_v49  }
  0xf4   :  { %958 = vst.msk [vmem:[#allocation0 + $0x6] sm:$0xc] %vm955_vm5, %v954_v49   ;;  %vm1275_vm5 = vcmask 31760  }
  0xf5   :  { %976 = vst.msk [vmem:[#allocation0] sm:$0x3] %vm975_vm6, %v974_v44  }
  0xf6   :  { %978 = vst.msk [vmem:[#allocation0 + $0x6] sm:$0xc] %vm975_vm6, %v974_v44  }
  0xf7   :  { %v1154_v53 = vpop.permute.xlu2 %1153  }
  0xf8   :  { %v994_v51 = vpop.permute.xlu0 %993   ;;  %v1014_v52 = vpop.permute.xlu1 %1013  }
  0xf9   :  { %996 = vst.msk [vmem:[#allocation0] sm:$0x3] %vm995_vm7, %v994_v51  }
  0xfa   :  { %998 = vst.msk [vmem:[#allocation0 + $0x6] sm:$0xc] %vm995_vm7, %v994_v51  }
  0xfb   :  { %1016 = vst.msk [vmem:[#allocation0] sm:$0x3] %vm1015_vm8, %v1014_v52  }
  0xfc   :  { %1018 = vst.msk [vmem:[#allocation0 + $0x6] sm:$0xc] %vm1015_vm8, %v1014_v52  }
  0xfd   :  { %1036 = vst.msk [vmem:[#allocation0] sm:$0x3] %vm1035_vm9, %v1034_v47  }
  0xfe   :  { %1038 = vst.msk [vmem:[#allocation0 + $0x6] sm:$0xc] %vm1035_vm9, %v1034_v47  }
  0xff   :  { %v1214_v39 = vpop.permute.xlu2 %1213  }
 0x100   :  { %v1054_v54 = vpop.permute.xlu0 %1053   ;;  %v1074_v55 = vpop.permute.xlu1 %1073  }
 0x101   :  { %1056 = vst.msk [vmem:[#allocation0] sm:$0x3] %vm1055_vm10, %v1054_v54  }
 0x102   :  { %1058 = vst.msk [vmem:[#allocation0 + $0x6] sm:$0xc] %vm1055_vm10, %v1054_v54  }
 0x103   :  { %1076 = vst.msk [vmem:[#allocation0] sm:$0x3] %vm1075_vm0, %v1074_v55  }
 0x104   :  { %1078 = vst.msk [vmem:[#allocation0 + $0x6] sm:$0xc] %vm1075_vm0, %v1074_v55  }
 0x105   :  { %1096 = vst.msk [vmem:[#allocation0] sm:$0x3] %vm1095_vm1, %v1094_v50  }
 0x106   :  { %1098 = vst.msk [vmem:[#allocation0 + $0x6] sm:$0xc] %vm1095_vm1, %v1094_v50  }
 0x107   :  { %v1274_v58 = vpop.permute.xlu2 %1273  }
 0x108   :  { %v1114_v56 = vpop.permute.xlu0 %1113   ;;  %v1134_v57 = vpop.permute.xlu1 %1133  }
 0x109   :  { %1116 = vst.msk [vmem:[#allocation0] sm:$0x3] %vm1115_vm2, %v1114_v56  }
 0x10a   :  { %1118 = vst.msk [vmem:[#allocation0 + $0x6] sm:$0xc] %vm1115_vm2, %v1114_v56  }
 0x10b   :  { %1136 = vst.msk [vmem:[#allocation0] sm:$0x3] %vm1135_vm11, %v1134_v57  }
 0x10c   :  { %1138 = vst.msk [vmem:[#allocation0 + $0x6] sm:$0xc] %vm1135_vm11, %v1134_v57  }
 0x10d   :  { %1156 = vst.msk [vmem:[#allocation0] sm:$0x3] %vm1155_vm12, %v1154_v53  }
 0x10e   :  { %1158 = vst.msk [vmem:[#allocation0 + $0x6] sm:$0xc] %vm1155_vm12, %v1154_v53  }
 0x110   :  { %v1174_v59 = vpop.permute.xlu0 %1173   ;;  %v1194_v60 = vpop.permute.xlu1 %1193  }
 0x111   :  { %1176 = vst.msk [vmem:[#allocation0] sm:$0x3] %vm1175_vm13, %v1174_v59  }
 0x112   :  { %1178 = vst.msk [vmem:[#allocation0 + $0x6] sm:$0xc] %vm1175_vm13, %v1174_v59  }
 0x113   :  { %1196 = vst.msk [vmem:[#allocation0] sm:$0x3] %vm1195_vm14, %v1194_v60  }
 0x114   :  { %1198 = vst.msk [vmem:[#allocation0 + $0x6] sm:$0xc] %vm1195_vm14, %v1194_v60  }
 0x115   :  { %1216 = vst.msk [vmem:[#allocation0] sm:$0x3] %vm1215_vm15, %v1214_v39  }
 0x116   :  { %1218 = vst.msk [vmem:[#allocation0 + $0x6] sm:$0xc] %vm1215_vm15, %v1214_v39  }
 0x118   :  { %v1234_v62 = vpop.permute.xlu0 %1233   ;;  %v1254_v63 = vpop.permute.xlu1 %1253  }
 0x119   :  { %1236 = vst.msk [vmem:[#allocation0] sm:$0x3] %vm1235_vm3, %v1234_v62  }
 0x11a   :  { %1238 = vst.msk [vmem:[#allocation0 + $0x6] sm:$0xc] %vm1235_vm3, %v1234_v62  }
 0x11b   :  { %1256 = vst.msk [vmem:[#allocation0] sm:$0x3] %vm1255_vm4, %v1254_v63  }
 0x11c   :  { %1258 = vst.msk [vmem:[#allocation0 + $0x6] sm:$0xc] %vm1255_vm4, %v1254_v63  }
 0x11d   :  { %1276 = vst.msk [vmem:[#allocation0] sm:$0x3] %vm1275_vm5, %v1274_v58  }
 0x11e   :  { %1278 = vst.msk [vmem:[#allocation0 + $0x6] sm:$0xc] %vm1275_vm5, %v1274_v58  }
 0x124   :  { %v1281_v61 = vld [vmem:[#allocation0] sm:$0x3] }
 0x125   :  { %1284 = vst [vmem:[%s2712_s1] sm:$0x3] %v1281_v61  ;;  %v1286_v0 = vld [vmem:[#allocation0 + $0x8] sm:$0x3] }
 0x126   :  { %1546 = vst [vmem:[%s2712_s1 + $0x2] sm:$0x3] %v1286_v0 }

// kernel: flow_forward.1
= control target key start
LH: loop header
LB: loop body
LE: loop exit
PB: predicated region body
PF: predicated region fallthrough
CT: control target
= control target key end

     0   :  { %s2594_s25 = smov 0   ;;  %s2596_s26 = smov 0   ;;  %s2919_s0 = inlined_call_operand.vmem [shape: f32[2,16,128], index: 0, kind: input, shape index: {}]   ;;  %s2920_s1 = inlined_call_operand.vmem [shape: f32[2,1,128], index: 1, kind: input, shape index: {}]   ;;  %s2921_s2 = inlined_call_operand.vmem [shape: f32[2,2,128,1], index: 2, kind: input, shape index: {}]   ;;  %s2922_s3 = inlined_call_operand.vmem [shape: f32[2,16,16], index: 3, kind: input, shape index: {}]   ;;  %s2923_s4 = inlined_call_operand.vmem [shape: f32[2,16,1], index: 4, kind: input, shape index: {}]   ;;  %s2924_s5 = inlined_call_operand.vmem [shape: bf16[2,32,8], index: 5, kind: input, shape index: {}]   ;;  %s2925_s6 = inlined_call_operand.vmem [shape: f32[2,32,1], index: 6, kind: input, shape index: {}]   ;;  %s2926_s7 = inlined_call_operand.vmem [shape: bf16[2,2,64,96], index: 7, kind: input, shape index: {}]   ;;  %s2927_s8 = inlined_call_operand.vmem [shape: bf16[2,2,64,32], index: 8, kind: input, shape index: {}]   ;;  %s2928_s9 = inlined_call_operand.vmem [shape: f32[2,2,64,1], index: 9, kind: input, shape index: {}]   ;;  %s2929_s10 = inlined_call_operand.vmem [shape: bf16[2,16,32], index: 10, kind: input, shape index: {}]   ;;  %s2930_s11 = inlined_call_operand.vmem [shape: f32[2,16,1], index: 11, kind: input, shape index: {}]   ;;  %s2931_s12 = inlined_call_operand.vmem [shape: f32[2,16,128], index: 12, kind: output, shape index: {0}]   ;;  %s2932_s13 = inlined_call_operand.vmem [shape: f32[2,1,1], index: 13, kind: output, shape index: {1}]  }
   0x1   :  { %2939 = sst [smem:[#allocation13_spill]] %s2919_s0  ;;  %s2598_s27 = smov 0  }
   0x2   :  { %2940 = sst [smem:[#allocation14_spill]] %s2920_s1  ;;  %s2600_s28 = smov 0  }
   0x3   :  { %2941 = sst [smem:[#allocation15_spill]] %s2921_s2  ;;  %s2602_s29 = smov 0  }
   0x4   :  { %2942 = sst [smem:[#allocation16_spill]] %s2922_s3 }
   0x5   :  { %2943 = sst [smem:[#allocation17_spill]] %s2923_s4 }
   0x6   :  { %2944 = sst [smem:[#allocation18_spill]] %s2924_s5 }
   0x7   :  { %2945 = sst [smem:[#allocation19_spill]] %s2925_s6 }
   0x8   :  { %2946 = sst [smem:[#allocation20_spill]] %s2926_s7 }
   0x9   :  { %2947 = sst [smem:[#allocation21_spill]] %s2932_s13 }
   0xa LB: > { %2948 = sst [smem:[#allocation5_spill]] %s2498_s25  ;;  %s33_s30 = sadd.s32 1, %s2506_s27  ;;  %s2514_s29 = sphi %s2602_s29, %s24_s29   ;;  %s2510_s28 = sphi %s2600_s28, %s2976_s28   ;;  %s2506_s27 = sphi %s2598_s27, %s2975_s27   ;;  %s2502_s26 = sphi %s2596_s26, %s2974_s26   ;;  %s2498_s25 = sphi %s2594_s25, %s2973_s25  }
   0xb   : > { %2949 = sst [smem:[#allocation6_spill]] %s2506_s27  ;;  %s36_s14 = sadd.s32 1, %s2510_s28 }
   0xc   : > { %2950 = sst [smem:[#allocation7_spill]] %s2510_s28  ;;  %p34_p0 = scmp.ge.s32.totalorder %s33_s30, 2 }
   0xd   : > { %2951 = sst [smem:[#allocation8_spill]] %s2514_s29  ;;  %p2132_p1 = scmp.ge.s32.totalorder %s2514_s29, 1 }
   0xe   : > { %p516_p2 = scmp.lt.s32.totalorder %s2514_s29, 5  ;;  %s2978_s30 = smov (%p34_p0, %s33_s30), 0 }
   0xf   : > { %2952 = sst [smem:[#allocation9_spill]] %s2978_s30  ;;  %s2980_s14 = smov (!%p34_p0, %s36_s14), %s2510_s28 }
  0x10   : > { %p517_p3 = pnand %p2132_p1, %p516_p2  ;;  %p38_p4 = scmp.ge.s32.totalorder %s2980_s14, 2 }
  0x12   : > { %s2982_s14 = smov (%p38_p4, %s2980_s14), 0  ;;  %520 = sbr.rel (%p517_p3) target bundleno = 2018 (0x7e2), region = 68 }
  0x13   : > { %2953 = sst [smem:[#allocation10_spill]] %s2982_s14 }
  0x17   : > { %p620_p5 = scmp.lt.s32.totalorder %s2502_s26, 1  ;;  %p630_p6 = scmp.lt.s32.totalorder %s2498_s25, 1 }
  0x18   : > { %s2954_s1 = sld [smem:[#allocation14_spill]] }
  0x19   : > { %s2984_s26 = smov (!%p620_p5, %s2502_s26), 1  ;;  %s2956_s0 = sld [smem:[#allocation13_spill]] }
  0x1a   : > { %s631_s15 = scalar_select %p630_p6, %s2498_s25, 1 }
  0x1b   : > { %s2320_s16 = sshll.u32 %s2984_s26, 4  ;;  %s2136_s24 = sshll.u32 %s2984_s26, 5 }
  0x1c   : > { %s2135_s23 = sshll.u32 %s631_s15, 4  ;;  %s2957_s3 = sld [smem:[#allocation16_spill]] }
  0x1d   : > { %s634_s27 = sadd.s32 %s2136_s24, %s2135_s23  ;;  %s2958_s4 = sld [smem:[#allocation17_spill]] }
  0x1e   : > { %s2631_s19 = scalar_lea.vmem %s2954_s1, %s2984_s26  ;;  %s2137_s17 = sshll.u32 %s634_s27, 3 }
  0x1f   : > { %2955 = sst [smem:[#allocation11_spill]] %s2631_s19  ;;  %s624_s22 = scalar_lea.vmem %s2956_s0, %s2320_s16 }
  0x20   : > { %s2959_s5 = sld [smem:[#allocation18_spill]]  ;;  %s2324_s30 = sshll.u32 %s631_s15, 5 }
  0x21   : > { %s2960_s2 = sld [smem:[#allocation15_spill]]  ;;  %s2325_s25 = sshll.u32 %s631_s15, 6 }
  0x22   : > { %s2639_s28 = scalar_lea.vmem %s2957_s3, %s2135_s23  ;;  %s2962_s6 = sld [smem:[#allocation19_spill]] }
  0x23   : > { %s2644_s13 = scalar_lea.vmem %s2958_s4, %s2135_s23  ;;  %s2963_s7 = sld [smem:[#allocation20_spill]] }
  0x24   : > { %s2327_s20 = sshll.u32 %s631_s15, 7  ;;  %s2689_s18 = scalar_lea.vmem %s2931_s12, %s2320_s16 }
  0x25   : > { %s2965_s21 = sld [smem:[#allocation5_spill]] }
  0x26   : > { %s2649_s19 = scalar_lea.vmem %s2959_s5, %s2135_s23  ;;  %s2669_s5 = scalar_lea.vmem %s2927_s8, %s2325_s25 }
  0x27   : > { %s2654_s0 = scalar_lea.vmem %s2960_s2, %s2137_s17  ;;  %s2328_s17 = sshll.u32 %s631_s15, 3 }
  0x28   : > { %2961 = sst [smem:[#allocation12_spill]] %s2654_s0  ;;  %s2659_s24 = scalar_lea.vmem %s2962_s6, %s2324_s30 }
  0x29   : > { %s2664_s27 = scalar_lea.vmem %s2963_s7, %s2325_s25  ;;  %s2674_s0 = scalar_lea.vmem %s2928_s9, %s2327_s20 }
  0x2a   : > { %s2679_s14 = scalar_lea.vmem %s2929_s10, %s2328_s17  ;;  %s2684_s6 = scalar_lea.vmem %s2930_s11, %s2135_s23 }
  0x2b   : > { %s2964_s2 = sld [smem:[#allocation21_spill]]  ;;  %p2158_p7 = scmp.ne.s32.totalorder %s2965_s21, 0 }
  0x2d   : > { %694 = sbr.rel (%p2158_p7) target bundleno = 54 (0x36), region = 72 }
  0x31   : > { %s2694_s20 = scalar_lea.vmem %s2964_s2, %s2984_s26 }
  0x32   : > { %v695_v0 = vld [vmem:[%s624_s22] sm:$0xff]  ;;  %v696_v1 = vld [vmem:[%s624_s22 + $0x8] sm:$0xff]  ;;  %vm699_vm0 = vcmask 0   ;;  %v2516_v2 = vmov 0.0  }
  0x33   : > { %697 = vst [vmem:[%s2689_s18] sm:$0xff] %v695_v0 }
  0x34   : > { %698 = vst [vmem:[%s2689_s18 + $0x8] sm:$0xff] %v696_v1 }
  0x35   : > { %700 = vst.msk [vmem:[%s2694_s20] sm:$0x1] %vm699_vm0, %v2516_v2 }
  0x36 PF: > { %v707_v5 = vld [vmem:[%s2639_s28] sm:$0xff]  ;;  %vm721_vm1 = vcmask 130048   ;;  %v2517_v6 = vmov 0   ;;  %s2966_s7 = sld [smem:[#allocation11_spill]]  ;;  %v770_v8 = vld [vmem:[%s2659_s24 + $0x10] sm:$0xff]  ;;  %v771_v9 = vld [vmem:[%s2659_s24 + $0x18] sm:$0xff] }
  0x37   : > { %2421 = vset.pattern.permute.xlu0 %v2517_v6  ;;  %v709_v7 = vld [vmem:[%s2644_s13] sm:$0xff]  ;;  %2422 = vset.pattern.permute.xlu1 %v2517_v6  ;;  %v769_v11 = vld [vmem:[%s2659_s24 + $0x8] sm:$0xff]  ;;  %vm809_vm2 = vcmask 1043456   ;;  %vm802_vm3 = vcmask 64512   ;;  %vm753_vm4 = vcmask 15360   ;;  %vm758_vm5 = vcmask 31760  }
  0x38   : > { %713 = vperm.xlu0 %2421, %v709_v7   ;;  %2423 = vset.pattern.permute.xlu2 %v2517_v6  ;;  %v768_v10 = vld [vmem:[%s2659_s24] sm:$0xff]  ;;  %v2332_v20 = vld [vmem:[%s2649_s19 + $0x8] sm:$0xff]  ;;  %v2518_v23 = vmov 0.0   ;;  %s2519_s26 = smov 2   ;;  %vm852_vm6 = vcmask 1047568   ;;  %s2520_s16 = smov 125  }
  0x39   : > { %789 = vperm.xlu1 %2422, %v771_v9   ;;  %779 = vperm.xlu2 %2423, %v769_v11   ;;  %v2331_v19 = vld [vmem:[%s2649_s19] sm:$0xff]  ;;  %756 = vst.msk [vmem:[#allocation2 + $0x20] sm:$0xff] %vm753_vm4, %v2518_v23  ;;  %s2967_s19 = sld [smem:[#allocation12_spill]]  ;;  %s2521_s22 = smov 126   ;;  %v1247_v60 = vld [vmem:[%s2674_s0 + $0x18] sm:$0xff]  ;;  %v1246_v61 = vld [vmem:[%s2674_s0 + $0x10] sm:$0xff] }
  0x3a   : > { %v705_v4 = vld [vmem:[%s2689_s18] sm:$0xff]  ;;  %761 = vst.msk [vmem:[#allocation2 + $0x28] sm:$0xff] %vm758_vm5, %v2518_v23  ;;  %s2522_s23 = smov 127   ;;  %v1245_v63 = vld [vmem:[%s2674_s0 + $0x8] sm:$0xff]  ;;  %vm971_vm7 = vcmask 1022976   ;;  %vm930_vm8 = vcmask 1031168  }
  0x3b   : > { %v706_v3 = vld [vmem:[%s2689_s18 + $0x8] sm:$0xff]  ;;  %754 = vst.msk [vmem:[#allocation2] sm:$0xff] %vm753_vm4, %v2518_v23  ;;  %v1244_v1 = vld [vmem:[%s2674_s0] sm:$0xff]  ;;  %vm889_vm9 = vcmask 1039360   ;;  %vm1108_vm10 = vcmask 785408  }
  0x3c   : > { %742 = vmatpush.msra.mxu3 %v706_v3  ;;  %v2710_v12 = vld [vmem:[%s2966_s7] ss:$0 sm:$0xff]  ;;  %755 = vst.msk [vmem:[#allocation2 + $0x10] sm:$0xff] %vm753_vm4, %v2518_v23 }
  0x3d   : > { %757 = vst.msk [vmem:[#allocation2 + $0x30] sm:$0xff] %vm753_vm4, %v2518_v23 }
  0x3e   : > { %743 = vmatpush.msra.mxu3 %v705_v4  ;;  %759 = vst.msk [vmem:[#allocation2 + $0x8] sm:$0xff] %vm758_vm5, %v2518_v23 }
  0x3f   : > { %2159 = vmatmul.msk.f32.vlgmr.msra.gmra.mxu3 %vm721_vm1, %v707_v5  ;;  %760 = vst.msk [vmem:[#allocation2 + $0x18] sm:$0xff] %vm758_vm5, %v2518_v23  ;;  %v1010_v54 = vld [vmem:[%s2967_s19 + $0x30] sm:$0xff]  ;;  %v1009_v55 = vld [vmem:[%s2967_s19 + $0x28] sm:$0xff]  ;;  %v1008_v56 = vld [vmem:[%s2967_s19 + $0x20] sm:$0xff] }
  0x40   : > { %784 = vperm.xlu0 %2421, %v770_v8   ;;  %762 = vst.msk [vmem:[#allocation2 + $0x38] sm:$0xff] %vm758_vm5, %v2518_v23  ;;  %v1004_v57 = vld [vmem:[%s2967_s19] sm:$0xff]  ;;  %v1007_v58 = vld [vmem:[%s2967_s19 + $0x18] sm:$0xff]  ;;  %v1006_v62 = vld [vmem:[%s2967_s19 + $0x10] sm:$0xff] }
  0x41   : > { %774 = vperm.xlu1 %2422, %v768_v10   ;;  %v1011_v59 = vld [vmem:[%s2967_s19 + $0x38] sm:$0xff]  ;;  %v1005_v0 = vld [vmem:[%s2967_s19 + $0x8] sm:$0xff] }
  0x93   : > { %v780_v32 = vpop.permute.xlu2 %779 }
  0xaa   : > { %v714_v13 = vpop.permute.xlu0 %713 }
  0xab   : > { %v790_v21 = vpop.permute.xlu1 %789 }
  0xb2   : > { %v785_v28 = vpop.permute.xlu0 %784 }
  0xb3   : > { %v775_v22 = vpop.permute.xlu1 %774 }
  0xc2   : > { %v745_v14 = vpop.f32.mrf.mxu3 }
  0xc3   : > { %v746_v15 = vadd.f32 %v745_v14, %v714_v13 }
  0xc5   : > { %v751_v16 = vmul.f32 %v2710_v12, %v746_v15 }
  0xc7   : > { %1882 = vst [vmem:[%s2689_s18] sm:$0xff] %v751_v16  ;;  %v767_v17 = vpack.c.bf16 %v751_v16, %v751_v16 }
  0xc9   : > { %v811_v18 = vsel %vm809_vm2, %v767_v17, 0 }
  0xca   : > { %820 = vmatpush.bf16.msra.mxu1 %v811_v18 }
  0xcd   : > { %2169 = vmatmul.msk.bf16.vlgmr.msra.gmra.mxu1 %vm802_vm3, %v2331_v19 }
  0xdd   : > { %2170 = vmatmul.msk.bf16.gmra.mxu1 %vm802_vm3, %v2332_v20 }
 0x14a   : > { %v822_v24 = vpop.f32.mrf.mxu1 }
 0x14b   : > { %v823_v25 = vadd.f32 %v822_v24, %v775_v22 }
 0x14d   : > { %v832_v26 = vmul.f32 %v2710_v12, %v823_v25 }
 0x14f   : > { %840 = vrot.lane.b32.xlu1 %v832_v26, %s2519_s26 }
 0x152   : > { %v824_v27 = vpop.f32.mrf.mxu1 }
 0x153   : > { %v825_v33 = vadd.f32 %v824_v27, %v780_v32 }
 0x155   : > { %v833_v36 = vmul.f32 %v2710_v12, %v825_v33 }
 0x15a   : > { %v827_v29 = vpop.f32.mrf.mxu1 }
 0x15b   : > { %v828_v30 = vadd.f32 %v827_v29, %v785_v28 }
 0x15d   : > { %v834_v31 = vmul.f32 %v2710_v12, %v828_v30 }
 0x15f   : > { %844 = vrot.lane.b32.xlu2 %v834_v31, %s2519_s26 }
 0x162   : > { %v829_v34 = vpop.f32.mrf.mxu1 }
 0x163   : > { %v830_v35 = vadd.f32 %v829_v34, %v790_v21 }
 0x165   : > { %v835_v37 = vmul.f32 %v2710_v12, %v830_v35 }
 0x167   : > { %846 = vrot.lane.b32.xlu0 %v835_v37, %s2519_s26  ;;  %842 = vrot.lane.b32.xlu2 %v833_v36, %s2519_s26 }
 0x1b9   : > { %v845_v38 = vpop.permute.xlu2 %844 }
 0x1ba   : > { %857 = vst.msk [vmem:[#allocation2 + $0x20] sm:$0xff] %vm852_vm6, %v845_v38 }
 0x1bb   : > { %858 = vst.msk [vmem:[#allocation2 + $0x28] sm:$0xff] %vm753_vm4, %v845_v38 }
 0x1c1   : > { %v843_v39 = vpop.permute.xlu2 %842  ;;  %v841_v40 = vpop.permute.xlu1 %840  ;;  %v2746_v47 = vld [vmem:[#allocation2 + $0x20] sm:$0xff] }
 0x1c2   : > { %855 = vst.msk [vmem:[#allocation2 + $0x10] sm:$0xff] %vm852_vm6, %v843_v39  ;;  %v2748_v48 = vld [vmem:[#allocation2 + $0x28] sm:$0xff] }
 0x1c3   : > { %856 = vst.msk [vmem:[#allocation2 + $0x18] sm:$0xff] %vm753_vm4, %v843_v39  ;;  %v953_v49 = vpack.c.bf16 %v2748_v48, %v2746_v47 }
 0x1c4   : > { %853 = vst.msk [vmem:[#allocation2] sm:$0xff] %vm852_vm6, %v841_v40 }
 0x1c5   : > { %854 = vst.msk [vmem:[#allocation2 + $0x8] sm:$0xff] %vm753_vm4, %v841_v40 }
 0x1c9   : > { %v2734_v41 = vld [vmem:[#allocation2 + $0x10] sm:$0xff] }
 0x1ca   : > { %v2736_v42 = vld [vmem:[#allocation2 + $0x18] sm:$0xff] }
 0x1cb   : > { %v952_v43 = vpack.c.bf16 %v2736_v42, %v2734_v41  ;;  %v2740_v44 = vld [vmem:[#allocation2] sm:$0xff] }
 0x1cc   : > { %v2742_v45 = vld [vmem:[#allocation2 + $0x8] sm:$0xff] }
 0x1cd   : > { %961 = vrot.lane.b32.xlu0 %v952_v43, %s2520_s16  ;;  %v951_v46 = vpack.c.bf16 %v2742_v45, %v2740_v44 }
 0x1cf   : > { %959 = vrot.lane.b32.xlu2 %v951_v46, %s2520_s16 }
 0x1d5   : > { %963 = vrot.lane.b32.xlu0 %v953_v49, %s2520_s16 }
 0x1d9   : > { %v847_v50 = vpop.permute.xlu0 %846 }
 0x1da   : > { %859 = vst.msk [vmem:[#allocation2 + $0x30] sm:$0xff] %vm852_vm6, %v847_v50 }
 0x1db   : > { %860 = vst.msk [vmem:[#allocation2 + $0x38] sm:$0xff] %vm753_vm4, %v847_v50  ;;  %v2333_v50 = vld [vmem:[%s2664_s27] sm:$0xff] }
 0x1dd   : > { %918 = vrot.lane.b32.xlu0 %v951_v46, %s2521_s22 }
 0x1e1   : > { %v2755_v51 = vld [vmem:[#allocation2 + $0x30] sm:$0xff] }
 0x1e2   : > { %v2757_v52 = vld [vmem:[#allocation2 + $0x38] sm:$0xff] }
 0x1e3   : > { %v954_v53 = vpack.c.bf16 %v2757_v52, %v2755_v51 }
 0x1e5   : > { %965 = vrot.lane.b32.xlu1 %v954_v53, %s2520_s16  ;;  %924 = vrot.lane.b32.xlu2 %v954_v53, %s2521_s22 }
 0x1e6   : > { %883 = vrot.lane.b32.xlu0 %v954_v53, %s2522_s23  ;;  %v2334_v53 = vld [vmem:[%s2664_s27 + $0x8] sm:$0xff] }
 0x1ed   : > { %922 = vrot.lane.b32.xlu1 %v953_v49, %s2521_s22  ;;  %881 = vrot.lane.b32.xlu2 %v953_v49, %s2522_s23 }
 0x1ee   : > { %1044 = vperm.xlu0 %2421, %v1010_v54   ;;  %v2335_v54 = vld [vmem:[%s2664_s27 + $0x10] sm:$0xff] }
 0x1f5   : > { %920 = vrot.lane.b32.xlu1 %v952_v43, %s2521_s22  ;;  %879 = vrot.lane.b32.xlu2 %v952_v43, %s2522_s23 }
 0x1f6   : > { %1039 = vperm.xlu0 %2421, %v1009_v55   ;;  %v2336_v55 = vld [vmem:[%s2664_s27 + $0x18] sm:$0xff] }
 0x1fd   : > { %1034 = vperm.xlu2 %2423, %v1008_v56   ;;  %877 = vrot.lane.b32.xlu1 %v951_v46, %s2522_s23 }
 0x1fe   : > { %1014 = vperm.xlu0 %2421, %v1004_v57  }
 0x205   : > { %1029 = vperm.xlu2 %2423, %v1007_v58   ;;  %1049 = vperm.xlu1 %2422, %v1011_v59  }
 0x206   : > { %1269 = vperm.xlu0 %2421, %v1247_v60  }
 0x20d   : > { %1264 = vperm.xlu2 %2423, %v1246_v61   ;;  %1024 = vperm.xlu1 %2422, %v1006_v62  }
 0x215   : > { %1259 = vperm.xlu2 %2423, %v1245_v63   ;;  %1019 = vperm.xlu1 %2422, %v1005_v0  }
 0x21d   : > { %1254 = vperm.xlu1 %2422, %v1244_v1   ;;  %1386 = vrot.lane.b32.xlu2 %v2710_v12, %s2519_s26  ;;  %v708_v1 = vld [vmem:[%s2639_s28 + $0x8] sm:$0xff]  ;;  %s2523_s28 = smov 124  }
 0x21e   : > { %2160 = vmatmul.msk.f32.gmra.mxu3 %vm721_vm1, %v708_v1 }
 0x229   : > { %v960_v2 = vpop.permute.xlu2 %959 }
 0x22a   : > { %v967_v3 = vrot.slane %v960_v2, 4 }
 0x22c   : > { %v972_v4 = vsel %vm971_vm7, %v960_v2, %v967_v3 }
 0x22d   : > { %980 = vst [vmem:[#allocation3 + $0x20] sm:$0xf] %v972_v4 }
 0x23f   : > { %v962_v5 = vpop.permute.xlu0 %961  ;;  %v925_v6 = vpop.permute.xlu2 %924 }
 0x240   : > { %v968_v7 = vrot.slane %v962_v5, 4  ;;  %v929_v8 = vrot.slane %v925_v6, 4 }
 0x242   : > { %v973_v9 = vsel %vm971_vm7, %v962_v5, %v968_v7  ;;  %v934_v10 = vsel %vm930_vm8, %v925_v6, %v929_v8 }
 0x243   : > { %981 = vst [vmem:[#allocation3 + $0x24] sm:$0xf] %v973_v9 }
 0x244   : > { %942 = vst [vmem:[#allocation3 + $0x1c] sm:$0xf] %v934_v10 }
 0x247   : > { %v964_v11 = vpop.permute.xlu0 %963  ;;  %v882_v12 = vpop.permute.xlu2 %881 }
 0x248   : > { %v969_v13 = vrot.slane %v964_v11, 4  ;;  %v887_v14 = vrot.slane %v882_v12, 4 }
 0x24a   : > { %v974_v15 = vsel %vm971_vm7, %v964_v11, %v969_v13  ;;  %v892_v16 = vsel %vm889_vm9, %v882_v12, %v887_v14  ;;  %v2341_v33 = vld [vmem:[#allocation3 + $0x20] sm:$0xff] }
 0x24b   : > { %982 = vst [vmem:[#allocation3 + $0x28] sm:$0xf] %v974_v15 }
 0x24c   : > { %900 = vst [vmem:[#allocation3 + $0x8] sm:$0xf] %v892_v16 }
 0x24f   : > { %v880_v17 = vpop.permute.xlu2 %879  ;;  %v919_v18 = vpop.permute.xlu0 %918 }
 0x250   : > { %v886_v19 = vrot.slane %v880_v17, 4  ;;  %v926_v20 = vrot.slane %v919_v18, 4 }
 0x252   : > { %v891_v21 = vsel %vm889_vm9, %v880_v17, %v886_v19  ;;  %v931_v22 = vsel %vm930_vm8, %v919_v18, %v926_v20 }
 0x253   : > { %899 = vst [vmem:[#allocation3 + $0x4] sm:$0xf] %v891_v21 }
 0x254   : > { %939 = vst [vmem:[#allocation3 + $0x10] sm:$0xf] %v931_v22 }
 0x257   : > { %v966_v23 = vpop.permute.xlu1 %965  ;;  %v1035_v61 = vpop.permute.xlu2 %1034 }
 0x258   : > { %v884_v24 = vpop.permute.xlu0 %883  ;;  %v970_v25 = vrot.slane %v966_v23, 4 }
 0x259   : > { %v888_v26 = vrot.slane %v884_v24, 4 }
 0x25a   : > { %v975_v27 = vsel %vm971_vm7, %v966_v23, %v970_v25 }
 0x25b   : > { %v893_v28 = vsel %vm889_vm9, %v884_v24, %v888_v26  ;;  %983 = vst [vmem:[#allocation3 + $0x2c] sm:$0xf] %v975_v27 }
 0x25c   : > { %901 = vst [vmem:[#allocation3 + $0xc] sm:$0xf] %v893_v28 }
 0x25f   : > { %v923_v29 = vpop.permute.xlu1 %922 }
 0x260   : > { %v928_v30 = vrot.slane %v923_v29, 4  ;;  %v1045_v60 = vpop.permute.xlu0 %1044 }
 0x262   : > { %v933_v31 = vsel %vm930_vm8, %v923_v29, %v928_v30  ;;  %v2342_v32 = vld [vmem:[#allocation3 + $0x28] sm:$0xff] }
 0x263   : > { %941 = vst [vmem:[#allocation3 + $0x18] sm:$0xf] %v933_v31  ;;  %1123 = vmatpush.bf16.msra.mxu2 %v2342_v32  ;;  %v2338_v46 = vld [vmem:[#allocation3 + $0x8] sm:$0xff] }
 0x267   : > { %v921_v34 = vpop.permute.xlu1 %920  ;;  %1124 = vmatpush.bf16.msra.mxu2 %v2341_v33 }
 0x268   : > { %v927_v35 = vrot.slane %v921_v34, 4  ;;  %v1040_v2 = vpop.permute.xlu0 %1039 }
 0x26a   : > { %v932_v36 = vsel %vm930_vm8, %v921_v34, %v927_v35  ;;  %v2340_v37 = vld [vmem:[#allocation3 + $0x18] sm:$0xff] }
 0x26b   : > { %940 = vst [vmem:[#allocation3 + $0x14] sm:$0xf] %v932_v36  ;;  %1125 = vmatpush.bf16.msra.mxu2 %v2340_v37 }
 0x26f   : > { %v878_v38 = vpop.permute.xlu1 %877 }
 0x270   : > { %v885_v39 = vrot.slane %v878_v38, 4  ;;  %v1015_v22 = vpop.permute.xlu0 %1014 }
 0x272   : > { %v890_v40 = vsel %vm889_vm9, %v878_v38, %v885_v39  ;;  %v2339_v43 = vld [vmem:[#allocation3 + $0x10] sm:$0xff] }
 0x273   : > { %898 = vst [vmem:[#allocation3] sm:$0xf] %v890_v40  ;;  %1126 = vmatpush.bf16.msra.mxu2 %v2339_v43 }
 0x277   : > { %1127 = vmatpush.bf16.msra.mxu2 %v2338_v46  ;;  %v1050_v3 = vpop.permute.xlu1 %1049 }
 0x27a   : > { %v2337_v49 = vld [vmem:[#allocation3] sm:$0xff] }
 0x27b   : > { %1128 = vmatpush.bf16.msra.mxu2 %v2337_v49 }
 0x27e   : > { %2211 = vmatmul.msk.bf16.vlgmr.msra.gmra.mxu2 %vm1108_vm10, %v2333_v50 }
 0x27f   : > { %v1025_v11 = vpop.permute.xlu1 %1024 }
 0x287   : > { %v1020_v25 = vpop.permute.xlu1 %1019 }
 0x28e   : > { %2212 = vmatmul.msk.bf16.gmra.mxu2 %vm1108_vm10, %v2334_v53 }
 0x29e   : > { %2213 = vmatmul.msk.bf16.gmra.mxu2 %vm1108_vm10, %v2335_v54 }
 0x2ae   : > { %2214 = vmatmul.msk.bf16.gmra.mxu2 %vm1108_vm10, %v2336_v55 }
 0x301   : > { %v1130_v56 = vpop.f32.mrf.mxu2 }
 0x302   : > { %v1131_v26 = vadd.f32 %v1130_v56, %v1015_v22 }
 0x309   : > { %v1132_v57 = vpop.f32.mrf.mxu2 }
 0x30a   : > { %v1133_v28 = vadd.f32 %v1132_v57, %v1020_v25  ;;  %v2344_v25 = vld [vmem:[%s2669_s5 + $0x8] sm:$0xff] }
 0x311   : > { %v2798_v58 = vpop.f32.mrf.mxu2 }
 0x319   : > { %v2800_v59 = vpop.f32.mrf.mxu2 }
 0x321   : > { %v1140_v62 = vpop.f32.mrf.mxu2 }
 0x322   : > { %v1141_v63 = vadd.f32 %v1140_v62, %v1035_v61 }
 0x324   : > { %v2215_v0 = vmul.f32 -1.442695, %v1141_v63 }
 0x326   : > { %2425 = vpow2.f32 %v2215_v0 }
 0x329   : > { %v1142_v4 = vpop.f32.mrf.mxu2 }
 0x32a   : > { %v1143_v5 = vadd.f32 %v1142_v4, %v1040_v2  ;;  %v1030_v2 = vpop.permute.xlu2 %1029 }
 0x32c   : > { %v2426_v6 = vpop.eup %2425  ;;  %v2216_v7 = vmul.f32 -1.442695, %v1143_v5  ;;  %v1138_v5 = vadd.f32 %v2800_v59, %v1030_v2 }
 0x32d   : > { %v1166_v8 = vadd.f32 1.0, %v2426_v6 }
 0x32e   : > { %2427 = vpow2.f32 %v2216_v7 }
 0x32f   : > { %2429 = vrcp.f32 %v1166_v8  ;;  %v1181_v31 = vand.u32 2147483648, %v1166_v8  ;;  %vm1175_vm12 = vweird.f32 %v1166_v8  ;;  %v1179_v33 = vand.u32 2147483647, %v1166_v8 }
 0x331   : > { %v1145_v9 = vpop.f32.mrf.mxu2  ;;  %v1182_v40 = vor.u32 1.1754944e-38, %v1181_v31  ;;  %vm1180_vm0 = vcmp.eq.f32.partialorder %v1179_v33, 8.507059e+37  ;;  %v1255_v33 = vpop.permute.xlu1 %1254 }
 0x332   : > { %v1146_v10 = vadd.f32 %v1145_v9, %v1045_v60 }
 0x334   : > { %v2428_v12 = vpop.eup %2427  ;;  %v2217_v13 = vmul.f32 -1.442695, %v1146_v10 }
 0x335   : > { %v2430_v14 = vpop.eup %2429  ;;  %v1167_v15 = vadd.f32 1.0, %v2428_v12 }
 0x336   : > { %2431 = vpow2.f32 %v2217_v13  ;;  %v1171_v16 = vmul.f32 %v2430_v14, %v1166_v8  ;;  %vm1176_vm11 = vweird.f32 %v2430_v14 }
 0x337   : > { %2433 = vrcp.f32 %v1167_v15  ;;  %vm2804_vm13 = vmor %vm1175_vm12, %vm1176_vm11  ;;  %v1196_v36 = vand.u32 2147483648, %v1167_v15  ;;  %v1194_v38 = vand.u32 2147483647, %v1167_v15  ;;  %vm1190_vm15 = vweird.f32 %v1167_v15 }
 0x338   : > { %v1172_v17 = vsub.f32 1.0, %v1171_v16 }
 0x339   : > { %v1147_v18 = vpop.f32.mrf.mxu2  ;;  %v1197_v55 = vor.u32 1.1754944e-38, %v1196_v36  ;;  %vm1195_vm2 = vcmp.eq.f32.partialorder %v1194_v38, 8.507059e+37 }
 0x33a   : > { %v1148_v19 = vadd.f32 %v1147_v18, %v1050_v3  ;;  %v1173_v20 = vmul.f32 %v2430_v14, %v1172_v17  ;;  %v1136_v3 = vadd.f32 %v2798_v58, %v1025_v11 }
 0x33c   : > { %v2432_v21 = vpop.eup %2431  ;;  %v2218_v23 = vmul.f32 -1.442695, %v1148_v19  ;;  %v1174_v30 = vadd.f32 %v2430_v14, %v1173_v20 }
 0x33d   : > { %v2434_v24 = vpop.eup %2433  ;;  %v1168_v27 = vadd.f32 1.0, %v2432_v21 }
 0x33e   : > { %2435 = vpow2.f32 %v2218_v23  ;;  %v1186_v29 = vmul.f32 %v2434_v24, %v1167_v15  ;;  %vm1191_vm14 = vweird.f32 %v2434_v24  ;;  %v1178_v37 = vsel %vm2804_vm13, %v2430_v14, %v1174_v30 }
 0x33f   : > { %2437 = vrcp.f32 %v1168_v27  ;;  %vm1192_vm1 = vmor %vm1190_vm15, %vm1191_vm14  ;;  %v1183_v53 = vsel %vm1180_vm0, %v1182_v40, %v1178_v37  ;;  %v1211_v8 = vand.u32 2147483648, %v1168_v27  ;;  %vm1205_vm5 = vweird.f32 %v1168_v27 }
 0x340   : > { %v1187_v32 = vsub.f32 1.0, %v1186_v29  ;;  %2439 = vtanh.f32 %v1131_v26  ;;  %v1209_v9 = vand.u32 2147483647, %v1168_v27  ;;  %vm1312_vm15 = vcmask 261120   ;;  %v2816_v26 = vpop.f32.mrf.mxu3  ;;  %v1265_v29 = vpop.permute.xlu2 %1264 }
 0x341   : > { %2441 = vtanh.f32 %v1133_v28  ;;  %v1212_v16 = vor.u32 1.1754944e-38, %v1211_v8 }
 0x342   : > { %v1188_v35 = vmul.f32 %v2434_v24, %v1187_v32  ;;  %vm1210_vm11 = vcmp.eq.f32.partialorder %v1209_v9, 8.507059e+37  ;;  %v1270_v32 = vpop.permute.xlu0 %1269 }
 0x344   : > { %v2436_v39 = vpop.eup %2435  ;;  %v1189_v43 = vadd.f32 %v2434_v24, %v1188_v35 }
 0x345   : > { %v2438_v46 = vpop.eup %2437  ;;  %v1169_v49 = vadd.f32 1.0, %v2436_v39  ;;  %v2345_v39 = vld [vmem:[%s2669_s5 + $0x10] sm:$0xff] }
 0x346   : > { %v1201_v50 = vmul.f32 %v2438_v46, %v1168_v27  ;;  %v1193_v54 = vsel %vm1192_vm1, %v2434_v24, %v1189_v43  ;;  %v2440_v56 = vpop.eup %2439  ;;  %vm1206_vm3 = vweird.f32 %v2438_v46  ;;  %v2343_v24 = vld [vmem:[%s2669_s5] sm:$0xff] }
 0x347   : > { %2443 = vrcp.f32 %v1169_v49  ;;  %v2442_v57 = vpop.eup %2441  ;;  %v1198_v61 = vsel %vm1195_vm2, %v1197_v55, %v1193_v54  ;;  %v1230_v62 = vmul.f32 %v2440_v56, %v1183_v53  ;;  %vm1207_vm7 = vmor %vm1205_vm5, %vm1206_vm3  ;;  %v1226_v12 = vand.u32 2147483648, %v1169_v49  ;;  %v2346_v54 = vld [vmem:[%s2669_s5 + $0x18] sm:$0xff] }
 0x348   : > { %v1202_v60 = vsub.f32 1.0, %v1201_v50  ;;  %v1231_v63 = vmul.f32 %v2442_v57, %v1198_v61  ;;  %2445 = vtanh.f32 %v1136_v3  ;;  %v1224_v15 = vand.u32 2147483647, %v1169_v49  ;;  %v1260_v37 = vpop.permute.xlu2 %1259 }
 0x349   : > { %2447 = vtanh.f32 %v1138_v5  ;;  %vm1220_vm12 = vweird.f32 %v1169_v49  ;;  %v1227_v11 = vor.u32 1.1754944e-38, %v1226_v12 }
 0x34a   : > { %v1203_v0 = vmul.f32 %v2438_v46, %v1202_v60  ;;  %v1234_v1 = vpack.c.bf16 %v1231_v63, %v1230_v62  ;;  %vm1225_vm14 = vcmp.eq.f32.partialorder %v1224_v15, 8.507059e+37  ;;  %v1529_v15 = vld [vmem:[%s2967_s19 + $0x70] sm:$0xff] }
 0x34c   : > { %v1204_v6 = vadd.f32 %v2438_v46, %v1203_v0 }
 0x34d   : > { %v2444_v4 = vpop.eup %2443 }
 0x34e   : > { %v1216_v7 = vmul.f32 %v2444_v4, %v1169_v49  ;;  %v1208_v13 = vsel %vm1207_vm7, %v2438_v46, %v1204_v6  ;;  %vm1221_vm9 = vweird.f32 %v2444_v4  ;;  %v2446_v17 = vpop.eup %2445 }
 0x34f   : > { %v1213_v59 = vsel %vm1210_vm11, %v1212_v16, %v1208_v13  ;;  %vm1222_vm13 = vmor %vm1220_vm12, %vm1221_vm9  ;;  %v2448_v19 = vpop.eup %2447  ;;  %v1528_v16 = vld [vmem:[%s2967_s19 + $0x68] sm:$0xff] }
 0x350   : > { %v1217_v10 = vsub.f32 1.0, %v1216_v7  ;;  %v1232_v21 = vmul.f32 %v2446_v17, %v1213_v59  ;;  %v1387_v43 = vpop.permute.xlu2 %1386  ;;  %v1527_v59 = vld [vmem:[%s2967_s19 + $0x60] sm:$0xff]  ;;  %v1525_v17 = vld [vmem:[%s2967_s19 + $0x50] sm:$0xff] }
 0x352   : > { %v1218_v14 = vmul.f32 %v2444_v4, %v1217_v10 }
 0x354   : > { %v1219_v58 = vadd.f32 %v2444_v4, %v1218_v14 }
 0x356   : > { %v1223_v18 = vsel %vm1222_vm13, %v2444_v4, %v1219_v58  ;;  %v1530_v58 = vld [vmem:[%s2967_s19 + $0x78] sm:$0xff] }
 0x357   : > { %v1228_v20 = vsel %vm1225_vm14, %v1227_v11, %v1223_v18  ;;  %v1523_v11 = vld [vmem:[%s2967_s19 + $0x40] sm:$0xff]  ;;  %v1526_v18 = vld [vmem:[%s2967_s19 + $0x58] sm:$0xff] }
 0x358   : > { %v1233_v22 = vmul.f32 %v2448_v19, %v1228_v20  ;;  %v1251_v19 = vld [vmem:[%s2674_s0 + $0x38] sm:$0xff]  ;;  %v1524_v20 = vld [vmem:[%s2967_s19 + $0x48] sm:$0xff] }
 0x35a   : > { %v1235_v23 = vpack.c.bf16 %v1233_v22, %v1232_v21  ;;  %v1250_v21 = vld [vmem:[%s2674_s0 + $0x30] sm:$0xff]  ;;  %v1248_v22 = vld [vmem:[%s2674_s0 + $0x20] sm:$0xff] }
 0x35c   : > { %1331 = vmatpush.bf16.msrb.mxu3 %v1235_v23  ;;  %v2301_v23 = vld [vmem:[%s2674_s0 + $0x50] sm:$0xff] }
 0x360   : > { %1332 = vmatpush.bf16.msrb.mxu3 %v1234_v1 }
 0x363   : > { %2235 = vmatmul.msk.bf16.vlgmr.msrb.gmra.mxu3 %vm1312_vm15, %v2343_v24  ;;  %v2302_v24 = vld [vmem:[%s2674_s0 + $0x58] sm:$0xff] }
 0x373   : > { %2236 = vmatmul.msk.bf16.gmra.mxu3 %vm1312_vm15, %v2344_v25  ;;  %v2300_v25 = vld [vmem:[%s2674_s0 + $0x48] sm:$0xff] }
 0x383   : > { %2237 = vmatmul.msk.bf16.gmra.mxu3 %vm1312_vm15, %v2345_v39 }
 0x393   : > { %2238 = vmatmul.msk.bf16.gmra.mxu3 %vm1312_vm15, %v2346_v54 }
 0x3e6   : > { %v1334_v27 = vpop.f32.mrf.mxu3 }
 0x3e7   : > { %v1335_v35 = vadd.f32 %v1334_v27, %v1255_v33  ;;  %v1249_v27 = vld [vmem:[%s2674_s0 + $0x28] sm:$0xff] }
 0x3ee   : > { %v1336_v28 = vpop.f32.mrf.mxu3 }
 0x3ef   : > { %v1337_v38 = vadd.f32 %v1336_v28, %v1260_v37  ;;  %v2299_v28 = vld [vmem:[%s2674_s0 + $0x40] sm:$0xff] }
 0x3f6   : > { %v1339_v30 = vpop.f32.mrf.mxu3 }
 0x3f7   : > { %v1340_v31 = vadd.f32 %v1339_v30, %v1265_v29  ;;  %v710_v29 = vld [vmem:[%s2644_s13 + $0x8] sm:$0xff] }
 0x3f8   : > { %v1844_v30 = vld [vmem:[%s2684_s6 + $0x8] sm:$0xff] }
 0x3f9   : > { %1370 = vrot.lane.b32.xlu0 %v1340_v31, %s2519_s26  ;;  %v1843_v31 = vld [vmem:[%s2684_s6] sm:$0xff] }
 0x3fe   : > { %v1341_v34 = vpop.f32.mrf.mxu3 }
 0x3ff   : > { %v1342_v36 = vadd.f32 %v1341_v34, %v1270_v32 }
 0x401   : > { %1372 = vrot.lane.b32.xlu1 %v1342_v36, %s2519_s26  ;;  %1366 = vrot.lane.b32.xlu0 %v1335_v35, %s2519_s26 }
 0x409   : > { %1368 = vrot.lane.b32.xlu1 %v1337_v38, %s2519_s26 }
 0x46b   : > { %v1371_v40 = vpop.permute.xlu0 %1370 }
 0x46c   : > { %v1382_v46 = vadd.f32 %v1371_v40, %v2746_v47  ;;  %v1383_v49 = vadd.f32 %v1371_v40, %v2748_v48 }
 0x46e   : > { %v1393_v50 = vmul.f32 %v1387_v43, %v1382_v46  ;;  %v1394_v53 = vmul.f32 %v1387_v43, %v1383_v49 }
 0x470   : > { %1401 = vst.msk [vmem:[#allocation2 + $0x20] sm:$0xff] %vm852_vm6, %v1393_v50 }
 0x471   : > { %1402 = vst.msk [vmem:[#allocation2 + $0x28] sm:$0xff] %vm753_vm4, %v1394_v53 }
 0x473   : > { %v1367_v55 = vpop.permute.xlu0 %1366  ;;  %v1373_v56 = vpop.permute.xlu1 %1372 }
 0x474   : > { %v1378_v57 = vadd.f32 %v1367_v55, %v2740_v44  ;;  %v1379_v60 = vadd.f32 %v1367_v55, %v2742_v45  ;;  %v1384_v61 = vadd.f32 %v1373_v56, %v2755_v51  ;;  %v1385_v62 = vadd.f32 %v1373_v56, %v2757_v52 }
 0x476   : > { %v1389_v47 = vmul.f32 %v1387_v43, %v1378_v57  ;;  %v1390_v48 = vmul.f32 %v1387_v43, %v1379_v60  ;;  %v1395_v63 = vmul.f32 %v1387_v43, %v1384_v61  ;;  %v1396_v0 = vmul.f32 %v1387_v43, %v1385_v62 }
 0x477   : > { %v1465_v1 = vld [vmem:[#allocation2 + $0x20] sm:$0xff] }
 0x478   : > { %1397 = vst.msk [vmem:[#allocation2] sm:$0xff] %vm852_vm6, %v1389_v47  ;;  %v1466_v2 = vld [vmem:[#allocation2 + $0x28] sm:$0xff] }
 0x479   : > { %1398 = vst.msk [vmem:[#allocation2 + $0x8] sm:$0xff] %vm753_vm4, %v1390_v48  ;;  %v1471_v3 = vpack.c.bf16 %v1466_v2, %v1465_v1 }
 0x47a   : > { %1403 = vst.msk [vmem:[#allocation2 + $0x30] sm:$0xff] %vm852_vm6, %v1395_v63 }
 0x47b   : > { %1404 = vst.msk [vmem:[#allocation2 + $0x38] sm:$0xff] %vm753_vm4, %v1396_v0  ;;  %1481 = vrot.lane.b32.xlu2 %v1471_v3, %s2523_s28  ;;  %v1369_v44 = vpop.permute.xlu1 %1368 }
 0x47c   : > { %v1380_v45 = vadd.f32 %v1369_v44, %v2734_v41  ;;  %v1381_v51 = vadd.f32 %v1369_v44, %v2736_v42 }
 0x47e   : > { %v1391_v52 = vmul.f32 %v1387_v43, %v1380_v45  ;;  %v1392_v4 = vmul.f32 %v1387_v43, %v1381_v51  ;;  %v2347_v51 = vld [vmem:[%s2664_s27 + $0x20] sm:$0xff] }
 0x47f   : > { %v1409_v5 = vld [vmem:[#allocation2] sm:$0xff] }
 0x480   : > { %1399 = vst.msk [vmem:[#allocation2 + $0x10] sm:$0xff] %vm852_vm6, %v1391_v52  ;;  %v1462_v6 = vld [vmem:[#allocation2 + $0x8] sm:$0xff] }
 0x481   : > { %v1412_v7 = vld [vmem:[#allocation2 + $0x30] sm:$0xff]  ;;  %1400 = vst.msk [vmem:[#allocation2 + $0x18] sm:$0xff] %vm753_vm4, %v1392_v4  ;;  %v1469_v8 = vpack.c.bf16 %v1462_v6, %v1409_v5  ;;  %vm1489_vm4 = vcmask 1014784   ;;  %v2348_v52 = vld [vmem:[%s2664_s27 + $0x28] sm:$0xff] }
 0x482   : > { %v1468_v9 = vld [vmem:[#allocation2 + $0x38] sm:$0xff]  ;;  %v2368_v10 = vpack.c.bf16 %v1412_v7, %v1465_v1  ;;  %v2349_v4 = vld [vmem:[%s2664_s27 + $0x30] sm:$0xff] }
 0x483   : > { %1477 = vrot.lane.b32.xlu1 %v1469_v8, %s2523_s28  ;;  %v1472_v12 = vpack.c.bf16 %v1468_v9, %v1412_v7 }
 0x484   : > { %2370 = vst [vmem:[#allocation3 + $0x8] sm:$0xff] %v2368_v10  }
 0x485   : > { %1483 = vrot.lane.b32.xlu0 %v1472_v12, %s2523_s28 }
 0x487   : > { %v1410_v41 = vld [vmem:[#allocation2 + $0x10] sm:$0xff] }
 0x488   : > { %v1464_v42 = vld [vmem:[#allocation2 + $0x18] sm:$0xff]  ;;  %v2363_v13 = vpack.c.bf16 %v1410_v41, %v1409_v5 }
 0x489   : > { %v1470_v14 = vpack.c.bf16 %v1464_v42, %v1410_v41  ;;  %v2350_v5 = vld [vmem:[%s2664_s27 + $0x38] sm:$0xff] }
 0x48a   : > { %2364 = vst [vmem:[#allocation3] sm:$0xff] %v2363_v13  }
 0x48b   : > { %1443 = vrot.lane.b32.xlu1 %v1472_v12, %s2521_s22  ;;  %1479 = vrot.lane.b32.xlu2 %v1470_v14, %s2523_s28  ;;  %v2352_v44 = vld [vmem:[#allocation3 + $0x8] sm:$0xff] }
 0x48d   : > { %1441 = vrot.lane.b32.xlu0 %v1471_v3, %s2521_s22 }
 0x491   : > { %v2351_v45 = vld [vmem:[#allocation3] sm:$0xff] }
 0x493   : > { %1563 = vperm.xlu1 %2422, %v1529_v15   ;;  %1437 = vrot.lane.b32.xlu2 %v1469_v8, %s2521_s22 }
 0x495   : > { %1439 = vrot.lane.b32.xlu0 %v1470_v14, %s2521_s22 }
 0x49b   : > { %1558 = vperm.xlu1 %2422, %v1528_v16   ;;  %1568 = vperm.xlu2 %2423, %v1530_v58  }
 0x49d   : > { %1553 = vperm.xlu0 %2421, %v1527_v59  }
 0x4a3   : > { %1533 = vperm.xlu1 %2422, %v1523_v11   ;;  %1543 = vperm.xlu2 %2423, %v1525_v17  }
 0x4a5   : > { %1548 = vperm.xlu0 %2421, %v1526_v18  }
 0x4ab   : > { %1289 = vperm.xlu1 %2422, %v1251_v19   ;;  %1538 = vperm.xlu2 %2423, %v1524_v20  }
 0x4ad   : > { %1284 = vperm.xlu0 %2421, %v1250_v21  }
 0x4b3   : > { %1274 = vperm.xlu1 %2422, %v1248_v22   ;;  %1776 = vperm.xlu2 %2423, %v2301_v23  }
 0x4b5   : > { %1781 = vperm.xlu0 %2421, %v2302_v24  }
 0x4bb   : > { %1771 = vperm.xlu1 %2422, %v2300_v25   ;;  %1279 = vperm.xlu2 %2423, %v1249_v27  }
 0x4bd   : > { %1766 = vperm.xlu0 %2421, %v2299_v28  }
 0x4c3   : > { %718 = vperm.xlu1 %2422, %v710_v29   ;;  %1852 = vperm.xlu2 %2423, %v1844_v30  }
 0x4cb   : > { %1847 = vperm.xlu2 %2423, %v1843_v31  }
 0x4d5   : > { %v1482_v32 = vpop.permute.xlu2 %1481 }
 0x4d6   : > { %v1487_v33 = vrot.slane %v1482_v32, 4 }
 0x4d8   : > { %v1492_v34 = vsel %vm1489_vm4, %v1482_v32, %v1487_v33 }
 0x4d9   : > { %1500 = vst [vmem:[#allocation3 + $0x28] sm:$0xf] %v1492_v34 }
 0x4e5   : > { %v1480_v35 = vpop.permute.xlu2 %1479 }
 0x4e6   : > { %v1486_v36 = vrot.slane %v1480_v35, 4 }
 0x4e8   : > { %v1491_v37 = vsel %vm1489_vm4, %v1480_v35, %v1486_v36 }
 0x4e9   : > { %1499 = vst [vmem:[#allocation3 + $0x24] sm:$0xf] %v1491_v37 }
 0x4ed   : > { %v1438_v38 = vpop.permute.xlu2 %1437 }
 0x4ee   : > { %v1445_v39 = vrot.slane %v1438_v38, 4 }
 0x4f0   : > { %v1449_v40 = vsel %vm930_vm8, %v1438_v38, %v1445_v39 }
 0x4f1   : > { %1457 = vst [vmem:[#allocation3 + $0x10] sm:$0xf] %v1449_v40 }
 0x4f5   : > { %v1478_v43 = vpop.permute.xlu1 %1477  ;;  %v1569_v14 = vpop.permute.xlu2 %1568 }
 0x4f6   : > { %v1485_v46 = vrot.slane %v1478_v43, 4 }
 0x4f7   : > { %v1484_v49 = vpop.permute.xlu0 %1483 }
 0x4f8   : > { %v1488_v50 = vrot.slane %v1484_v49, 4  ;;  %v1490_v53 = vsel %vm1489_vm4, %v1478_v43, %v1485_v46 }
 0x4f9   : > { %1498 = vst [vmem:[#allocation3 + $0x20] sm:$0xf] %v1490_v53 }
 0x4fa   : > { %v1493_v54 = vsel %vm1489_vm4, %v1484_v49, %v1488_v50 }
 0x4fb   : > { %1501 = vst [vmem:[#allocation3 + $0x2c] sm:$0xf] %v1493_v54 }
 0x4fd   : > { %v1444_v55 = vpop.permute.xlu1 %1443  ;;  %v1544_v20 = vpop.permute.xlu2 %1543 }
 0x4fe   : > { %v1448_v56 = vrot.slane %v1444_v55, 4 }
 0x4ff   : > { %v1442_v57 = vpop.permute.xlu0 %1441 }
 0x500   : > { %v1447_v60 = vrot.slane %v1442_v57, 4  ;;  %v1452_v61 = vsel %vm930_vm8, %v1444_v55, %v1448_v56  ;;  %v2355_v48 = vld [vmem:[#allocation3 + $0x20] sm:$0xff] }
 0x501   : > { %1460 = vst [vmem:[#allocation3 + $0x1c] sm:$0xf] %v1452_v61 }
 0x502   : > { %v1451_v62 = vsel %vm930_vm8, %v1442_v57, %v1447_v60  ;;  %v2356_v47 = vld [vmem:[#allocation3 + $0x28] sm:$0xff] }
 0x503   : > { %1459 = vst [vmem:[#allocation3 + $0x18] sm:$0xf] %v1451_v62  ;;  %1641 = vmatpush.bf16.msra.mxu0 %v2356_v47 }
 0x505   : > { %v1564_v10 = vpop.permute.xlu1 %1563  ;;  %v1539_v35 = vpop.permute.xlu2 %1538 }
 0x507   : > { %v1440_v63 = vpop.permute.xlu0 %1439  ;;  %1642 = vmatpush.bf16.msra.mxu0 %v2355_v48 }
 0x508   : > { %v1446_v0 = vrot.slane %v1440_v63, 4 }
 0x50a   : > { %v1450_v1 = vsel %vm930_vm8, %v1440_v63, %v1446_v0  ;;  %v2354_v2 = vld [vmem:[#allocation3 + $0x18] sm:$0xff] }
 0x50b   : > { %1458 = vst [vmem:[#allocation3 + $0x14] sm:$0xf] %v1450_v1  ;;  %1643 = vmatpush.bf16.msra.mxu0 %v2354_v2 }
 0x50d   : > { %v1559_v15 = vpop.permute.xlu1 %1558 }
 0x50f   : > { %v1554_v12 = vpop.permute.xlu0 %1553 }
 0x512   : > { %v2353_v3 = vld [vmem:[#allocation3 + $0x10] sm:$0xff] }
 0x513   : > { %1644 = vmatpush.bf16.msra.mxu0 %v2353_v3 }
 0x515   : > { %v1534_v32 = vpop.permute.xlu1 %1533 }
 0x517   : > { %1645 = vmatpush.bf16.msra.mxu0 %v2352_v44 }
 0x51b   : > { %1646 = vmatpush.bf16.msra.mxu0 %v2351_v45 }
 0x51e   : > { %2287 = vmatmul.msk.bf16.vlgmr.msra.gmra.mxu0 %vm1108_vm10, %v2347_v51 }
 0x52e   : > { %2288 = vmatmul.msk.bf16.gmra.mxu0 %vm1108_vm10, %v2348_v52 }
 0x53e   : > { %2289 = vmatmul.msk.bf16.gmra.mxu0 %vm1108_vm10, %v2349_v4 }
 0x54e   : > { %2290 = vmatmul.msk.bf16.gmra.mxu0 %vm1108_vm10, %v2350_v5 }
 0x59b   : > { %v1648_v6 = vpop.f32.mrf.mxu0 }
 0x59c   : > { %v1649_v36 = vadd.f32 %v1648_v6, %v1534_v32  ;;  %v1549_v6 = vpop.permute.xlu0 %1548  ;;  %v1290_v32 = vpop.permute.xlu1 %1289 }
 0x5a3   : > { %v1650_v7 = vpop.f32.mrf.mxu0 }
 0x5a4   : > { %v1651_v38 = vadd.f32 %v1650_v7, %v1539_v35  ;;  %v1777_v35 = vpop.permute.xlu2 %1776 }
 0x5ab   : > { %v2881_v8 = vpop.f32.mrf.mxu0 }
 0x5ac   : > { %v1654_v7 = vadd.f32 %v2881_v8, %v1544_v20 }
 0x5b3   : > { %v2883_v9 = vpop.f32.mrf.mxu0 }
 0x5bb   : > { %v1658_v41 = vpop.f32.mrf.mxu0 }
 0x5bc   : > { %v1659_v42 = vadd.f32 %v1658_v41, %v1554_v12  ;;  %v1656_v12 = vadd.f32 %v2883_v9, %v1549_v6 }
 0x5be   : > { %v2291_v13 = vmul.f32 -1.442695, %v1659_v42 }
 0x5c0   : > { %2449 = vpow2.f32 %v2291_v13 }
 0x5c3   : > { %v1660_v16 = vpop.f32.mrf.mxu0 }
 0x5c4   : > { %v1661_v58 = vadd.f32 %v1660_v16, %v1559_v15 }
 0x5c6   : > { %v2450_v59 = vpop.eup %2449  ;;  %v2292_v11 = vmul.f32 -1.442695, %v1661_v58 }
 0x5c7   : > { %v1684_v17 = vadd.f32 1.0, %v2450_v59 }
 0x5c8   : > { %2451 = vpow2.f32 %v2292_v11 }
 0x5c9   : > { %2453 = vrcp.f32 %v1684_v17  ;;  %v1699_v43 = vand.u32 2147483648, %v1684_v17  ;;  %vm1693_vm8 = vweird.f32 %v1684_v17  ;;  %v1697_v49 = vand.u32 2147483647, %v1684_v17 }
 0x5cb   : > { %v1663_v18 = vpop.f32.mrf.mxu0  ;;  %v1700_v60 = vor.u32 1.1754944e-38, %v1699_v43  ;;  %vm1698_vm2 = vcmp.eq.f32.partialorder %v1697_v49, 8.507059e+37 }
 0x5cc   : > { %v1664_v19 = vadd.f32 %v1663_v18, %v1564_v10 }
 0x5ce   : > { %v2452_v21 = vpop.eup %2451  ;;  %v2293_v22 = vmul.f32 -1.442695, %v1664_v19 }
 0x5cf   : > { %v2454_v23 = vpop.eup %2453  ;;  %v1685_v24 = vadd.f32 1.0, %v2452_v21 }
 0x5d0   : > { %2455 = vpow2.f32 %v2293_v22  ;;  %v1689_v25 = vmul.f32 %v2454_v23, %v1684_v17  ;;  %vm1694_vm6 = vweird.f32 %v2454_v23 }
 0x5d1   : > { %2457 = vrcp.f32 %v1685_v24  ;;  %vm2885_vm10 = vmor %vm1693_vm8, %vm1694_vm6  ;;  %v1714_v54 = vand.u32 2147483648, %v1685_v24  ;;  %v1712_v56 = vand.u32 2147483647, %v1685_v24  ;;  %vm1708_vm1 = vweird.f32 %v1685_v24 }
 0x5d2   : > { %v1690_v27 = vsub.f32 1.0, %v1689_v25 }
 0x5d3   : > { %v1665_v28 = vpop.f32.mrf.mxu0  ;;  %v1715_v1 = vor.u32 1.1754944e-38, %v1714_v54  ;;  %vm1713_vm5 = vcmp.eq.f32.partialorder %v1712_v56, 8.507059e+37 }
 0x5d4   : > { %v1666_v29 = vadd.f32 %v1665_v28, %v1569_v14  ;;  %v1691_v30 = vmul.f32 %v2454_v23, %v1690_v27  ;;  %v2357_v27 = vld [vmem:[%s2669_s5 + $0x20] sm:$0xff]  ;;  %v2358_v28 = vld [vmem:[%s2669_s5 + $0x28] sm:$0xff] }
 0x5d6   : > { %v2456_v31 = vpop.eup %2455  ;;  %v2294_v33 = vmul.f32 -1.442695, %v1666_v29  ;;  %v1692_v40 = vadd.f32 %v2454_v23, %v1691_v30  ;;  %v1344_v29 = vpop.f32.mrf.mxu3 }
 0x5d7   : > { %v2458_v34 = vpop.eup %2457  ;;  %v1686_v37 = vadd.f32 1.0, %v2456_v31 }
 0x5d8   : > { %2459 = vpow2.f32 %v2294_v33  ;;  %v1704_v39 = vmul.f32 %v2458_v34, %v1685_v24  ;;  %vm1709_vm0 = vweird.f32 %v2458_v34  ;;  %v1696_v55 = vsel %vm2885_vm10, %v2454_v23, %v1692_v40  ;;  %v1285_v33 = vpop.permute.xlu0 %1284  ;;  %v1280_v40 = vpop.permute.xlu2 %1279 }
 0x5d9   : > { %2461 = vrcp.f32 %v1686_v37  ;;  %vm1710_vm3 = vmor %vm1708_vm1, %vm1709_vm0  ;;  %v1701_v63 = vsel %vm1698_vm2, %v1700_v60, %v1696_v55  ;;  %v1729_v13 = vand.u32 2147483648, %v1686_v37  ;;  %vm1723_vm9 = vweird.f32 %v1686_v37 }
 0x5da   : > { %v1705_v46 = vsub.f32 1.0, %v1704_v39  ;;  %2463 = vtanh.f32 %v1649_v36  ;;  %v1727_v14 = vand.u32 2147483647, %v1686_v37 }
 0x5db   : > { %2465 = vtanh.f32 %v1651_v38  ;;  %v1730_v17 = vor.u32 1.1754944e-38, %v1729_v13 }
 0x5dc   : > { %v1706_v53 = vmul.f32 %v2458_v34, %v1705_v46  ;;  %vm1728_vm13 = vcmp.eq.f32.partialorder %v1727_v14, 8.507059e+37 }
 0x5de   : > { %v2460_v57 = vpop.eup %2459  ;;  %v1707_v61 = vadd.f32 %v2458_v34, %v1706_v53  ;;  %v1346_v31 = vpop.f32.mrf.mxu3 }
 0x5df   : > { %v2462_v62 = vpop.eup %2461  ;;  %v1687_v47 = vadd.f32 1.0, %v2460_v57  ;;  %v1347_v54 = vadd.f32 %v1346_v31, %v1280_v40 }
 0x5e0   : > { %v1719_v48 = vmul.f32 %v2462_v62, %v1686_v37  ;;  %v1711_v0 = vsel %vm1710_vm3, %v2458_v34, %v1707_v61  ;;  %v2464_v2 = vpop.eup %2463  ;;  %vm1724_vm7 = vweird.f32 %v2462_v62  ;;  %v1275_v37 = vpop.permute.xlu1 %1274 }
 0x5e1   : > { %2467 = vrcp.f32 %v1687_v47  ;;  %v2466_v3 = vpop.eup %2465  ;;  %v1716_v45 = vsel %vm1713_vm5, %v1715_v1, %v1711_v0  ;;  %v1748_v51 = vmul.f32 %v2464_v2, %v1701_v63  ;;  %vm1725_vm11 = vmor %vm1723_vm9, %vm1724_vm7  ;;  %v1744_v16 = vand.u32 2147483648, %v1687_v47  ;;  %v1782_v38 = vpop.permute.xlu0 %1781  ;;  %v2475_v1 = vld [vmem:[%s2966_s7] ss:$0 sm:$0xff] }
 0x5e2   : > { %v1720_v44 = vsub.f32 1.0, %v1719_v48  ;;  %v1749_v52 = vmul.f32 %v2466_v3, %v1716_v45  ;;  %2469 = vtanh.f32 %v1654_v7  ;;  %v1742_v11 = vand.u32 2147483647, %v1687_v47  ;;  %v1853_v6 = vpop.permute.xlu2 %1852 }
 0x5e3   : > { %2471 = vtanh.f32 %v1656_v12  ;;  %vm1738_vm14 = vweird.f32 %v1687_v47  ;;  %v1745_v18 = vor.u32 1.1754944e-38, %v1744_v16 }
 0x5e4   : > { %v1721_v4 = vmul.f32 %v2462_v62, %v1720_v44  ;;  %v1752_v5 = vpack.c.bf16 %v1749_v52, %v1748_v51  ;;  %vm1743_vm6 = vcmp.eq.f32.partialorder %v1742_v11, 8.507059e+37 }
 0x5e6   : > { %v1722_v41 = vadd.f32 %v2462_v62, %v1721_v4  ;;  %v1349_v36 = vpop.f32.mrf.mxu3  ;;  %v2359_v4 = vld [vmem:[%s2679_s14] sm:$0xff] }
 0x5e7   : > { %v2468_v10 = vpop.eup %2467  ;;  %v1350_v50 = vadd.f32 %v1349_v36, %v1285_v33 }
 0x5e8   : > { %v1734_v42 = vmul.f32 %v2468_v10, %v1687_v47  ;;  %v1726_v58 = vsel %vm1725_vm11, %v2462_v62, %v1722_v41  ;;  %vm1739_vm12 = vweird.f32 %v2468_v10  ;;  %v2470_v19 = vpop.eup %2469  ;;  %v1772_v49 = vpop.permute.xlu1 %1771  ;;  %v1345_v47 = vadd.f32 %v1344_v29, %v1275_v37 }
 0x5e9   : > { %v1731_v9 = vsel %vm1728_vm13, %v1730_v17, %v1726_v58  ;;  %vm1740_vm4 = vmor %vm1738_vm14, %vm1739_vm12  ;;  %v2472_v21 = vpop.eup %2471  ;;  %v1767_v55 = vpop.permute.xlu0 %1766 }
 0x5ea   : > { %v1735_v15 = vsub.f32 1.0, %v1734_v42  ;;  %v1750_v23 = vmul.f32 %v2470_v19, %v1731_v9  ;;  %v1848_v16 = vpop.permute.xlu2 %1847 }
 0x5ec   : > { %v1736_v59 = vmul.f32 %v2468_v10, %v1735_v15 }
 0x5ee   : > { %v1737_v8 = vadd.f32 %v2468_v10, %v1736_v59  ;;  %v1351_v46 = vpop.f32.mrf.mxu3 }
 0x5ef   : > { %v1352_v57 = vadd.f32 %v1351_v46, %v1290_v32 }
 0x5f0   : > { %v1741_v20 = vsel %vm1740_vm4, %v2468_v10, %v1737_v8  ;;  %v719_v12 = vpop.permute.xlu1 %718 }
 0x5f1   : > { %v1746_v22 = vsel %vm1743_vm6, %v1745_v18, %v1741_v20  ;;  %v749_v13 = vadd.f32 %v2816_v26, %v719_v12 }
 0x5f2   : > { %v1751_v24 = vmul.f32 %v2472_v21, %v1746_v22 }
 0x5f3   : > { %v752_v14 = vmul.f32 %v2475_v1, %v749_v13 }
 0x5f4   : > { %v1753_v25 = vpack.c.bf16 %v1751_v24, %v1750_v23  ;;  %v1884_v23 = vld [vmem:[%s2694_s20] sm:$0x1] }
 0x5f6   : > { %1806 = vmatpush.bf16.msrb.mxu1 %v1753_v25 }
 0x5fa   : > { %1807 = vmatpush.bf16.msrb.mxu1 %v1752_v5 }
 0x5fd   : > { %2311 = vmatmul.msk.bf16.vlgmr.msrb.gmra.mxu1 %vm1312_vm15, %v2357_v27 }
 0x60d   : > { %2312 = vmatmul.msk.bf16.gmra.mxu1 %vm1312_vm15, %v2358_v28 }
 0x67a   : > { %v1809_v30 = vpop.f32.mrf.mxu1 }
 0x67b   : > { %v1810_v60 = vadd.f32 %v1809_v30, %v1767_v55 }
 0x67d   : > { %v1823_v0 = vadd.f32 %v1810_v60, %v1345_v47 }
 0x67f   : > { %v1837_v51 = vmul.f32 %v2475_v1, %v1823_v0 }
 0x682   : > { %v1811_v34 = vpop.f32.mrf.mxu1 }
 0x683   : > { %v1812_v53 = vadd.f32 %v1811_v34, %v1772_v49 }
 0x685   : > { %v1824_v48 = vadd.f32 %v1812_v53, %v1347_v54 }
 0x687   : > { %v1838_v44 = vmul.f32 %v2475_v1, %v1824_v48 }
 0x689   : > { %v1841_v52 = vpack.c.bf16 %v1838_v44, %v1837_v51 }
 0x68a   : > { %v1814_v39 = vpop.f32.mrf.mxu1 }
 0x68b   : > { %v1815_v43 = vadd.f32 %v1814_v39, %v1777_v35 }
 0x68d   : > { %v1825_v61 = vadd.f32 %v1815_v43, %v1350_v50 }
 0x68f   : > { %v1839_v2 = vmul.f32 %v2475_v1, %v1825_v61 }
 0x692   : > { %v1816_v56 = vpop.f32.mrf.mxu1 }
 0x693   : > { %v1817_v62 = vadd.f32 %v1816_v56, %v1782_v38 }
 0x695   : > { %v1826_v63 = vadd.f32 %v1817_v62, %v1352_v57 }
 0x697   : > { %v1840_v3 = vmul.f32 %v2475_v1, %v1826_v63 }
 0x699   : > { %v1842_v45 = vpack.c.bf16 %v1840_v3, %v1839_v2 }
 0x69b   : > { %1869 = vmatpush.bf16.msra.mxu1 %v1842_v45 }
 0x69f   : > { %1870 = vmatpush.bf16.msra.mxu1 %v1841_v52 }
 0x6a2   : > { %2317 = vmatmul.msk.bf16.vlgmr.msra.gmra.mxu1 %vm1312_vm15, %v2359_v4  ;;  %vm1897_vm15 = vcmask 0  }
 0x71f   : > { %v1872_v5 = vpop.f32.mrf.mxu1 }
 0x720   : > { %v1873_v58 = vadd.f32 %v1872_v5, %v1848_v16 }
 0x727   : > { %v1874_v7 = vpop.f32.mrf.mxu1 }
 0x728   : > { %v1875_v10 = vadd.f32 %v1874_v7, %v1853_v6 }
 0x72a   : > { %v1877_v41 = vmul.f32 1.442695, %v1875_v10  ;;  %v1885_v42 = vmul.f32 %v2475_v1, %v1875_v10 }
 0x72c   : > { %2473 = vpow2.f32 %v1877_v41  ;;  %1886 = vadd.xlane.f32.xlu0 %v1885_v42 }
 0x732   : > { %v2474_v15 = vpop.eup %2473 }
 0x733   : > { %v1879_v59 = vmul.f32 %v2474_v15, %v752_v14 }
 0x735   : > { %v1880_v11 = vadd.f32 %v1879_v59, %v1873_v58 }
 0x737   : > { %v1881_v17 = vmul.f32 %v2475_v1, %v1880_v11 }
 0x739   : > { %1883 = vst [vmem:[%s2689_s18 + $0x8] sm:$0xff] %v1881_v17 }
 0x79f   : > { %v1887_v8 = vpop.xlane.xlu0 %1886 }
 0x7a0   : > { %v1888_v9 = vrot.slane %v1887_v8, 4 }
 0x7a2   : > { %v1889_v18 = vadd.f32 %v1888_v9, %v1887_v8 }
 0x7a4   : > { %v1890_v19 = vrot.slane %v1889_v18, 2 }
 0x7a6   : > { %v1891_v20 = vadd.f32 %v1890_v19, %v1889_v18 }
 0x7a8   : > { %v1892_v21 = vrot.slane %v1891_v20, 1 }
 0x7aa   : > { %v1893_v22 = vadd.f32 %v1892_v21, %v1891_v20 }
 0x7ac   : > { %2371 = vpush %v1893_v22 }
 0x7dd   : > { %s2372_s0 = spop %2371 }
 0x7de   : > { %v1895_v26 = vstv %s2372_s0 }
 0x7df   : > { %v1896_v24 = vadd.f32 %v1895_v26, %v1884_v23 }
 0x7e1   : > { %1898 = vst.msk [vmem:[%s2694_s20] sm:$0x1] %vm1897_vm15, %v1896_v24 }
 0x7e2 PF: > { %s2972_s5 = sld [smem:[#allocation8_spill]] }
 0x7e3   : > { %s2973_s25 = sld [smem:[#allocation6_spill]] }
 0x7e4   : > { %s2974_s26 = sld [smem:[#allocation7_spill]] }
 0x7e5   : > { %s2975_s27 = sld [smem:[#allocation9_spill]] }
 0x7e6   : > { %s2976_s28 = sld [smem:[#allocation10_spill]] }
 0x7e8   : > { %s24_s29 = sadd.s32 1, %s2972_s5  }
 0x7e9   : > { %p21_p8 = scmp.ge.s32.totalorder %s24_s29, 6  }
 0x7eb   :  { %23 = sbr.rel (!%p21_p8) target bundleno = 10 (0xa), region = 150 }

</bundles_post_ra>
